<compile_context>
chip_gen: v7x
topology: tpu7x:2x2x1
jax: 0.10.0
libtpu: 0.0.40
codegen_flags: <defaults>
</compile_context>

<pallas_src>
import functools
import math

import jax
import jax.numpy as jnp
from jax import lax
from jax.experimental import pallas as pl
from jax.experimental.pallas import tpu as pltpu

# ----------------------- tiny, deterministic config -----------------------
VOCAB = 64
PAD_ID = 1            # RoBERTa padding_idx; attention_mask = (ids != 1)
HIDDEN = 32
N_LAYERS = 2
N_HEADS = 2
HEAD_DIM = HIDDEN // N_HEADS
FFN = 64
POS_TABLE = 16        # >= SEQ + PAD_ID + 2
LSTM_HIDDEN = 128
NUM_CLASSES = 5
SEQ = 8
MAX_ANSWER_LEN = 8    # == SEQ so logits.view(-1, max_answer_length, C) is valid
BATCH = 2
LN_EPS = 1e-5


def _full_spec(shape):
  # One full-array block per grid step (grid=(1,)); block == full dims so the
  # (8,128) divisibility rule does not apply.
  return pl.BlockSpec(shape, lambda i: (0,) * len(shape))


# --------------------------- in-kernel helpers ------------------------------
def _layernorm(x, g, b):
  mu = jnp.mean(x, axis=-1, keepdims=True)
  var = jnp.mean((x - mu) ** 2, axis=-1, keepdims=True)
  return (x - mu) * lax.rsqrt(var + LN_EPS) * g + b


def _erf(x):
  # Abramowitz & Stegun 7.1.26 rational approximation (|err| < 1.5e-7); uses
  # only exp + polynomials so it lowers cleanly on all TPU generations while
  # matching RoBERTa's exact erf-GELU far closer than the tanh approximation.
  a1, a2, a3, a4, a5 = (0.254829592, -0.284496736, 1.421413741,
                        -1.453152027, 1.061405429)
  p = 0.3275911
  sign = jnp.where(x < 0.0, -1.0, 1.0)
  xa = jnp.abs(x)
  t = 1.0 / (1.0 + p * xa)
  poly = ((((a5 * t + a4) * t + a3) * t + a2) * t + a1) * t
  return sign * (1.0 - poly * jnp.exp(-xa * xa))


def _gelu(x):
  return 0.5 * x * (1.0 + _erf(x * (1.0 / math.sqrt(2.0))))


# ------------------------------ fused kernel --------------------------------
def _clue_kernel(ids_ref, pos_ref, maskf_ref,
                 wemb_ref, pemb_ref, temb_ref, eln_g_ref, eln_b_ref,
                 wqkv_ref, bqkv_ref, wo_ref, bo_ref,
                 ln1_g_ref, ln1_b_ref, w1_ref, b1_ref, w2_ref, b2_ref,
                 ln2_g_ref, ln2_b_ref,
                 wih_ref, bih_ref, whh_ref, bhh_ref, fcw_ref, fcb_ref,
                 out_ref, *, batch, seq):
  bs = batch * seq

  ids = ids_ref[...]                    # [BS, 1] int32
  pos = pos_ref[...]                    # [BS, 1] int32
  maskf = maskf_ref[...]                # [B, S]  float32 (1 = real token)

  # ---- embeddings via one-hot matmuls (exact gather, MXU-friendly) ----
  oh_w = (lax.broadcasted_iota(jnp.int32, (bs, VOCAB), 1) == ids
          ).astype(jnp.float32)
  oh_p = (lax.broadcasted_iota(jnp.int32, (bs, POS_TABLE), 1) == pos
          ).astype(jnp.float32)
  emb = (jnp.dot(oh_w, wemb_ref[...], preferred_element_type=jnp.float32)
         + jnp.dot(oh_p, pemb_ref[...], preferred_element_type=jnp.float32)
         + temb_ref[...])
  h = _layernorm(emb, eln_g_ref[...], eln_b_ref[...])        # [BS, H]

  # additive attention bias per batch (0 / -1e9), constant across layers:
  # hoisted out of the layer loop so it is built exactly once.
  key_bias = [(maskf[b:b + 1, :] - 1.0) * 1e9 for b in range(batch)]  # [1, S]

  # ---- transformer encoder layers (post-LN, fused QKV, in-kernel heads) ----
  scale = 1.0 / math.sqrt(HEAD_DIM)
  for l in range(N_LAYERS):
    qkv = jnp.dot(h, wqkv_ref[l],
                  preferred_element_type=jnp.float32) + bqkv_ref[l]  # [BS, 3H]
    q = qkv[:, 0:HIDDEN]
    k = qkv[:, HIDDEN:2 * HIDDEN]
    v = qkv[:, 2 * HIDDEN:3 * HIDDEN]

    ctx_rows = []
    for b in range(batch):
      r0 = b * seq
      head_ctx = []
      for hd in range(N_HEADS):
        c0 = hd * HEAD_DIM
        qb = q[r0:r0 + seq, c0:c0 + HEAD_DIM]                 # [S, Dh]
        kb = k[r0:r0 + seq, c0:c0 + HEAD_DIM]
        vb = v[r0:r0 + seq, c0:c0 + HEAD_DIM]
        s = lax.dot_general(qb, kb, (((1,), (1,)), ((), ())),
                            preferred_element_type=jnp.float32)  # [S, S]
        s = s * scale + key_bias[b]
        m = jnp.max(s, axis=-1, keepdims=True)
        p = jnp.exp(s - m)
        p = p / jnp.sum(p, axis=-1, keepdims=True)
        head_ctx.append(jnp.dot(p, vb,
                                preferred_element_type=jnp.float32))  # [S, Dh]
      ctx_rows.append(jnp.concatenate(head_ctx, axis=1))      # [S, H]
    ctx = jnp.concatenate(ctx_rows, axis=0)                   # [BS, H]

    attn_out = jnp.dot(ctx, wo_ref[l],
                       preferred_element_type=jnp.float32) + bo_ref[l]
    h = _layernorm(attn_out + h, ln1_g_ref[l], ln1_b_ref[l])

    inter = jnp.dot(h, w1_ref[l],
                    preferred_element_type=jnp.float32) + b1_ref[l]
    inter = _gelu(inter)
    ffn = jnp.dot(inter, w2_ref[l],
                  preferred_element_type=jnp.float32) + b2_ref[l]
    h = _layernorm(ffn + h, ln2_g_ref[l], ln2_b_ref[l])

  # ---- LSTM (batch-first, single layer) fused with final FC ----
  # Pre-compute all input gates with one lane-dense [BS, 4*LH] matmul.
  xg = jnp.dot(h, wih_ref[...],
               preferred_element_type=jnp.float32) + bih_ref[...]   # [BS, 4LH]
  hprev = jnp.zeros((batch, LSTM_HIDDEN), jnp.float32)
  cprev = jnp.zeros((batch, LSTM_HIDDEN), jnp.float32)
  h_ts = []
  for t in range(seq):   # static unroll; S = 8
    xg_t = jnp.concatenate(
        [xg[b * seq + t:b * seq + t + 1, :] for b in range(batch)], axis=0)
    gates = (xg_t
             + jnp.dot(hprev, whh_ref[...],
                       preferred_element_type=jnp.float32)
             + bhh_ref[...])                                  # [B, 4LH]
    # PyTorch gate order: i, f, g, o (lane-aligned 128-wide slices)
    i_g = jax.nn.sigmoid(gates[:, 0:LSTM_HIDDEN])
    f_g = jax.nn.sigmoid(gates[:, LSTM_HIDDEN:2 * LSTM_HIDDEN])
    g_g = jnp.tanh(gates[:, 2 * LSTM_HIDDEN:3 * LSTM_HIDDEN])
    o_g = jax.nn.sigmoid(gates[:, 3 * LSTM_HIDDEN:4 * LSTM_HIDDEN])
    cprev = f_g * cprev + i_g * g_g
    hprev = o_g * jnp.tanh(cprev)
    h_ts.append(hprev)

  # Final FC fused in-kernel; write logits directly in [B, S, C] order.
  for b in range(batch):
    hb = jnp.concatenate([h_ts[t][b:b + 1, :] for t in range(seq)],
                         axis=0)                              # [S, LSTM_HIDDEN]
    logits_b = jnp.dot(hb, fcw_ref[...],
                       preferred_element_type=jnp.float32) + fcb_ref[...]
    out_ref[b] = logits_b                                     # [S, NUM_CLASSES]


# -------------------------- model forward (wrapper) -------------------------
def clue_model_forward(input_ids, params):
  B, S = input_ids.shape
  attention_mask = (input_ids != PAD_ID).astype(jnp.int32)
  # RoBERTa position ids: cumsum(mask) * mask + padding_idx
  position_ids = jnp.cumsum(attention_mask, axis=1) * attention_mask + PAD_ID

  ids_flat = input_ids.reshape(B * S, 1).astype(jnp.int32)
  pos_flat = position_ids.reshape(B * S, 1).astype(jnp.int32)
  maskf = attention_mask.astype(jnp.float32)

  inputs = (ids_flat, pos_flat, maskf,
            params["word_emb"], params["pos_emb"], params["type_emb"],
            params["emb_ln_g"], params["emb_ln_b"],
            params["wqkv"], params["bqkv"], params["wo"], params["bo"],
            params["ln1_g"], params["ln1_b"], params["w1"], params["b1"],
            params["w2"], params["b2"], params["ln2_g"], params["ln2_b"],
            params["lstm_w_ih_t"], params["lstm_b_ih"],
            params["lstm_w_hh_t"], params["lstm_b_hh"],
            params["fc_w_t"], params["fc_b"])

  logits = pl.pallas_call(
      functools.partial(_clue_kernel, batch=B, seq=S),
      grid=(1,),
      out_shape=jax.ShapeDtypeStruct((B, S, NUM_CLASSES), jnp.float32),
      in_specs=[_full_spec(x.shape) for x in inputs],
      out_specs=_full_spec((B, S, NUM_CLASSES)),
      # Single fully-fused block: the whole model is << 1 MiB of VMEM, so no
      # grid / pipelining is needed on any generation (incl. v7x's 64 MiB).
      compiler_params=pltpu.CompilerParams(
          dimension_semantics=("arbitrary",)),
  )(*inputs)
  return logits.reshape(-1, MAX_ANSWER_LEN, NUM_CLASSES)


# ------------------------------ param init ----------------------------------
def init_params(key):
  def nrm(k, shape, scale=0.02):
    return (scale * jax.random.normal(k, shape)).astype(jnp.float32)

  ks = iter(jax.random.split(key, 32))
  L = N_LAYERS
  # All weights pre-stacked over layers and pre-transposed to [K, N] so no
  # per-forward transposes are needed.
  params = {
      "word_emb": nrm(next(ks), (VOCAB, HIDDEN)),
      "pos_emb": nrm(next(ks), (POS_TABLE, HIDDEN)),
      "type_emb": nrm(next(ks), (1, HIDDEN)),
      "emb_ln_g": jnp.ones((1, HIDDEN), jnp.float32),
      "emb_ln_b": jnp.zeros((1, HIDDEN), jnp.float32),
      "wqkv": nrm(next(ks), (L, HIDDEN, 3 * HIDDEN)),
      "bqkv": jnp.zeros((L, 1, 3 * HIDDEN), jnp.float32),
      "wo": nrm(next(ks), (L, HIDDEN, HIDDEN)),
      "bo": jnp.zeros((L, 1, HIDDEN), jnp.float32),
      "ln1_g": jnp.ones((L, 1, HIDDEN), jnp.float32),
      "ln1_b": jnp.zeros((L, 1, HIDDEN), jnp.float32),
      "w1": nrm(next(ks), (L, HIDDEN, FFN)),
      "b1": jnp.zeros((L, 1, FFN), jnp.float32),
      "w2": nrm(next(ks), (L, FFN, HIDDEN)),
      "b2": jnp.zeros((L, 1, HIDDEN), jnp.float32),
      "ln2_g": jnp.ones((L, 1, HIDDEN), jnp.float32),
      "ln2_b": jnp.zeros((L, 1, HIDDEN), jnp.float32),
      # LSTM weights stored pre-transposed: [in, 4H] / [H, 4H]
      "lstm_w_ih_t": nrm(next(ks), (HIDDEN, 4 * LSTM_HIDDEN), 0.05),
      "lstm_b_ih": jnp.zeros((1, 4 * LSTM_HIDDEN), jnp.float32),
      "lstm_w_hh_t": nrm(next(ks), (LSTM_HIDDEN, 4 * LSTM_HIDDEN), 0.05),
      "lstm_b_hh": jnp.zeros((1, 4 * LSTM_HIDDEN), jnp.float32),
      # fc stored pre-transposed: [128, num_classes]
      "fc_w_t": nrm(next(ks), (LSTM_HIDDEN, NUM_CLASSES), 0.05),
      "fc_b": jnp.zeros((1, NUM_CLASSES), jnp.float32),
  }
  return params


# --------------------------------- main --------------------------------------
if __name__ == "__main__":
  key = jax.random.PRNGKey(0)
  k_ids, k_params = jax.random.split(key)

  input_ids = jax.random.randint(k_ids, (BATCH, SEQ), 2, VOCAB, dtype=jnp.int32)
  # put some PAD tokens (id == 1) to exercise the attention mask
  input_ids = input_ids.at[0, -2:].set(PAD_ID)
  input_ids = input_ids.at[1, -1:].set(PAD_ID)

  params = init_params(k_params)

  fwd = jax.jit(clue_model_forward)
  logits = jax.block_until_ready(fwd(input_ids, params))

  expected = (BATCH * SEQ // MAX_ANSWER_LEN, MAX_ANSWER_LEN, NUM_CLASSES)
  assert logits.shape == expected, (logits.shape, expected)
  assert bool(jnp.all(jnp.isfinite(logits)))
  print("KERNEL_OK")
</pallas_src>

<mosaic_0001>
module attributes {stable_mosaic.version = 11 : i64} {
  func.func @_clue_kernel(%arg0: i32, %arg1: memref<16x1xi32, #tpu.memory_space<vmem>>, %arg2: memref<16x1xi32, #tpu.memory_space<vmem>>, %arg3: memref<2x8xf32, #tpu.memory_space<vmem>>, %arg4: memref<64x32xf32, #tpu.memory_space<vmem>>, %arg5: memref<16x32xf32, #tpu.memory_space<vmem>>, %arg6: memref<1x32xf32, #tpu.memory_space<vmem>>, %arg7: memref<1x32xf32, #tpu.memory_space<vmem>>, %arg8: memref<1x32xf32, #tpu.memory_space<vmem>>, %arg9: memref<2x32x96xf32, #tpu.memory_space<vmem>>, %arg10: memref<2x1x96xf32, #tpu.memory_space<vmem>>, %arg11: memref<2x32x32xf32, #tpu.memory_space<vmem>>, %arg12: memref<2x1x32xf32, #tpu.memory_space<vmem>>, %arg13: memref<2x1x32xf32, #tpu.memory_space<vmem>>, %arg14: memref<2x1x32xf32, #tpu.memory_space<vmem>>, %arg15: memref<2x32x64xf32, #tpu.memory_space<vmem>>, %arg16: memref<2x1x64xf32, #tpu.memory_space<vmem>>, %arg17: memref<2x64x32xf32, #tpu.memory_space<vmem>>, %arg18: memref<2x1x32xf32, #tpu.memory_space<vmem>>, %arg19: memref<2x1x32xf32, #tpu.memory_space<vmem>>, %arg20: memref<2x1x32xf32, #tpu.memory_space<vmem>>, %arg21: memref<32x512xf32, #tpu.memory_space<vmem>>, %arg22: memref<1x512xf32, #tpu.memory_space<vmem>>, %arg23: memref<128x512xf32, #tpu.memory_space<vmem>>, %arg24: memref<1x512xf32, #tpu.memory_space<vmem>>, %arg25: memref<128x5xf32, #tpu.memory_space<vmem>>, %arg26: memref<1x5xf32, #tpu.memory_space<vmem>>, %arg27: memref<2x8x5xf32, #tpu.memory_space<vmem>>) attributes {dimension_semantics = [#tpu.dimension_semantics<arbitrary>], iteration_bounds = array<i64: 1>, scalar_prefetch = 0 : i64, scratch_operands = 0 : i64, tpu.core_type = #tpu.core_type<tc>, window_params = [{pipeline_mode = #tpu.pipeline_mode<synchronous>, transform_indices = @transform_0, window_bounds = array<i64: 16, 1>}, {pipeline_mode = #tpu.pipeline_mode<synchronous>, transform_indices = @transform_1, window_bounds = array<i64: 16, 1>}, {pipeline_mode = #tpu.pipeline_mode<synchronous>, transform_indices = @transform_2, window_bounds = array<i64: 2, 8>}, {pipeline_mode = #tpu.pipeline_mode<synchronous>, transform_indices = @transform_3, window_bounds = array<i64: 64, 32>}, {pipeline_mode = #tpu.pipeline_mode<synchronous>, transform_indices = @transform_4, window_bounds = array<i64: 16, 32>}, {pipeline_mode = #tpu.pipeline_mode<synchronous>, transform_indices = @transform_5, window_bounds = array<i64: 1, 32>}, {pipeline_mode = #tpu.pipeline_mode<synchronous>, transform_indices = @transform_6, window_bounds = array<i64: 1, 32>}, {pipeline_mode = #tpu.pipeline_mode<synchronous>, transform_indices = @transform_7, window_bounds = array<i64: 1, 32>}, {pipeline_mode = #tpu.pipeline_mode<synchronous>, transform_indices = @transform_8, window_bounds = array<i64: 2, 32, 96>}, {pipeline_mode = #tpu.pipeline_mode<synchronous>, transform_indices = @transform_9, window_bounds = array<i64: 2, 1, 96>}, {pipeline_mode = #tpu.pipeline_mode<synchronous>, transform_indices = @transform_10, window_bounds = array<i64: 2, 32, 32>}, {pipeline_mode = #tpu.pipeline_mode<synchronous>, transform_indices = @transform_11, window_bounds = array<i64: 2, 1, 32>}, {pipeline_mode = #tpu.pipeline_mode<synchronous>, transform_indices = @transform_12, window_bounds = array<i64: 2, 1, 32>}, {pipeline_mode = #tpu.pipeline_mode<synchronous>, transform_indices = @transform_13, window_bounds = array<i64: 2, 1, 32>}, {pipeline_mode = #tpu.pipeline_mode<synchronous>, transform_indices = @transform_14, window_bounds = array<i64: 2, 32, 64>}, {pipeline_mode = #tpu.pipeline_mode<synchronous>, transform_indices = @transform_15, window_bounds = array<i64: 2, 1, 64>}, {pipeline_mode = #tpu.pipeline_mode<synchronous>, transform_indices = @transform_16, window_bounds = array<i64: 2, 64, 32>}, {pipeline_mode = #tpu.pipeline_mode<synchronous>, transform_indices = @transform_17, window_bounds = array<i64: 2, 1, 32>}, {pipeline_mode = #tpu.pipeline_mode<synchronous>, transform_indices = @transform_18, window_bounds = array<i64: 2, 1, 32>}, {pipeline_mode = #tpu.pipeline_mode<synchronous>, transform_indices = @transform_19, window_bounds = array<i64: 2, 1, 32>}, {pipeline_mode = #tpu.pipeline_mode<synchronous>, transform_indices = @transform_20, window_bounds = array<i64: 32, 512>}, {pipeline_mode = #tpu.pipeline_mode<synchronous>, transform_indices = @transform_21, window_bounds = array<i64: 1, 512>}, {pipeline_mode = #tpu.pipeline_mode<synchronous>, transform_indices = @transform_22, window_bounds = array<i64: 128, 512>}, {pipeline_mode = #tpu.pipeline_mode<synchronous>, transform_indices = @transform_23, window_bounds = array<i64: 1, 512>}, {pipeline_mode = #tpu.pipeline_mode<synchronous>, transform_indices = @transform_24, window_bounds = array<i64: 128, 5>}, {pipeline_mode = #tpu.pipeline_mode<synchronous>, transform_indices = @transform_25, window_bounds = array<i64: 1, 5>}, {pipeline_mode = #tpu.pipeline_mode<synchronous>, transform_indices = @transform_26, window_bounds = array<i64: 2, 8, 5>}]} {
    %c0 = arith.constant 0 : index
    %c0_0 = arith.constant 0 : index
    %0 = vector.load %arg1[%c0, %c0_0] : memref<16x1xi32, #tpu.memory_space<vmem>>, vector<16x1xi32>
    %c0_1 = arith.constant 0 : index
    %c0_2 = arith.constant 0 : index
    %1 = vector.load %arg2[%c0_1, %c0_2] : memref<16x1xi32, #tpu.memory_space<vmem>>, vector<16x1xi32>
    %c0_3 = arith.constant 0 : index
    %c0_4 = arith.constant 0 : index
    %2 = vector.load %arg3[%c0_3, %c0_4] : memref<2x8xf32, #tpu.memory_space<vmem>>, vector<2x8xf32>
    %3 = tpu.iota {dimensions = array<i32: 1>} : vector<16x64xi32>
    %4 = vector.broadcast %0 : vector<16x1xi32> to vector<16x64xi32>
    %5 = arith.cmpi eq, %3, %4 : vector<16x64xi32>
    %6 = arith.extui %5 : vector<16x64xi1> to vector<16x64xi32>
    %7 = arith.sitofp %6 : vector<16x64xi32> to vector<16x64xf32>
    %8 = tpu.iota {dimensions = array<i32: 1>} : vector<16x16xi32>
    %9 = vector.broadcast %1 : vector<16x1xi32> to vector<16x16xi32>
    %10 = arith.cmpi eq, %8, %9 : vector<16x16xi32>
    %11 = arith.extui %10 : vector<16x16xi1> to vector<16x16xi32>
    %12 = arith.sitofp %11 : vector<16x16xi32> to vector<16x16xf32>
    %c0_5 = arith.constant 0 : index
    %c0_6 = arith.constant 0 : index
    %13 = vector.load %arg4[%c0_5, %c0_6] : memref<64x32xf32, #tpu.memory_space<vmem>>, vector<64x32xf32>
    %cst = arith.constant dense<0.000000e+00> : vector<16x32xf32>
    %14 = tpu.matmul %7, %13, %cst {dimension_numbers = #tpu.dot_dimension_numbers<[1], [0], [0], [1], [0, 0, 1, 1], [], []>} : vector<16x64xf32>, vector<64x32xf32>, vector<16x32xf32> -> vector<16x32xf32>
    %c0_7 = arith.constant 0 : index
    %c0_8 = arith.constant 0 : index
    %15 = vector.load %arg5[%c0_7, %c0_8] : memref<16x32xf32, #tpu.memory_space<vmem>>, vector<16x32xf32>
    %cst_9 = arith.constant dense<0.000000e+00> : vector<16x32xf32>
    %16 = tpu.matmul %12, %15, %cst_9 {dimension_numbers = #tpu.dot_dimension_numbers<[1], [0], [0], [1], [0, 0, 1, 1], [], []>} : vector<16x16xf32>, vector<16x32xf32>, vector<16x32xf32> -> vector<16x32xf32>
    %17 = arith.addf %14, %16 : vector<16x32xf32>
    %c0_10 = arith.constant 0 : index
    %c0_11 = arith.constant 0 : index
    %18 = vector.load %arg6[%c0_10, %c0_11] : memref<1x32xf32, #tpu.memory_space<vmem>>, vector<1x32xf32>
    %19 = vector.broadcast %18 : vector<1x32xf32> to vector<16x32xf32>
    %20 = arith.addf %17, %19 : vector<16x32xf32>
    %c0_12 = arith.constant 0 : index
    %c0_13 = arith.constant 0 : index
    %21 = vector.load %arg7[%c0_12, %c0_13] : memref<1x32xf32, #tpu.memory_space<vmem>>, vector<1x32xf32>
    %c0_14 = arith.constant 0 : index
    %c0_15 = arith.constant 0 : index
    %22 = vector.load %arg8[%c0_14, %c0_15] : memref<1x32xf32, #tpu.memory_space<vmem>>, vector<1x32xf32>
    %cst_16 = arith.constant dense<0.000000e+00> : vector<16xf32>
    %23 = vector.multi_reduction <add>, %20, %cst_16 [1] : vector<16x32xf32> to vector<16xf32>
    %24 = vector.shape_cast %23 : vector<16xf32> to vector<16x1xf32>
    %cst_17 = arith.constant 3.200000e+01 : f32
    %25 = vector.broadcast %cst_17 : f32 to vector<16x1xf32>
    %26 = arith.divf %24, %25 : vector<16x1xf32>
    %27 = vector.broadcast %26 : vector<16x1xf32> to vector<16x32xf32>
    %28 = arith.subf %20, %27 : vector<16x32xf32>
    %29 = arith.mulf %28, %28 : vector<16x32xf32>
    %cst_18 = arith.constant dense<0.000000e+00> : vector<16xf32>
    %30 = vector.multi_reduction <add>, %29, %cst_18 [1] : vector<16x32xf32> to vector<16xf32>
    %31 = vector.shape_cast %30 : vector<16xf32> to vector<16x1xf32>
    %cst_19 = arith.constant 3.200000e+01 : f32
    %32 = vector.broadcast %cst_19 : f32 to vector<16x1xf32>
    %33 = arith.divf %31, %32 : vector<16x1xf32>
    %34 = vector.broadcast %26 : vector<16x1xf32> to vector<16x32xf32>
    %35 = arith.subf %20, %34 : vector<16x32xf32>
    %cst_20 = arith.constant 9.99999974E-6 : f32
    %36 = vector.broadcast %cst_20 : f32 to vector<16x1xf32>
    %37 = arith.addf %33, %36 : vector<16x1xf32>
    %38 = math.rsqrt %37 : vector<16x1xf32>
    %39 = vector.broadcast %38 : vector<16x1xf32> to vector<16x32xf32>
    %40 = arith.mulf %35, %39 : vector<16x32xf32>
    %41 = vector.broadcast %21 : vector<1x32xf32> to vector<16x32xf32>
    %42 = arith.mulf %40, %41 : vector<16x32xf32>
    %43 = vector.broadcast %22 : vector<1x32xf32> to vector<16x32xf32>
    %44 = arith.addf %42, %43 : vector<16x32xf32>
    %45 = vector.extract_strided_slice %2 {offsets = [0, 0], sizes = [1, 8], strides = [1, 1]} : vector<2x8xf32> to vector<1x8xf32>
    %cst_21 = arith.constant 1.000000e+00 : f32
    %46 = vector.broadcast %cst_21 : f32 to vector<1x8xf32>
    %47 = arith.subf %45, %46 : vector<1x8xf32>
    %cst_22 = arith.constant 1.000000e+09 : f32
    %48 = vector.broadcast %cst_22 : f32 to vector<1x8xf32>
    %49 = arith.mulf %47, %48 : vector<1x8xf32>
    %50 = vector.extract_strided_slice %2 {offsets = [1, 0], sizes = [1, 8], strides = [1, 1]} : vector<2x8xf32> to vector<1x8xf32>
    %cst_23 = arith.constant 1.000000e+00 : f32
    %51 = vector.broadcast %cst_23 : f32 to vector<1x8xf32>
    %52 = arith.subf %50, %51 : vector<1x8xf32>
    %cst_24 = arith.constant 1.000000e+09 : f32
    %53 = vector.broadcast %cst_24 : f32 to vector<1x8xf32>
    %54 = arith.mulf %52, %53 : vector<1x8xf32>
    %c0_25 = arith.constant 0 : index
    %c0_26 = arith.constant 0 : index
    %c0_27 = arith.constant 0 : index
    %55 = vector.load %arg9[%c0_25, %c0_26, %c0_27] : memref<2x32x96xf32, #tpu.memory_space<vmem>>, vector<1x32x96xf32>
    %56 = vector.shape_cast %55 : vector<1x32x96xf32> to vector<32x96xf32>
    %cst_28 = arith.constant dense<0.000000e+00> : vector<16x96xf32>
    %57 = tpu.matmul %44, %56, %cst_28 {dimension_numbers = #tpu.dot_dimension_numbers<[1], [0], [0], [1], [0, 0, 1, 1], [], []>} : vector<16x32xf32>, vector<32x96xf32>, vector<16x96xf32> -> vector<16x96xf32>
    %c0_29 = arith.constant 0 : index
    %c0_30 = arith.constant 0 : index
    %c0_31 = arith.constant 0 : index
    %58 = vector.load %arg10[%c0_29, %c0_30, %c0_31] : memref<2x1x96xf32, #tpu.memory_space<vmem>>, vector<1x1x96xf32>
    %59 = vector.shape_cast %58 : vector<1x1x96xf32> to vector<1x96xf32>
    %60 = vector.broadcast %59 : vector<1x96xf32> to vector<16x96xf32>
    %61 = arith.addf %57, %60 : vector<16x96xf32>
    %62 = vector.extract_strided_slice %61 {offsets = [0, 0], sizes = [16, 32], strides = [1, 1]} : vector<16x96xf32> to vector<16x32xf32>
    %63 = vector.extract_strided_slice %61 {offsets = [0, 32], sizes = [16, 32], strides = [1, 1]} : vector<16x96xf32> to vector<16x32xf32>
    %64 = vector.extract_strided_slice %61 {offsets = [0, 64], sizes = [16, 32], strides = [1, 1]} : vector<16x96xf32> to vector<16x32xf32>
    %65 = vector.extract_strided_slice %62 {offsets = [0, 0], sizes = [8, 16], strides = [1, 1]} : vector<16x32xf32> to vector<8x16xf32>
    %66 = vector.extract_strided_slice %63 {offsets = [0, 0], sizes = [8, 16], strides = [1, 1]} : vector<16x32xf32> to vector<8x16xf32>
    %67 = vector.extract_strided_slice %64 {offsets = [0, 0], sizes = [8, 16], strides = [1, 1]} : vector<16x32xf32> to vector<8x16xf32>
    %cst_32 = arith.constant dense<0.000000e+00> : vector<8x8xf32>
    %68 = tpu.matmul %65, %66, %cst_32 {dimension_numbers = #tpu.dot_dimension_numbers<[1], [1], [0], [0], [0, 0, 1, 0], [], []>} : vector<8x16xf32>, vector<8x16xf32>, vector<8x8xf32> -> vector<8x8xf32>
    %cst_33 = arith.constant 2.500000e-01 : f32
    %69 = vector.broadcast %cst_33 : f32 to vector<8x8xf32>
    %70 = arith.mulf %68, %69 : vector<8x8xf32>
    %71 = vector.broadcast %49 : vector<1x8xf32> to vector<8x8xf32>
    %72 = arith.addf %70, %71 : vector<8x8xf32>
    %cst_34 = arith.constant dense<0xFF800000> : vector<8xf32>
    %73 = vector.multi_reduction <maximumf>, %72, %cst_34 [1] : vector<8x8xf32> to vector<8xf32>
    %74 = vector.shape_cast %73 : vector<8xf32> to vector<8x1xf32>
    %75 = vector.broadcast %74 : vector<8x1xf32> to vector<8x8xf32>
    %76 = arith.subf %72, %75 : vector<8x8xf32>
    %77 = math.exp %76 : vector<8x8xf32>
    %cst_35 = arith.constant dense<0.000000e+00> : vector<8xf32>
    %78 = vector.multi_reduction <add>, %77, %cst_35 [1] : vector<8x8xf32> to vector<8xf32>
    %79 = vector.shape_cast %78 : vector<8xf32> to vector<8x1xf32>
    %80 = vector.broadcast %79 : vector<8x1xf32> to vector<8x8xf32>
    %81 = arith.divf %77, %80 : vector<8x8xf32>
    %cst_36 = arith.constant dense<0.000000e+00> : vector<8x16xf32>
    %82 = tpu.matmul %81, %67, %cst_36 {dimension_numbers = #tpu.dot_dimension_numbers<[1], [0], [0], [1], [0, 0, 1, 1], [], []>} : vector<8x8xf32>, vector<8x16xf32>, vector<8x16xf32> -> vector<8x16xf32>
    %83 = vector.extract_strided_slice %62 {offsets = [0, 16], sizes = [8, 16], strides = [1, 1]} : vector<16x32xf32> to vector<8x16xf32>
    %84 = vector.extract_strided_slice %63 {offsets = [0, 16], sizes = [8, 16], strides = [1, 1]} : vector<16x32xf32> to vector<8x16xf32>
    %85 = vector.extract_strided_slice %64 {offsets = [0, 16], sizes = [8, 16], strides = [1, 1]} : vector<16x32xf32> to vector<8x16xf32>
    %cst_37 = arith.constant dense<0.000000e+00> : vector<8x8xf32>
    %86 = tpu.matmul %83, %84, %cst_37 {dimension_numbers = #tpu.dot_dimension_numbers<[1], [1], [0], [0], [0, 0, 1, 0], [], []>} : vector<8x16xf32>, vector<8x16xf32>, vector<8x8xf32> -> vector<8x8xf32>
    %cst_38 = arith.constant 2.500000e-01 : f32
    %87 = vector.broadcast %cst_38 : f32 to vector<8x8xf32>
    %88 = arith.mulf %86, %87 : vector<8x8xf32>
    %89 = vector.broadcast %49 : vector<1x8xf32> to vector<8x8xf32>
    %90 = arith.addf %88, %89 : vector<8x8xf32>
    %cst_39 = arith.constant dense<0xFF800000> : vector<8xf32>
    %91 = vector.multi_reduction <maximumf>, %90, %cst_39 [1] : vector<8x8xf32> to vector<8xf32>
    %92 = vector.shape_cast %91 : vector<8xf32> to vector<8x1xf32>
    %93 = vector.broadcast %92 : vector<8x1xf32> to vector<8x8xf32>
    %94 = arith.subf %90, %93 : vector<8x8xf32>
    %95 = math.exp %94 : vector<8x8xf32>
    %cst_40 = arith.constant dense<0.000000e+00> : vector<8xf32>
    %96 = vector.multi_reduction <add>, %95, %cst_40 [1] : vector<8x8xf32> to vector<8xf32>
    %97 = vector.shape_cast %96 : vector<8xf32> to vector<8x1xf32>
    %98 = vector.broadcast %97 : vector<8x1xf32> to vector<8x8xf32>
    %99 = arith.divf %95, %98 : vector<8x8xf32>
    %cst_41 = arith.constant dense<0.000000e+00> : vector<8x16xf32>
    %100 = tpu.matmul %99, %85, %cst_41 {dimension_numbers = #tpu.dot_dimension_numbers<[1], [0], [0], [1], [0, 0, 1, 1], [], []>} : vector<8x8xf32>, vector<8x16xf32>, vector<8x16xf32> -> vector<8x16xf32>
    %101 = tpu.concatenate %82, %100 in 1 : vector<8x16xf32>, vector<8x16xf32> -> vector<8x32xf32>
    %102 = vector.extract_strided_slice %62 {offsets = [8, 0], sizes = [8, 16], strides = [1, 1]} : vector<16x32xf32> to vector<8x16xf32>
    %103 = vector.extract_strided_slice %63 {offsets = [8, 0], sizes = [8, 16], strides = [1, 1]} : vector<16x32xf32> to vector<8x16xf32>
    %104 = vector.extract_strided_slice %64 {offsets = [8, 0], sizes = [8, 16], strides = [1, 1]} : vector<16x32xf32> to vector<8x16xf32>
    %cst_42 = arith.constant dense<0.000000e+00> : vector<8x8xf32>
    %105 = tpu.matmul %102, %103, %cst_42 {dimension_numbers = #tpu.dot_dimension_numbers<[1], [1], [0], [0], [0, 0, 1, 0], [], []>} : vector<8x16xf32>, vector<8x16xf32>, vector<8x8xf32> -> vector<8x8xf32>
    %cst_43 = arith.constant 2.500000e-01 : f32
    %106 = vector.broadcast %cst_43 : f32 to vector<8x8xf32>
    %107 = arith.mulf %105, %106 : vector<8x8xf32>
    %108 = vector.broadcast %54 : vector<1x8xf32> to vector<8x8xf32>
    %109 = arith.addf %107, %108 : vector<8x8xf32>
    %cst_44 = arith.constant dense<0xFF800000> : vector<8xf32>
    %110 = vector.multi_reduction <maximumf>, %109, %cst_44 [1] : vector<8x8xf32> to vector<8xf32>
    %111 = vector.shape_cast %110 : vector<8xf32> to vector<8x1xf32>
    %112 = vector.broadcast %111 : vector<8x1xf32> to vector<8x8xf32>
    %113 = arith.subf %109, %112 : vector<8x8xf32>
    %114 = math.exp %113 : vector<8x8xf32>
    %cst_45 = arith.constant dense<0.000000e+00> : vector<8xf32>
    %115 = vector.multi_reduction <add>, %114, %cst_45 [1] : vector<8x8xf32> to vector<8xf32>
    %116 = vector.shape_cast %115 : vector<8xf32> to vector<8x1xf32>
    %117 = vector.broadcast %116 : vector<8x1xf32> to vector<8x8xf32>
    %118 = arith.divf %114, %117 : vector<8x8xf32>
    %cst_46 = arith.constant dense<0.000000e+00> : vector<8x16xf32>
    %119 = tpu.matmul %118, %104, %cst_46 {dimension_numbers = #tpu.dot_dimension_numbers<[1], [0], [0], [1], [0, 0, 1, 1], [], []>} : vector<8x8xf32>, vector<8x16xf32>, vector<8x16xf32> -> vector<8x16xf32>
    %120 = vector.extract_strided_slice %62 {offsets = [8, 16], sizes = [8, 16], strides = [1, 1]} : vector<16x32xf32> to vector<8x16xf32>
    %121 = vector.extract_strided_slice %63 {offsets = [8, 16], sizes = [8, 16], strides = [1, 1]} : vector<16x32xf32> to vector<8x16xf32>
    %122 = vector.extract_strided_slice %64 {offsets = [8, 16], sizes = [8, 16], strides = [1, 1]} : vector<16x32xf32> to vector<8x16xf32>
    %cst_47 = arith.constant dense<0.000000e+00> : vector<8x8xf32>
    %123 = tpu.matmul %120, %121, %cst_47 {dimension_numbers = #tpu.dot_dimension_numbers<[1], [1], [0], [0], [0, 0, 1, 0], [], []>} : vector<8x16xf32>, vector<8x16xf32>, vector<8x8xf32> -> vector<8x8xf32>
    %cst_48 = arith.constant 2.500000e-01 : f32
    %124 = vector.broadcast %cst_48 : f32 to vector<8x8xf32>
    %125 = arith.mulf %123, %124 : vector<8x8xf32>
    %126 = vector.broadcast %54 : vector<1x8xf32> to vector<8x8xf32>
    %127 = arith.addf %125, %126 : vector<8x8xf32>
    %cst_49 = arith.constant dense<0xFF800000> : vector<8xf32>
    %128 = vector.multi_reduction <maximumf>, %127, %cst_49 [1] : vector<8x8xf32> to vector<8xf32>
    %129 = vector.shape_cast %128 : vector<8xf32> to vector<8x1xf32>
    %130 = vector.broadcast %129 : vector<8x1xf32> to vector<8x8xf32>
    %131 = arith.subf %127, %130 : vector<8x8xf32>
    %132 = math.exp %131 : vector<8x8xf32>
    %cst_50 = arith.constant dense<0.000000e+00> : vector<8xf32>
    %133 = vector.multi_reduction <add>, %132, %cst_50 [1] : vector<8x8xf32> to vector<8xf32>
    %134 = vector.shape_cast %133 : vector<8xf32> to vector<8x1xf32>
    %135 = vector.broadcast %134 : vector<8x1xf32> to vector<8x8xf32>
    %136 = arith.divf %132, %135 : vector<8x8xf32>
    %cst_51 = arith.constant dense<0.000000e+00> : vector<8x16xf32>
    %137 = tpu.matmul %136, %122, %cst_51 {dimension_numbers = #tpu.dot_dimension_numbers<[1], [0], [0], [1], [0, 0, 1, 1], [], []>} : vector<8x8xf32>, vector<8x16xf32>, vector<8x16xf32> -> vector<8x16xf32>
    %138 = tpu.concatenate %119, %137 in 1 : vector<8x16xf32>, vector<8x16xf32> -> vector<8x32xf32>
    %139 = tpu.concatenate %101, %138 in 0 : vector<8x32xf32>, vector<8x32xf32> -> vector<16x32xf32>
    %c0_52 = arith.constant 0 : index
    %c0_53 = arith.constant 0 : index
    %c0_54 = arith.constant 0 : index
    %140 = vector.load %arg11[%c0_52, %c0_53, %c0_54] : memref<2x32x32xf32, #tpu.memory_space<vmem>>, vector<1x32x32xf32>
    %141 = vector.shape_cast %140 : vector<1x32x32xf32> to vector<32x32xf32>
    %cst_55 = arith.constant dense<0.000000e+00> : vector<16x32xf32>
    %142 = tpu.matmul %139, %141, %cst_55 {dimension_numbers = #tpu.dot_dimension_numbers<[1], [0], [0], [1], [0, 0, 1, 1], [], []>} : vector<16x32xf32>, vector<32x32xf32>, vector<16x32xf32> -> vector<16x32xf32>
    %c0_56 = arith.constant 0 : index
    %c0_57 = arith.constant 0 : index
    %c0_58 = arith.constant 0 : index
    %143 = vector.load %arg12[%c0_56, %c0_57, %c0_58] : memref<2x1x32xf32, #tpu.memory_space<vmem>>, vector<1x1x32xf32>
    %144 = vector.shape_cast %143 : vector<1x1x32xf32> to vector<1x32xf32>
    %145 = vector.broadcast %144 : vector<1x32xf32> to vector<16x32xf32>
    %146 = arith.addf %142, %145 : vector<16x32xf32>
    %147 = arith.addf %146, %44 : vector<16x32xf32>
    %c0_59 = arith.constant 0 : index
    %c0_60 = arith.constant 0 : index
    %c0_61 = arith.constant 0 : index
    %148 = vector.load %arg13[%c0_59, %c0_60, %c0_61] : memref<2x1x32xf32, #tpu.memory_space<vmem>>, vector<1x1x32xf32>
    %149 = vector.shape_cast %148 : vector<1x1x32xf32> to vector<1x32xf32>
    %c0_62 = arith.constant 0 : index
    %c0_63 = arith.constant 0 : index
    %c0_64 = arith.constant 0 : index
    %150 = vector.load %arg14[%c0_62, %c0_63, %c0_64] : memref<2x1x32xf32, #tpu.memory_space<vmem>>, vector<1x1x32xf32>
    %151 = vector.shape_cast %150 : vector<1x1x32xf32> to vector<1x32xf32>
    %cst_65 = arith.constant dense<0.000000e+00> : vector<16xf32>
    %152 = vector.multi_reduction <add>, %147, %cst_65 [1] : vector<16x32xf32> to vector<16xf32>
    %153 = vector.shape_cast %152 : vector<16xf32> to vector<16x1xf32>
    %cst_66 = arith.constant 3.200000e+01 : f32
    %154 = vector.broadcast %cst_66 : f32 to vector<16x1xf32>
    %155 = arith.divf %153, %154 : vector<16x1xf32>
    %156 = vector.broadcast %155 : vector<16x1xf32> to vector<16x32xf32>
    %157 = arith.subf %147, %156 : vector<16x32xf32>
    %158 = arith.mulf %157, %157 : vector<16x32xf32>
    %cst_67 = arith.constant dense<0.000000e+00> : vector<16xf32>
    %159 = vector.multi_reduction <add>, %158, %cst_67 [1] : vector<16x32xf32> to vector<16xf32>
    %160 = vector.shape_cast %159 : vector<16xf32> to vector<16x1xf32>
    %cst_68 = arith.constant 3.200000e+01 : f32
    %161 = vector.broadcast %cst_68 : f32 to vector<16x1xf32>
    %162 = arith.divf %160, %161 : vector<16x1xf32>
    %163 = vector.broadcast %155 : vector<16x1xf32> to vector<16x32xf32>
    %164 = arith.subf %147, %163 : vector<16x32xf32>
    %cst_69 = arith.constant 9.99999974E-6 : f32
    %165 = vector.broadcast %cst_69 : f32 to vector<16x1xf32>
    %166 = arith.addf %162, %165 : vector<16x1xf32>
    %167 = math.rsqrt %166 : vector<16x1xf32>
    %168 = vector.broadcast %167 : vector<16x1xf32> to vector<16x32xf32>
    %169 = arith.mulf %164, %168 : vector<16x32xf32>
    %170 = vector.broadcast %149 : vector<1x32xf32> to vector<16x32xf32>
    %171 = arith.mulf %169, %170 : vector<16x32xf32>
    %172 = vector.broadcast %151 : vector<1x32xf32> to vector<16x32xf32>
    %173 = arith.addf %171, %172 : vector<16x32xf32>
    %c0_70 = arith.constant 0 : index
    %c0_71 = arith.constant 0 : index
    %c0_72 = arith.constant 0 : index
    %174 = vector.load %arg15[%c0_70, %c0_71, %c0_72] : memref<2x32x64xf32, #tpu.memory_space<vmem>>, vector<1x32x64xf32>
    %175 = vector.shape_cast %174 : vector<1x32x64xf32> to vector<32x64xf32>
    %cst_73 = arith.constant dense<0.000000e+00> : vector<16x64xf32>
    %176 = tpu.matmul %173, %175, %cst_73 {dimension_numbers = #tpu.dot_dimension_numbers<[1], [0], [0], [1], [0, 0, 1, 1], [], []>} : vector<16x32xf32>, vector<32x64xf32>, vector<16x64xf32> -> vector<16x64xf32>
    %c0_74 = arith.constant 0 : index
    %c0_75 = arith.constant 0 : index
    %c0_76 = arith.constant 0 : index
    %177 = vector.load %arg16[%c0_74, %c0_75, %c0_76] : memref<2x1x64xf32, #tpu.memory_space<vmem>>, vector<1x1x64xf32>
    %178 = vector.shape_cast %177 : vector<1x1x64xf32> to vector<1x64xf32>
    %179 = vector.broadcast %178 : vector<1x64xf32> to vector<16x64xf32>
    %180 = arith.addf %176, %179 : vector<16x64xf32>
    %cst_77 = arith.constant 5.000000e-01 : f32
    %181 = vector.broadcast %cst_77 : f32 to vector<16x64xf32>
    %182 = arith.mulf %181, %180 : vector<16x64xf32>
    %cst_78 = arith.constant 0.707106769 : f32
    %183 = vector.broadcast %cst_78 : f32 to vector<16x64xf32>
    %184 = arith.mulf %180, %183 : vector<16x64xf32>
    %cst_79 = arith.constant 0.000000e+00 : f32
    %185 = vector.broadcast %cst_79 : f32 to vector<16x64xf32>
    %186 = arith.cmpf olt, %184, %185 : vector<16x64xf32>
    %cst_80 = arith.constant -1.000000e+00 : f32
    %cst_81 = arith.constant 1.000000e+00 : f32
    %187 = vector.broadcast %cst_80 : f32 to vector<16x64xf32>
    %188 = vector.broadcast %cst_81 : f32 to vector<16x64xf32>
    %189 = arith.select %186, %187, %188 : vector<16x64xi1>, vector<16x64xf32>
    %190 = math.absf %184 : vector<16x64xf32>
    %cst_82 = arith.constant 0.327591091 : f32
    %191 = vector.broadcast %cst_82 : f32 to vector<16x64xf32>
    %192 = arith.mulf %191, %190 : vector<16x64xf32>
    %cst_83 = arith.constant 1.000000e+00 : f32
    %193 = vector.broadcast %cst_83 : f32 to vector<16x64xf32>
    %194 = arith.addf %193, %192 : vector<16x64xf32>
    %cst_84 = arith.constant 1.000000e+00 : f32
    %195 = vector.broadcast %cst_84 : f32 to vector<16x64xf32>
    %196 = arith.divf %195, %194 : vector<16x64xf32>
    %cst_85 = arith.constant 1.06140542 : f32
    %197 = vector.broadcast %cst_85 : f32 to vector<16x64xf32>
    %198 = arith.mulf %197, %196 : vector<16x64xf32>
    %cst_86 = arith.constant -1.45315206 : f32
    %199 = vector.broadcast %cst_86 : f32 to vector<16x64xf32>
    %200 = arith.addf %198, %199 : vector<16x64xf32>
    %201 = arith.mulf %200, %196 : vector<16x64xf32>
    %cst_87 = arith.constant 1.42141378 : f32
    %202 = vector.broadcast %cst_87 : f32 to vector<16x64xf32>
    %203 = arith.addf %201, %202 : vector<16x64xf32>
    %204 = arith.mulf %203, %196 : vector<16x64xf32>
    %cst_88 = arith.constant -0.284496725 : f32
    %205 = vector.broadcast %cst_88 : f32 to vector<16x64xf32>
    %206 = arith.addf %204, %205 : vector<16x64xf32>
    %207 = arith.mulf %206, %196 : vector<16x64xf32>
    %cst_89 = arith.constant 0.254829586 : f32
    %208 = vector.broadcast %cst_89 : f32 to vector<16x64xf32>
    %209 = arith.addf %207, %208 : vector<16x64xf32>
    %210 = arith.mulf %209, %196 : vector<16x64xf32>
    %cst_90 = arith.constant 0.000000e+00 : f32
    %211 = vector.broadcast %cst_90 : f32 to vector<16x64xf32>
    %212 = arith.subf %211, %190 : vector<16x64xf32>
    %213 = arith.mulf %212, %190 : vector<16x64xf32>
    %214 = math.exp %213 : vector<16x64xf32>
    %215 = arith.mulf %210, %214 : vector<16x64xf32>
    %cst_91 = arith.constant 1.000000e+00 : f32
    %216 = vector.broadcast %cst_91 : f32 to vector<16x64xf32>
    %217 = arith.subf %216, %215 : vector<16x64xf32>
    %218 = arith.mulf %189, %217 : vector<16x64xf32>
    %cst_92 = arith.constant 1.000000e+00 : f32
    %219 = vector.broadcast %cst_92 : f32 to vector<16x64xf32>
    %220 = arith.addf %219, %218 : vector<16x64xf32>
    %221 = arith.mulf %182, %220 : vector<16x64xf32>
    %c0_93 = arith.constant 0 : index
    %c0_94 = arith.constant 0 : index
    %c0_95 = arith.constant 0 : index
    %222 = vector.load %arg17[%c0_93, %c0_94, %c0_95] : memref<2x64x32xf32, #tpu.memory_space<vmem>>, vector<1x64x32xf32>
    %223 = vector.shape_cast %222 : vector<1x64x32xf32> to vector<64x32xf32>
    %cst_96 = arith.constant dense<0.000000e+00> : vector<16x32xf32>
    %224 = tpu.matmul %221, %223, %cst_96 {dimension_numbers = #tpu.dot_dimension_numbers<[1], [0], [0], [1], [0, 0, 1, 1], [], []>} : vector<16x64xf32>, vector<64x32xf32>, vector<16x32xf32> -> vector<16x32xf32>
    %c0_97 = arith.constant 0 : index
    %c0_98 = arith.constant 0 : index
    %c0_99 = arith.constant 0 : index
    %225 = vector.load %arg18[%c0_97, %c0_98, %c0_99] : memref<2x1x32xf32, #tpu.memory_space<vmem>>, vector<1x1x32xf32>
    %226 = vector.shape_cast %225 : vector<1x1x32xf32> to vector<1x32xf32>
    %227 = vector.broadcast %226 : vector<1x32xf32> to vector<16x32xf32>
    %228 = arith.addf %224, %227 : vector<16x32xf32>
    %229 = arith.addf %228, %173 : vector<16x32xf32>
    %c0_100 = arith.constant 0 : index
    %c0_101 = arith.constant 0 : index
    %c0_102 = arith.constant 0 : index
    %230 = vector.load %arg19[%c0_100, %c0_101, %c0_102] : memref<2x1x32xf32, #tpu.memory_space<vmem>>, vector<1x1x32xf32>
    %231 = vector.shape_cast %230 : vector<1x1x32xf32> to vector<1x32xf32>
    %c0_103 = arith.constant 0 : index
    %c0_104 = arith.constant 0 : index
    %c0_105 = arith.constant 0 : index
    %232 = vector.load %arg20[%c0_103, %c0_104, %c0_105] : memref<2x1x32xf32, #tpu.memory_space<vmem>>, vector<1x1x32xf32>
    %233 = vector.shape_cast %232 : vector<1x1x32xf32> to vector<1x32xf32>
    %cst_106 = arith.constant dense<0.000000e+00> : vector<16xf32>
    %234 = vector.multi_reduction <add>, %229, %cst_106 [1] : vector<16x32xf32> to vector<16xf32>
    %235 = vector.shape_cast %234 : vector<16xf32> to vector<16x1xf32>
    %cst_107 = arith.constant 3.200000e+01 : f32
    %236 = vector.broadcast %cst_107 : f32 to vector<16x1xf32>
    %237 = arith.divf %235, %236 : vector<16x1xf32>
    %238 = vector.broadcast %237 : vector<16x1xf32> to vector<16x32xf32>
    %239 = arith.subf %229, %238 : vector<16x32xf32>
    %240 = arith.mulf %239, %239 : vector<16x32xf32>
    %cst_108 = arith.constant dense<0.000000e+00> : vector<16xf32>
    %241 = vector.multi_reduction <add>, %240, %cst_108 [1] : vector<16x32xf32> to vector<16xf32>
    %242 = vector.shape_cast %241 : vector<16xf32> to vector<16x1xf32>
    %cst_109 = arith.constant 3.200000e+01 : f32
    %243 = vector.broadcast %cst_109 : f32 to vector<16x1xf32>
    %244 = arith.divf %242, %243 : vector<16x1xf32>
    %245 = vector.broadcast %237 : vector<16x1xf32> to vector<16x32xf32>
    %246 = arith.subf %229, %245 : vector<16x32xf32>
    %cst_110 = arith.constant 9.99999974E-6 : f32
    %247 = vector.broadcast %cst_110 : f32 to vector<16x1xf32>
    %248 = arith.addf %244, %247 : vector<16x1xf32>
    %249 = math.rsqrt %248 : vector<16x1xf32>
    %250 = vector.broadcast %249 : vector<16x1xf32> to vector<16x32xf32>
    %251 = arith.mulf %246, %250 : vector<16x32xf32>
    %252 = vector.broadcast %231 : vector<1x32xf32> to vector<16x32xf32>
    %253 = arith.mulf %251, %252 : vector<16x32xf32>
    %254 = vector.broadcast %233 : vector<1x32xf32> to vector<16x32xf32>
    %255 = arith.addf %253, %254 : vector<16x32xf32>
    %c1 = arith.constant 1 : index
    %c0_111 = arith.constant 0 : index
    %c0_112 = arith.constant 0 : index
    %256 = vector.load %arg9[%c1, %c0_111, %c0_112] : memref<2x32x96xf32, #tpu.memory_space<vmem>>, vector<1x32x96xf32>
    %257 = vector.shape_cast %256 : vector<1x32x96xf32> to vector<32x96xf32>
    %cst_113 = arith.constant dense<0.000000e+00> : vector<16x96xf32>
    %258 = tpu.matmul %255, %257, %cst_113 {dimension_numbers = #tpu.dot_dimension_numbers<[1], [0], [0], [1], [0, 0, 1, 1], [], []>} : vector<16x32xf32>, vector<32x96xf32>, vector<16x96xf32> -> vector<16x96xf32>
    %c1_114 = arith.constant 1 : index
    %c0_115 = arith.constant 0 : index
    %c0_116 = arith.constant 0 : index
    %259 = vector.load %arg10[%c1_114, %c0_115, %c0_116] : memref<2x1x96xf32, #tpu.memory_space<vmem>>, vector<1x1x96xf32>
    %260 = vector.shape_cast %259 : vector<1x1x96xf32> to vector<1x96xf32>
    %261 = vector.broadcast %260 : vector<1x96xf32> to vector<16x96xf32>
    %262 = arith.addf %258, %261 : vector<16x96xf32>
    %263 = vector.extract_strided_slice %262 {offsets = [0, 0], sizes = [16, 32], strides = [1, 1]} : vector<16x96xf32> to vector<16x32xf32>
    %264 = vector.extract_strided_slice %262 {offsets = [0, 32], sizes = [16, 32], strides = [1, 1]} : vector<16x96xf32> to vector<16x32xf32>
    %265 = vector.extract_strided_slice %262 {offsets = [0, 64], sizes = [16, 32], strides = [1, 1]} : vector<16x96xf32> to vector<16x32xf32>
    %266 = vector.extract_strided_slice %263 {offsets = [0, 0], sizes = [8, 16], strides = [1, 1]} : vector<16x32xf32> to vector<8x16xf32>
    %267 = vector.extract_strided_slice %264 {offsets = [0, 0], sizes = [8, 16], strides = [1, 1]} : vector<16x32xf32> to vector<8x16xf32>
    %268 = vector.extract_strided_slice %265 {offsets = [0, 0], sizes = [8, 16], strides = [1, 1]} : vector<16x32xf32> to vector<8x16xf32>
    %cst_117 = arith.constant dense<0.000000e+00> : vector<8x8xf32>
    %269 = tpu.matmul %266, %267, %cst_117 {dimension_numbers = #tpu.dot_dimension_numbers<[1], [1], [0], [0], [0, 0, 1, 0], [], []>} : vector<8x16xf32>, vector<8x16xf32>, vector<8x8xf32> -> vector<8x8xf32>
    %cst_118 = arith.constant 2.500000e-01 : f32
    %270 = vector.broadcast %cst_118 : f32 to vector<8x8xf32>
    %271 = arith.mulf %269, %270 : vector<8x8xf32>
    %272 = vector.broadcast %49 : vector<1x8xf32> to vector<8x8xf32>
    %273 = arith.addf %271, %272 : vector<8x8xf32>
    %cst_119 = arith.constant dense<0xFF800000> : vector<8xf32>
    %274 = vector.multi_reduction <maximumf>, %273, %cst_119 [1] : vector<8x8xf32> to vector<8xf32>
    %275 = vector.shape_cast %274 : vector<8xf32> to vector<8x1xf32>
    %276 = vector.broadcast %275 : vector<8x1xf32> to vector<8x8xf32>
    %277 = arith.subf %273, %276 : vector<8x8xf32>
    %278 = math.exp %277 : vector<8x8xf32>
    %cst_120 = arith.constant dense<0.000000e+00> : vector<8xf32>
    %279 = vector.multi_reduction <add>, %278, %cst_120 [1] : vector<8x8xf32> to vector<8xf32>
    %280 = vector.shape_cast %279 : vector<8xf32> to vector<8x1xf32>
    %281 = vector.broadcast %280 : vector<8x1xf32> to vector<8x8xf32>
    %282 = arith.divf %278, %281 : vector<8x8xf32>
    %cst_121 = arith.constant dense<0.000000e+00> : vector<8x16xf32>
    %283 = tpu.matmul %282, %268, %cst_121 {dimension_numbers = #tpu.dot_dimension_numbers<[1], [0], [0], [1], [0, 0, 1, 1], [], []>} : vector<8x8xf32>, vector<8x16xf32>, vector<8x16xf32> -> vector<8x16xf32>
    %284 = vector.extract_strided_slice %263 {offsets = [0, 16], sizes = [8, 16], strides = [1, 1]} : vector<16x32xf32> to vector<8x16xf32>
    %285 = vector.extract_strided_slice %264 {offsets = [0, 16], sizes = [8, 16], strides = [1, 1]} : vector<16x32xf32> to vector<8x16xf32>
    %286 = vector.extract_strided_slice %265 {offsets = [0, 16], sizes = [8, 16], strides = [1, 1]} : vector<16x32xf32> to vector<8x16xf32>
    %cst_122 = arith.constant dense<0.000000e+00> : vector<8x8xf32>
    %287 = tpu.matmul %284, %285, %cst_122 {dimension_numbers = #tpu.dot_dimension_numbers<[1], [1], [0], [0], [0, 0, 1, 0], [], []>} : vector<8x16xf32>, vector<8x16xf32>, vector<8x8xf32> -> vector<8x8xf32>
    %cst_123 = arith.constant 2.500000e-01 : f32
    %288 = vector.broadcast %cst_123 : f32 to vector<8x8xf32>
    %289 = arith.mulf %287, %288 : vector<8x8xf32>
    %290 = vector.broadcast %49 : vector<1x8xf32> to vector<8x8xf32>
    %291 = arith.addf %289, %290 : vector<8x8xf32>
    %cst_124 = arith.constant dense<0xFF800000> : vector<8xf32>
    %292 = vector.multi_reduction <maximumf>, %291, %cst_124 [1] : vector<8x8xf32> to vector<8xf32>
    %293 = vector.shape_cast %292 : vector<8xf32> to vector<8x1xf32>
    %294 = vector.broadcast %293 : vector<8x1xf32> to vector<8x8xf32>
    %295 = arith.subf %291, %294 : vector<8x8xf32>
    %296 = math.exp %295 : vector<8x8xf32>
    %cst_125 = arith.constant dense<0.000000e+00> : vector<8xf32>
    %297 = vector.multi_reduction <add>, %296, %cst_125 [1] : vector<8x8xf32> to vector<8xf32>
    %298 = vector.shape_cast %297 : vector<8xf32> to vector<8x1xf32>
    %299 = vector.broadcast %298 : vector<8x1xf32> to vector<8x8xf32>
    %300 = arith.divf %296, %299 : vector<8x8xf32>
    %cst_126 = arith.constant dense<0.000000e+00> : vector<8x16xf32>
    %301 = tpu.matmul %300, %286, %cst_126 {dimension_numbers = #tpu.dot_dimension_numbers<[1], [0], [0], [1], [0, 0, 1, 1], [], []>} : vector<8x8xf32>, vector<8x16xf32>, vector<8x16xf32> -> vector<8x16xf32>
    %302 = tpu.concatenate %283, %301 in 1 : vector<8x16xf32>, vector<8x16xf32> -> vector<8x32xf32>
    %303 = vector.extract_strided_slice %263 {offsets = [8, 0], sizes = [8, 16], strides = [1, 1]} : vector<16x32xf32> to vector<8x16xf32>
    %304 = vector.extract_strided_slice %264 {offsets = [8, 0], sizes = [8, 16], strides = [1, 1]} : vector<16x32xf32> to vector<8x16xf32>
    %305 = vector.extract_strided_slice %265 {offsets = [8, 0], sizes = [8, 16], strides = [1, 1]} : vector<16x32xf32> to vector<8x16xf32>
    %cst_127 = arith.constant dense<0.000000e+00> : vector<8x8xf32>
    %306 = tpu.matmul %303, %304, %cst_127 {dimension_numbers = #tpu.dot_dimension_numbers<[1], [1], [0], [0], [0, 0, 1, 0], [], []>} : vector<8x16xf32>, vector<8x16xf32>, vector<8x8xf32> -> vector<8x8xf32>
    %cst_128 = arith.constant 2.500000e-01 : f32
    %307 = vector.broadcast %cst_128 : f32 to vector<8x8xf32>
    %308 = arith.mulf %306, %307 : vector<8x8xf32>
    %309 = vector.broadcast %54 : vector<1x8xf32> to vector<8x8xf32>
    %310 = arith.addf %308, %309 : vector<8x8xf32>
    %cst_129 = arith.constant dense<0xFF800000> : vector<8xf32>
    %311 = vector.multi_reduction <maximumf>, %310, %cst_129 [1] : vector<8x8xf32> to vector<8xf32>
    %312 = vector.shape_cast %311 : vector<8xf32> to vector<8x1xf32>
    %313 = vector.broadcast %312 : vector<8x1xf32> to vector<8x8xf32>
    %314 = arith.subf %310, %313 : vector<8x8xf32>
    %315 = math.exp %314 : vector<8x8xf32>
    %cst_130 = arith.constant dense<0.000000e+00> : vector<8xf32>
    %316 = vector.multi_reduction <add>, %315, %cst_130 [1] : vector<8x8xf32> to vector<8xf32>
    %317 = vector.shape_cast %316 : vector<8xf32> to vector<8x1xf32>
    %318 = vector.broadcast %317 : vector<8x1xf32> to vector<8x8xf32>
    %319 = arith.divf %315, %318 : vector<8x8xf32>
    %cst_131 = arith.constant dense<0.000000e+00> : vector<8x16xf32>
    %320 = tpu.matmul %319, %305, %cst_131 {dimension_numbers = #tpu.dot_dimension_numbers<[1], [0], [0], [1], [0, 0, 1, 1], [], []>} : vector<8x8xf32>, vector<8x16xf32>, vector<8x16xf32> -> vector<8x16xf32>
    %321 = vector.extract_strided_slice %263 {offsets = [8, 16], sizes = [8, 16], strides = [1, 1]} : vector<16x32xf32> to vector<8x16xf32>
    %322 = vector.extract_strided_slice %264 {offsets = [8, 16], sizes = [8, 16], strides = [1, 1]} : vector<16x32xf32> to vector<8x16xf32>
    %323 = vector.extract_strided_slice %265 {offsets = [8, 16], sizes = [8, 16], strides = [1, 1]} : vector<16x32xf32> to vector<8x16xf32>
    %cst_132 = arith.constant dense<0.000000e+00> : vector<8x8xf32>
    %324 = tpu.matmul %321, %322, %cst_132 {dimension_numbers = #tpu.dot_dimension_numbers<[1], [1], [0], [0], [0, 0, 1, 0], [], []>} : vector<8x16xf32>, vector<8x16xf32>, vector<8x8xf32> -> vector<8x8xf32>
    %cst_133 = arith.constant 2.500000e-01 : f32
    %325 = vector.broadcast %cst_133 : f32 to vector<8x8xf32>
    %326 = arith.mulf %324, %325 : vector<8x8xf32>
    %327 = vector.broadcast %54 : vector<1x8xf32> to vector<8x8xf32>
    %328 = arith.addf %326, %327 : vector<8x8xf32>
    %cst_134 = arith.constant dense<0xFF800000> : vector<8xf32>
    %329 = vector.multi_reduction <maximumf>, %328, %cst_134 [1] : vector<8x8xf32> to vector<8xf32>
    %330 = vector.shape_cast %329 : vector<8xf32> to vector<8x1xf32>
    %331 = vector.broadcast %330 : vector<8x1xf32> to vector<8x8xf32>
    %332 = arith.subf %328, %331 : vector<8x8xf32>
    %333 = math.exp %332 : vector<8x8xf32>
    %cst_135 = arith.constant dense<0.000000e+00> : vector<8xf32>
    %334 = vector.multi_reduction <add>, %333, %cst_135 [1] : vector<8x8xf32> to vector<8xf32>
    %335 = vector.shape_cast %334 : vector<8xf32> to vector<8x1xf32>
    %336 = vector.broadcast %335 : vector<8x1xf32> to vector<8x8xf32>
    %337 = arith.divf %333, %336 : vector<8x8xf32>
    %cst_136 = arith.constant dense<0.000000e+00> : vector<8x16xf32>
    %338 = tpu.matmul %337, %323, %cst_136 {dimension_numbers = #tpu.dot_dimension_numbers<[1], [0], [0], [1], [0, 0, 1, 1], [], []>} : vector<8x8xf32>, vector<8x16xf32>, vector<8x16xf32> -> vector<8x16xf32>
    %339 = tpu.concatenate %320, %338 in 1 : vector<8x16xf32>, vector<8x16xf32> -> vector<8x32xf32>
    %340 = tpu.concatenate %302, %339 in 0 : vector<8x32xf32>, vector<8x32xf32> -> vector<16x32xf32>
    %c1_137 = arith.constant 1 : index
    %c0_138 = arith.constant 0 : index
    %c0_139 = arith.constant 0 : index
    %341 = vector.load %arg11[%c1_137, %c0_138, %c0_139] : memref<2x32x32xf32, #tpu.memory_space<vmem>>, vector<1x32x32xf32>
    %342 = vector.shape_cast %341 : vector<1x32x32xf32> to vector<32x32xf32>
    %cst_140 = arith.constant dense<0.000000e+00> : vector<16x32xf32>
    %343 = tpu.matmul %340, %342, %cst_140 {dimension_numbers = #tpu.dot_dimension_numbers<[1], [0], [0], [1], [0, 0, 1, 1], [], []>} : vector<16x32xf32>, vector<32x32xf32>, vector<16x32xf32> -> vector<16x32xf32>
    %c1_141 = arith.constant 1 : index
    %c0_142 = arith.constant 0 : index
    %c0_143 = arith.constant 0 : index
    %344 = vector.load %arg12[%c1_141, %c0_142, %c0_143] : memref<2x1x32xf32, #tpu.memory_space<vmem>>, vector<1x1x32xf32>
    %345 = vector.shape_cast %344 : vector<1x1x32xf32> to vector<1x32xf32>
    %346 = vector.broadcast %345 : vector<1x32xf32> to vector<16x32xf32>
    %347 = arith.addf %343, %346 : vector<16x32xf32>
    %348 = arith.addf %347, %255 : vector<16x32xf32>
    %c1_144 = arith.constant 1 : index
    %c0_145 = arith.constant 0 : index
    %c0_146 = arith.constant 0 : index
    %349 = vector.load %arg13[%c1_144, %c0_145, %c0_146] : memref<2x1x32xf32, #tpu.memory_space<vmem>>, vector<1x1x32xf32>
    %350 = vector.shape_cast %349 : vector<1x1x32xf32> to vector<1x32xf32>
    %c1_147 = arith.constant 1 : index
    %c0_148 = arith.constant 0 : index
    %c0_149 = arith.constant 0 : index
    %351 = vector.load %arg14[%c1_147, %c0_148, %c0_149] : memref<2x1x32xf32, #tpu.memory_space<vmem>>, vector<1x1x32xf32>
    %352 = vector.shape_cast %351 : vector<1x1x32xf32> to vector<1x32xf32>
    %cst_150 = arith.constant dense<0.000000e+00> : vector<16xf32>
    %353 = vector.multi_reduction <add>, %348, %cst_150 [1] : vector<16x32xf32> to vector<16xf32>
    %354 = vector.shape_cast %353 : vector<16xf32> to vector<16x1xf32>
    %cst_151 = arith.constant 3.200000e+01 : f32
    %355 = vector.broadcast %cst_151 : f32 to vector<16x1xf32>
    %356 = arith.divf %354, %355 : vector<16x1xf32>
    %357 = vector.broadcast %356 : vector<16x1xf32> to vector<16x32xf32>
    %358 = arith.subf %348, %357 : vector<16x32xf32>
    %359 = arith.mulf %358, %358 : vector<16x32xf32>
    %cst_152 = arith.constant dense<0.000000e+00> : vector<16xf32>
    %360 = vector.multi_reduction <add>, %359, %cst_152 [1] : vector<16x32xf32> to vector<16xf32>
    %361 = vector.shape_cast %360 : vector<16xf32> to vector<16x1xf32>
    %cst_153 = arith.constant 3.200000e+01 : f32
    %362 = vector.broadcast %cst_153 : f32 to vector<16x1xf32>
    %363 = arith.divf %361, %362 : vector<16x1xf32>
    %364 = vector.broadcast %356 : vector<16x1xf32> to vector<16x32xf32>
    %365 = arith.subf %348, %364 : vector<16x32xf32>
    %cst_154 = arith.constant 9.99999974E-6 : f32
    %366 = vector.broadcast %cst_154 : f32 to vector<16x1xf32>
    %367 = arith.addf %363, %366 : vector<16x1xf32>
    %368 = math.rsqrt %367 : vector<16x1xf32>
    %369 = vector.broadcast %368 : vector<16x1xf32> to vector<16x32xf32>
    %370 = arith.mulf %365, %369 : vector<16x32xf32>
    %371 = vector.broadcast %350 : vector<1x32xf32> to vector<16x32xf32>
    %372 = arith.mulf %370, %371 : vector<16x32xf32>
    %373 = vector.broadcast %352 : vector<1x32xf32> to vector<16x32xf32>
    %374 = arith.addf %372, %373 : vector<16x32xf32>
    %c1_155 = arith.constant 1 : index
    %c0_156 = arith.constant 0 : index
    %c0_157 = arith.constant 0 : index
    %375 = vector.load %arg15[%c1_155, %c0_156, %c0_157] : memref<2x32x64xf32, #tpu.memory_space<vmem>>, vector<1x32x64xf32>
    %376 = vector.shape_cast %375 : vector<1x32x64xf32> to vector<32x64xf32>
    %cst_158 = arith.constant dense<0.000000e+00> : vector<16x64xf32>
    %377 = tpu.matmul %374, %376, %cst_158 {dimension_numbers = #tpu.dot_dimension_numbers<[1], [0], [0], [1], [0, 0, 1, 1], [], []>} : vector<16x32xf32>, vector<32x64xf32>, vector<16x64xf32> -> vector<16x64xf32>
    %c1_159 = arith.constant 1 : index
    %c0_160 = arith.constant 0 : index
    %c0_161 = arith.constant 0 : index
    %378 = vector.load %arg16[%c1_159, %c0_160, %c0_161] : memref<2x1x64xf32, #tpu.memory_space<vmem>>, vector<1x1x64xf32>
    %379 = vector.shape_cast %378 : vector<1x1x64xf32> to vector<1x64xf32>
    %380 = vector.broadcast %379 : vector<1x64xf32> to vector<16x64xf32>
    %381 = arith.addf %377, %380 : vector<16x64xf32>
    %cst_162 = arith.constant 5.000000e-01 : f32
    %382 = vector.broadcast %cst_162 : f32 to vector<16x64xf32>
    %383 = arith.mulf %382, %381 : vector<16x64xf32>
    %cst_163 = arith.constant 0.707106769 : f32
    %384 = vector.broadcast %cst_163 : f32 to vector<16x64xf32>
    %385 = arith.mulf %381, %384 : vector<16x64xf32>
    %cst_164 = arith.constant 0.000000e+00 : f32
    %386 = vector.broadcast %cst_164 : f32 to vector<16x64xf32>
    %387 = arith.cmpf olt, %385, %386 : vector<16x64xf32>
    %cst_165 = arith.constant -1.000000e+00 : f32
    %cst_166 = arith.constant 1.000000e+00 : f32
    %388 = vector.broadcast %cst_165 : f32 to vector<16x64xf32>
    %389 = vector.broadcast %cst_166 : f32 to vector<16x64xf32>
    %390 = arith.select %387, %388, %389 : vector<16x64xi1>, vector<16x64xf32>
    %391 = math.absf %385 : vector<16x64xf32>
    %cst_167 = arith.constant 0.327591091 : f32
    %392 = vector.broadcast %cst_167 : f32 to vector<16x64xf32>
    %393 = arith.mulf %392, %391 : vector<16x64xf32>
    %cst_168 = arith.constant 1.000000e+00 : f32
    %394 = vector.broadcast %cst_168 : f32 to vector<16x64xf32>
    %395 = arith.addf %394, %393 : vector<16x64xf32>
    %cst_169 = arith.constant 1.000000e+00 : f32
    %396 = vector.broadcast %cst_169 : f32 to vector<16x64xf32>
    %397 = arith.divf %396, %395 : vector<16x64xf32>
    %cst_170 = arith.constant 1.06140542 : f32
    %398 = vector.broadcast %cst_170 : f32 to vector<16x64xf32>
    %399 = arith.mulf %398, %397 : vector<16x64xf32>
    %cst_171 = arith.constant -1.45315206 : f32
    %400 = vector.broadcast %cst_171 : f32 to vector<16x64xf32>
    %401 = arith.addf %399, %400 : vector<16x64xf32>
    %402 = arith.mulf %401, %397 : vector<16x64xf32>
    %cst_172 = arith.constant 1.42141378 : f32
    %403 = vector.broadcast %cst_172 : f32 to vector<16x64xf32>
    %404 = arith.addf %402, %403 : vector<16x64xf32>
    %405 = arith.mulf %404, %397 : vector<16x64xf32>
    %cst_173 = arith.constant -0.284496725 : f32
    %406 = vector.broadcast %cst_173 : f32 to vector<16x64xf32>
    %407 = arith.addf %405, %406 : vector<16x64xf32>
    %408 = arith.mulf %407, %397 : vector<16x64xf32>
    %cst_174 = arith.constant 0.254829586 : f32
    %409 = vector.broadcast %cst_174 : f32 to vector<16x64xf32>
    %410 = arith.addf %408, %409 : vector<16x64xf32>
    %411 = arith.mulf %410, %397 : vector<16x64xf32>
    %cst_175 = arith.constant 0.000000e+00 : f32
    %412 = vector.broadcast %cst_175 : f32 to vector<16x64xf32>
    %413 = arith.subf %412, %391 : vector<16x64xf32>
    %414 = arith.mulf %413, %391 : vector<16x64xf32>
    %415 = math.exp %414 : vector<16x64xf32>
    %416 = arith.mulf %411, %415 : vector<16x64xf32>
    %cst_176 = arith.constant 1.000000e+00 : f32
    %417 = vector.broadcast %cst_176 : f32 to vector<16x64xf32>
    %418 = arith.subf %417, %416 : vector<16x64xf32>
    %419 = arith.mulf %390, %418 : vector<16x64xf32>
    %cst_177 = arith.constant 1.000000e+00 : f32
    %420 = vector.broadcast %cst_177 : f32 to vector<16x64xf32>
    %421 = arith.addf %420, %419 : vector<16x64xf32>
    %422 = arith.mulf %383, %421 : vector<16x64xf32>
    %c1_178 = arith.constant 1 : index
    %c0_179 = arith.constant 0 : index
    %c0_180 = arith.constant 0 : index
    %423 = vector.load %arg17[%c1_178, %c0_179, %c0_180] : memref<2x64x32xf32, #tpu.memory_space<vmem>>, vector<1x64x32xf32>
    %424 = vector.shape_cast %423 : vector<1x64x32xf32> to vector<64x32xf32>
    %cst_181 = arith.constant dense<0.000000e+00> : vector<16x32xf32>
    %425 = tpu.matmul %422, %424, %cst_181 {dimension_numbers = #tpu.dot_dimension_numbers<[1], [0], [0], [1], [0, 0, 1, 1], [], []>} : vector<16x64xf32>, vector<64x32xf32>, vector<16x32xf32> -> vector<16x32xf32>
    %c1_182 = arith.constant 1 : index
    %c0_183 = arith.constant 0 : index
    %c0_184 = arith.constant 0 : index
    %426 = vector.load %arg18[%c1_182, %c0_183, %c0_184] : memref<2x1x32xf32, #tpu.memory_space<vmem>>, vector<1x1x32xf32>
    %427 = vector.shape_cast %426 : vector<1x1x32xf32> to vector<1x32xf32>
    %428 = vector.broadcast %427 : vector<1x32xf32> to vector<16x32xf32>
    %429 = arith.addf %425, %428 : vector<16x32xf32>
    %430 = arith.addf %429, %374 : vector<16x32xf32>
    %c1_185 = arith.constant 1 : index
    %c0_186 = arith.constant 0 : index
    %c0_187 = arith.constant 0 : index
    %431 = vector.load %arg19[%c1_185, %c0_186, %c0_187] : memref<2x1x32xf32, #tpu.memory_space<vmem>>, vector<1x1x32xf32>
    %432 = vector.shape_cast %431 : vector<1x1x32xf32> to vector<1x32xf32>
    %c1_188 = arith.constant 1 : index
    %c0_189 = arith.constant 0 : index
    %c0_190 = arith.constant 0 : index
    %433 = vector.load %arg20[%c1_188, %c0_189, %c0_190] : memref<2x1x32xf32, #tpu.memory_space<vmem>>, vector<1x1x32xf32>
    %434 = vector.shape_cast %433 : vector<1x1x32xf32> to vector<1x32xf32>
    %cst_191 = arith.constant dense<0.000000e+00> : vector<16xf32>
    %435 = vector.multi_reduction <add>, %430, %cst_191 [1] : vector<16x32xf32> to vector<16xf32>
    %436 = vector.shape_cast %435 : vector<16xf32> to vector<16x1xf32>
    %cst_192 = arith.constant 3.200000e+01 : f32
    %437 = vector.broadcast %cst_192 : f32 to vector<16x1xf32>
    %438 = arith.divf %436, %437 : vector<16x1xf32>
    %439 = vector.broadcast %438 : vector<16x1xf32> to vector<16x32xf32>
    %440 = arith.subf %430, %439 : vector<16x32xf32>
    %441 = arith.mulf %440, %440 : vector<16x32xf32>
    %cst_193 = arith.constant dense<0.000000e+00> : vector<16xf32>
    %442 = vector.multi_reduction <add>, %441, %cst_193 [1] : vector<16x32xf32> to vector<16xf32>
    %443 = vector.shape_cast %442 : vector<16xf32> to vector<16x1xf32>
    %cst_194 = arith.constant 3.200000e+01 : f32
    %444 = vector.broadcast %cst_194 : f32 to vector<16x1xf32>
    %445 = arith.divf %443, %444 : vector<16x1xf32>
    %446 = vector.broadcast %438 : vector<16x1xf32> to vector<16x32xf32>
    %447 = arith.subf %430, %446 : vector<16x32xf32>
    %cst_195 = arith.constant 9.99999974E-6 : f32
    %448 = vector.broadcast %cst_195 : f32 to vector<16x1xf32>
    %449 = arith.addf %445, %448 : vector<16x1xf32>
    %450 = math.rsqrt %449 : vector<16x1xf32>
    %451 = vector.broadcast %450 : vector<16x1xf32> to vector<16x32xf32>
    %452 = arith.mulf %447, %451 : vector<16x32xf32>
    %453 = vector.broadcast %432 : vector<1x32xf32> to vector<16x32xf32>
    %454 = arith.mulf %452, %453 : vector<16x32xf32>
    %455 = vector.broadcast %434 : vector<1x32xf32> to vector<16x32xf32>
    %456 = arith.addf %454, %455 : vector<16x32xf32>
    %c0_196 = arith.constant 0 : index
    %c0_197 = arith.constant 0 : index
    %457 = vector.load %arg21[%c0_196, %c0_197] : memref<32x512xf32, #tpu.memory_space<vmem>>, vector<32x512xf32>
    %cst_198 = arith.constant dense<0.000000e+00> : vector<16x512xf32>
    %458 = tpu.matmul %456, %457, %cst_198 {dimension_numbers = #tpu.dot_dimension_numbers<[1], [0], [0], [1], [0, 0, 1, 1], [], []>} : vector<16x32xf32>, vector<32x512xf32>, vector<16x512xf32> -> vector<16x512xf32>
    %c0_199 = arith.constant 0 : index
    %c0_200 = arith.constant 0 : index
    %459 = vector.load %arg22[%c0_199, %c0_200] : memref<1x512xf32, #tpu.memory_space<vmem>>, vector<1x512xf32>
    %460 = vector.broadcast %459 : vector<1x512xf32> to vector<16x512xf32>
    %461 = arith.addf %458, %460 : vector<16x512xf32>
    %cst_201 = arith.constant 0.000000e+00 : f32
    %462 = vector.broadcast %cst_201 : f32 to vector<2x128xf32>
    %cst_202 = arith.constant 0.000000e+00 : f32
    %463 = vector.broadcast %cst_202 : f32 to vector<2x128xf32>
    %464 = vector.extract_strided_slice %461 {offsets = [0, 0], sizes = [1, 512], strides = [1, 1]} : vector<16x512xf32> to vector<1x512xf32>
    %465 = vector.extract_strided_slice %461 {offsets = [8, 0], sizes = [1, 512], strides = [1, 1]} : vector<16x512xf32> to vector<1x512xf32>
    %466 = tpu.concatenate %464, %465 in 0 : vector<1x512xf32>, vector<1x512xf32> -> vector<2x512xf32>
    %c0_203 = arith.constant 0 : index
    %c0_204 = arith.constant 0 : index
    %467 = vector.load %arg23[%c0_203, %c0_204] : memref<128x512xf32, #tpu.memory_space<vmem>>, vector<128x512xf32>
    %cst_205 = arith.constant dense<0.000000e+00> : vector<2x512xf32>
    %468 = tpu.matmul %462, %467, %cst_205 {dimension_numbers = #tpu.dot_dimension_numbers<[1], [0], [0], [1], [0, 0, 1, 1], [], []>} : vector<2x128xf32>, vector<128x512xf32>, vector<2x512xf32> -> vector<2x512xf32>
    %469 = arith.addf %466, %468 : vector<2x512xf32>
    %c0_206 = arith.constant 0 : index
    %c0_207 = arith.constant 0 : index
    %470 = vector.load %arg24[%c0_206, %c0_207] : memref<1x512xf32, #tpu.memory_space<vmem>>, vector<1x512xf32>
    %471 = vector.broadcast %470 : vector<1x512xf32> to vector<2x512xf32>
    %472 = arith.addf %469, %471 : vector<2x512xf32>
    %473 = vector.extract_strided_slice %472 {offsets = [0, 0], sizes = [2, 128], strides = [1, 1]} : vector<2x512xf32> to vector<2x128xf32>
    %474 = arith.negf %473 : vector<2x128xf32>
    %475 = math.exp %474 : vector<2x128xf32>
    %cst_208 = arith.constant 1.000000e+00 : f32
    %476 = vector.broadcast %cst_208 : f32 to vector<2x128xf32>
    %477 = arith.addf %476, %475 : vector<2x128xf32>
    %478 = arith.divf %476, %477 : vector<2x128xf32>
    %479 = vector.extract_strided_slice %472 {offsets = [0, 128], sizes = [2, 128], strides = [1, 1]} : vector<2x512xf32> to vector<2x128xf32>
    %480 = arith.negf %479 : vector<2x128xf32>
    %481 = math.exp %480 : vector<2x128xf32>
    %cst_209 = arith.constant 1.000000e+00 : f32
    %482 = vector.broadcast %cst_209 : f32 to vector<2x128xf32>
    %483 = arith.addf %482, %481 : vector<2x128xf32>
    %484 = arith.divf %482, %483 : vector<2x128xf32>
    %485 = vector.extract_strided_slice %472 {offsets = [0, 256], sizes = [2, 128], strides = [1, 1]} : vector<2x512xf32> to vector<2x128xf32>
    %486 = math.tanh %485 : vector<2x128xf32>
    %487 = vector.extract_strided_slice %472 {offsets = [0, 384], sizes = [2, 128], strides = [1, 1]} : vector<2x512xf32> to vector<2x128xf32>
    %488 = arith.negf %487 : vector<2x128xf32>
    %489 = math.exp %488 : vector<2x128xf32>
    %cst_210 = arith.constant 1.000000e+00 : f32
    %490 = vector.broadcast %cst_210 : f32 to vector<2x128xf32>
    %491 = arith.addf %490, %489 : vector<2x128xf32>
    %492 = arith.divf %490, %491 : vector<2x128xf32>
    %493 = arith.mulf %484, %463 : vector<2x128xf32>
    %494 = arith.mulf %478, %486 : vector<2x128xf32>
    %495 = arith.addf %493, %494 : vector<2x128xf32>
    %496 = math.tanh %495 : vector<2x128xf32>
    %497 = arith.mulf %492, %496 : vector<2x128xf32>
    %498 = vector.extract_strided_slice %461 {offsets = [1, 0], sizes = [1, 512], strides = [1, 1]} : vector<16x512xf32> to vector<1x512xf32>
    %499 = vector.extract_strided_slice %461 {offsets = [9, 0], sizes = [1, 512], strides = [1, 1]} : vector<16x512xf32> to vector<1x512xf32>
    %500 = tpu.concatenate %498, %499 in 0 : vector<1x512xf32>, vector<1x512xf32> -> vector<2x512xf32>
    %c0_211 = arith.constant 0 : index
    %c0_212 = arith.constant 0 : index
    %501 = vector.load %arg23[%c0_211, %c0_212] : memref<128x512xf32, #tpu.memory_space<vmem>>, vector<128x512xf32>
    %cst_213 = arith.constant dense<0.000000e+00> : vector<2x512xf32>
    %502 = tpu.matmul %497, %501, %cst_213 {dimension_numbers = #tpu.dot_dimension_numbers<[1], [0], [0], [1], [0, 0, 1, 1], [], []>} : vector<2x128xf32>, vector<128x512xf32>, vector<2x512xf32> -> vector<2x512xf32>
    %503 = arith.addf %500, %502 : vector<2x512xf32>
    %c0_214 = arith.constant 0 : index
    %c0_215 = arith.constant 0 : index
    %504 = vector.load %arg24[%c0_214, %c0_215] : memref<1x512xf32, #tpu.memory_space<vmem>>, vector<1x512xf32>
    %505 = vector.broadcast %504 : vector<1x512xf32> to vector<2x512xf32>
    %506 = arith.addf %503, %505 : vector<2x512xf32>
    %507 = vector.extract_strided_slice %506 {offsets = [0, 0], sizes = [2, 128], strides = [1, 1]} : vector<2x512xf32> to vector<2x128xf32>
    %508 = arith.negf %507 : vector<2x128xf32>
    %509 = math.exp %508 : vector<2x128xf32>
    %cst_216 = arith.constant 1.000000e+00 : f32
    %510 = vector.broadcast %cst_216 : f32 to vector<2x128xf32>
    %511 = arith.addf %510, %509 : vector<2x128xf32>
    %512 = arith.divf %510, %511 : vector<2x128xf32>
    %513 = vector.extract_strided_slice %506 {offsets = [0, 128], sizes = [2, 128], strides = [1, 1]} : vector<2x512xf32> to vector<2x128xf32>
    %514 = arith.negf %513 : vector<2x128xf32>
    %515 = math.exp %514 : vector<2x128xf32>
    %cst_217 = arith.constant 1.000000e+00 : f32
    %516 = vector.broadcast %cst_217 : f32 to vector<2x128xf32>
    %517 = arith.addf %516, %515 : vector<2x128xf32>
    %518 = arith.divf %516, %517 : vector<2x128xf32>
    %519 = vector.extract_strided_slice %506 {offsets = [0, 256], sizes = [2, 128], strides = [1, 1]} : vector<2x512xf32> to vector<2x128xf32>
    %520 = math.tanh %519 : vector<2x128xf32>
    %521 = vector.extract_strided_slice %506 {offsets = [0, 384], sizes = [2, 128], strides = [1, 1]} : vector<2x512xf32> to vector<2x128xf32>
    %522 = arith.negf %521 : vector<2x128xf32>
    %523 = math.exp %522 : vector<2x128xf32>
    %cst_218 = arith.constant 1.000000e+00 : f32
    %524 = vector.broadcast %cst_218 : f32 to vector<2x128xf32>
    %525 = arith.addf %524, %523 : vector<2x128xf32>
    %526 = arith.divf %524, %525 : vector<2x128xf32>
    %527 = arith.mulf %518, %495 : vector<2x128xf32>
    %528 = arith.mulf %512, %520 : vector<2x128xf32>
    %529 = arith.addf %527, %528 : vector<2x128xf32>
    %530 = math.tanh %529 : vector<2x128xf32>
    %531 = arith.mulf %526, %530 : vector<2x128xf32>
    %532 = vector.extract_strided_slice %461 {offsets = [2, 0], sizes = [1, 512], strides = [1, 1]} : vector<16x512xf32> to vector<1x512xf32>
    %533 = vector.extract_strided_slice %461 {offsets = [10, 0], sizes = [1, 512], strides = [1, 1]} : vector<16x512xf32> to vector<1x512xf32>
    %534 = tpu.concatenate %532, %533 in 0 : vector<1x512xf32>, vector<1x512xf32> -> vector<2x512xf32>
    %c0_219 = arith.constant 0 : index
    %c0_220 = arith.constant 0 : index
    %535 = vector.load %arg23[%c0_219, %c0_220] : memref<128x512xf32, #tpu.memory_space<vmem>>, vector<128x512xf32>
    %cst_221 = arith.constant dense<0.000000e+00> : vector<2x512xf32>
    %536 = tpu.matmul %531, %535, %cst_221 {dimension_numbers = #tpu.dot_dimension_numbers<[1], [0], [0], [1], [0, 0, 1, 1], [], []>} : vector<2x128xf32>, vector<128x512xf32>, vector<2x512xf32> -> vector<2x512xf32>
    %537 = arith.addf %534, %536 : vector<2x512xf32>
    %c0_222 = arith.constant 0 : index
    %c0_223 = arith.constant 0 : index
    %538 = vector.load %arg24[%c0_222, %c0_223] : memref<1x512xf32, #tpu.memory_space<vmem>>, vector<1x512xf32>
    %539 = vector.broadcast %538 : vector<1x512xf32> to vector<2x512xf32>
    %540 = arith.addf %537, %539 : vector<2x512xf32>
    %541 = vector.extract_strided_slice %540 {offsets = [0, 0], sizes = [2, 128], strides = [1, 1]} : vector<2x512xf32> to vector<2x128xf32>
    %542 = arith.negf %541 : vector<2x128xf32>
    %543 = math.exp %542 : vector<2x128xf32>
    %cst_224 = arith.constant 1.000000e+00 : f32
    %544 = vector.broadcast %cst_224 : f32 to vector<2x128xf32>
    %545 = arith.addf %544, %543 : vector<2x128xf32>
    %546 = arith.divf %544, %545 : vector<2x128xf32>
    %547 = vector.extract_strided_slice %540 {offsets = [0, 128], sizes = [2, 128], strides = [1, 1]} : vector<2x512xf32> to vector<2x128xf32>
    %548 = arith.negf %547 : vector<2x128xf32>
    %549 = math.exp %548 : vector<2x128xf32>
    %cst_225 = arith.constant 1.000000e+00 : f32
    %550 = vector.broadcast %cst_225 : f32 to vector<2x128xf32>
    %551 = arith.addf %550, %549 : vector<2x128xf32>
    %552 = arith.divf %550, %551 : vector<2x128xf32>
    %553 = vector.extract_strided_slice %540 {offsets = [0, 256], sizes = [2, 128], strides = [1, 1]} : vector<2x512xf32> to vector<2x128xf32>
    %554 = math.tanh %553 : vector<2x128xf32>
    %555 = vector.extract_strided_slice %540 {offsets = [0, 384], sizes = [2, 128], strides = [1, 1]} : vector<2x512xf32> to vector<2x128xf32>
    %556 = arith.negf %555 : vector<2x128xf32>
    %557 = math.exp %556 : vector<2x128xf32>
    %cst_226 = arith.constant 1.000000e+00 : f32
    %558 = vector.broadcast %cst_226 : f32 to vector<2x128xf32>
    %559 = arith.addf %558, %557 : vector<2x128xf32>
    %560 = arith.divf %558, %559 : vector<2x128xf32>
    %561 = arith.mulf %552, %529 : vector<2x128xf32>
    %562 = arith.mulf %546, %554 : vector<2x128xf32>
    %563 = arith.addf %561, %562 : vector<2x128xf32>
    %564 = math.tanh %563 : vector<2x128xf32>
    %565 = arith.mulf %560, %564 : vector<2x128xf32>
    %566 = vector.extract_strided_slice %461 {offsets = [3, 0], sizes = [1, 512], strides = [1, 1]} : vector<16x512xf32> to vector<1x512xf32>
    %567 = vector.extract_strided_slice %461 {offsets = [11, 0], sizes = [1, 512], strides = [1, 1]} : vector<16x512xf32> to vector<1x512xf32>
    %568 = tpu.concatenate %566, %567 in 0 : vector<1x512xf32>, vector<1x512xf32> -> vector<2x512xf32>
    %c0_227 = arith.constant 0 : index
    %c0_228 = arith.constant 0 : index
    %569 = vector.load %arg23[%c0_227, %c0_228] : memref<128x512xf32, #tpu.memory_space<vmem>>, vector<128x512xf32>
    %cst_229 = arith.constant dense<0.000000e+00> : vector<2x512xf32>
    %570 = tpu.matmul %565, %569, %cst_229 {dimension_numbers = #tpu.dot_dimension_numbers<[1], [0], [0], [1], [0, 0, 1, 1], [], []>} : vector<2x128xf32>, vector<128x512xf32>, vector<2x512xf32> -> vector<2x512xf32>
    %571 = arith.addf %568, %570 : vector<2x512xf32>
    %c0_230 = arith.constant 0 : index
    %c0_231 = arith.constant 0 : index
    %572 = vector.load %arg24[%c0_230, %c0_231] : memref<1x512xf32, #tpu.memory_space<vmem>>, vector<1x512xf32>
    %573 = vector.broadcast %572 : vector<1x512xf32> to vector<2x512xf32>
    %574 = arith.addf %571, %573 : vector<2x512xf32>
    %575 = vector.extract_strided_slice %574 {offsets = [0, 0], sizes = [2, 128], strides = [1, 1]} : vector<2x512xf32> to vector<2x128xf32>
    %576 = arith.negf %575 : vector<2x128xf32>
    %577 = math.exp %576 : vector<2x128xf32>
    %cst_232 = arith.constant 1.000000e+00 : f32
    %578 = vector.broadcast %cst_232 : f32 to vector<2x128xf32>
    %579 = arith.addf %578, %577 : vector<2x128xf32>
    %580 = arith.divf %578, %579 : vector<2x128xf32>
    %581 = vector.extract_strided_slice %574 {offsets = [0, 128], sizes = [2, 128], strides = [1, 1]} : vector<2x512xf32> to vector<2x128xf32>
    %582 = arith.negf %581 : vector<2x128xf32>
    %583 = math.exp %582 : vector<2x128xf32>
    %cst_233 = arith.constant 1.000000e+00 : f32
    %584 = vector.broadcast %cst_233 : f32 to vector<2x128xf32>
    %585 = arith.addf %584, %583 : vector<2x128xf32>
    %586 = arith.divf %584, %585 : vector<2x128xf32>
    %587 = vector.extract_strided_slice %574 {offsets = [0, 256], sizes = [2, 128], strides = [1, 1]} : vector<2x512xf32> to vector<2x128xf32>
    %588 = math.tanh %587 : vector<2x128xf32>
    %589 = vector.extract_strided_slice %574 {offsets = [0, 384], sizes = [2, 128], strides = [1, 1]} : vector<2x512xf32> to vector<2x128xf32>
    %590 = arith.negf %589 : vector<2x128xf32>
    %591 = math.exp %590 : vector<2x128xf32>
    %cst_234 = arith.constant 1.000000e+00 : f32
    %592 = vector.broadcast %cst_234 : f32 to vector<2x128xf32>
    %593 = arith.addf %592, %591 : vector<2x128xf32>
    %594 = arith.divf %592, %593 : vector<2x128xf32>
    %595 = arith.mulf %586, %563 : vector<2x128xf32>
    %596 = arith.mulf %580, %588 : vector<2x128xf32>
    %597 = arith.addf %595, %596 : vector<2x128xf32>
    %598 = math.tanh %597 : vector<2x128xf32>
    %599 = arith.mulf %594, %598 : vector<2x128xf32>
    %600 = vector.extract_strided_slice %461 {offsets = [4, 0], sizes = [1, 512], strides = [1, 1]} : vector<16x512xf32> to vector<1x512xf32>
    %601 = vector.extract_strided_slice %461 {offsets = [12, 0], sizes = [1, 512], strides = [1, 1]} : vector<16x512xf32> to vector<1x512xf32>
    %602 = tpu.concatenate %600, %601 in 0 : vector<1x512xf32>, vector<1x512xf32> -> vector<2x512xf32>
    %c0_235 = arith.constant 0 : index
    %c0_236 = arith.constant 0 : index
    %603 = vector.load %arg23[%c0_235, %c0_236] : memref<128x512xf32, #tpu.memory_space<vmem>>, vector<128x512xf32>
    %cst_237 = arith.constant dense<0.000000e+00> : vector<2x512xf32>
    %604 = tpu.matmul %599, %603, %cst_237 {dimension_numbers = #tpu.dot_dimension_numbers<[1], [0], [0], [1], [0, 0, 1, 1], [], []>} : vector<2x128xf32>, vector<128x512xf32>, vector<2x512xf32> -> vector<2x512xf32>
    %605 = arith.addf %602, %604 : vector<2x512xf32>
    %c0_238 = arith.constant 0 : index
    %c0_239 = arith.constant 0 : index
    %606 = vector.load %arg24[%c0_238, %c0_239] : memref<1x512xf32, #tpu.memory_space<vmem>>, vector<1x512xf32>
    %607 = vector.broadcast %606 : vector<1x512xf32> to vector<2x512xf32>
    %608 = arith.addf %605, %607 : vector<2x512xf32>
    %609 = vector.extract_strided_slice %608 {offsets = [0, 0], sizes = [2, 128], strides = [1, 1]} : vector<2x512xf32> to vector<2x128xf32>
    %610 = arith.negf %609 : vector<2x128xf32>
    %611 = math.exp %610 : vector<2x128xf32>
    %cst_240 = arith.constant 1.000000e+00 : f32
    %612 = vector.broadcast %cst_240 : f32 to vector<2x128xf32>
    %613 = arith.addf %612, %611 : vector<2x128xf32>
    %614 = arith.divf %612, %613 : vector<2x128xf32>
    %615 = vector.extract_strided_slice %608 {offsets = [0, 128], sizes = [2, 128], strides = [1, 1]} : vector<2x512xf32> to vector<2x128xf32>
    %616 = arith.negf %615 : vector<2x128xf32>
    %617 = math.exp %616 : vector<2x128xf32>
    %cst_241 = arith.constant 1.000000e+00 : f32
    %618 = vector.broadcast %cst_241 : f32 to vector<2x128xf32>
    %619 = arith.addf %618, %617 : vector<2x128xf32>
    %620 = arith.divf %618, %619 : vector<2x128xf32>
    %621 = vector.extract_strided_slice %608 {offsets = [0, 256], sizes = [2, 128], strides = [1, 1]} : vector<2x512xf32> to vector<2x128xf32>
    %622 = math.tanh %621 : vector<2x128xf32>
    %623 = vector.extract_strided_slice %608 {offsets = [0, 384], sizes = [2, 128], strides = [1, 1]} : vector<2x512xf32> to vector<2x128xf32>
    %624 = arith.negf %623 : vector<2x128xf32>
    %625 = math.exp %624 : vector<2x128xf32>
    %cst_242 = arith.constant 1.000000e+00 : f32
    %626 = vector.broadcast %cst_242 : f32 to vector<2x128xf32>
    %627 = arith.addf %626, %625 : vector<2x128xf32>
    %628 = arith.divf %626, %627 : vector<2x128xf32>
    %629 = arith.mulf %620, %597 : vector<2x128xf32>
    %630 = arith.mulf %614, %622 : vector<2x128xf32>
    %631 = arith.addf %629, %630 : vector<2x128xf32>
    %632 = math.tanh %631 : vector<2x128xf32>
    %633 = arith.mulf %628, %632 : vector<2x128xf32>
    %634 = vector.extract_strided_slice %461 {offsets = [5, 0], sizes = [1, 512], strides = [1, 1]} : vector<16x512xf32> to vector<1x512xf32>
    %635 = vector.extract_strided_slice %461 {offsets = [13, 0], sizes = [1, 512], strides = [1, 1]} : vector<16x512xf32> to vector<1x512xf32>
    %636 = tpu.concatenate %634, %635 in 0 : vector<1x512xf32>, vector<1x512xf32> -> vector<2x512xf32>
    %c0_243 = arith.constant 0 : index
    %c0_244 = arith.constant 0 : index
    %637 = vector.load %arg23[%c0_243, %c0_244] : memref<128x512xf32, #tpu.memory_space<vmem>>, vector<128x512xf32>
    %cst_245 = arith.constant dense<0.000000e+00> : vector<2x512xf32>
    %638 = tpu.matmul %633, %637, %cst_245 {dimension_numbers = #tpu.dot_dimension_numbers<[1], [0], [0], [1], [0, 0, 1, 1], [], []>} : vector<2x128xf32>, vector<128x512xf32>, vector<2x512xf32> -> vector<2x512xf32>
    %639 = arith.addf %636, %638 : vector<2x512xf32>
    %c0_246 = arith.constant 0 : index
    %c0_247 = arith.constant 0 : index
    %640 = vector.load %arg24[%c0_246, %c0_247] : memref<1x512xf32, #tpu.memory_space<vmem>>, vector<1x512xf32>
    %641 = vector.broadcast %640 : vector<1x512xf32> to vector<2x512xf32>
    %642 = arith.addf %639, %641 : vector<2x512xf32>
    %643 = vector.extract_strided_slice %642 {offsets = [0, 0], sizes = [2, 128], strides = [1, 1]} : vector<2x512xf32> to vector<2x128xf32>
    %644 = arith.negf %643 : vector<2x128xf32>
    %645 = math.exp %644 : vector<2x128xf32>
    %cst_248 = arith.constant 1.000000e+00 : f32
    %646 = vector.broadcast %cst_248 : f32 to vector<2x128xf32>
    %647 = arith.addf %646, %645 : vector<2x128xf32>
    %648 = arith.divf %646, %647 : vector<2x128xf32>
    %649 = vector.extract_strided_slice %642 {offsets = [0, 128], sizes = [2, 128], strides = [1, 1]} : vector<2x512xf32> to vector<2x128xf32>
    %650 = arith.negf %649 : vector<2x128xf32>
    %651 = math.exp %650 : vector<2x128xf32>
    %cst_249 = arith.constant 1.000000e+00 : f32
    %652 = vector.broadcast %cst_249 : f32 to vector<2x128xf32>
    %653 = arith.addf %652, %651 : vector<2x128xf32>
    %654 = arith.divf %652, %653 : vector<2x128xf32>
    %655 = vector.extract_strided_slice %642 {offsets = [0, 256], sizes = [2, 128], strides = [1, 1]} : vector<2x512xf32> to vector<2x128xf32>
    %656 = math.tanh %655 : vector<2x128xf32>
    %657 = vector.extract_strided_slice %642 {offsets = [0, 384], sizes = [2, 128], strides = [1, 1]} : vector<2x512xf32> to vector<2x128xf32>
    %658 = arith.negf %657 : vector<2x128xf32>
    %659 = math.exp %658 : vector<2x128xf32>
    %cst_250 = arith.constant 1.000000e+00 : f32
    %660 = vector.broadcast %cst_250 : f32 to vector<2x128xf32>
    %661 = arith.addf %660, %659 : vector<2x128xf32>
    %662 = arith.divf %660, %661 : vector<2x128xf32>
    %663 = arith.mulf %654, %631 : vector<2x128xf32>
    %664 = arith.mulf %648, %656 : vector<2x128xf32>
    %665 = arith.addf %663, %664 : vector<2x128xf32>
    %666 = math.tanh %665 : vector<2x128xf32>
    %667 = arith.mulf %662, %666 : vector<2x128xf32>
    %668 = vector.extract_strided_slice %461 {offsets = [6, 0], sizes = [1, 512], strides = [1, 1]} : vector<16x512xf32> to vector<1x512xf32>
    %669 = vector.extract_strided_slice %461 {offsets = [14, 0], sizes = [1, 512], strides = [1, 1]} : vector<16x512xf32> to vector<1x512xf32>
    %670 = tpu.concatenate %668, %669 in 0 : vector<1x512xf32>, vector<1x512xf32> -> vector<2x512xf32>
    %c0_251 = arith.constant 0 : index
    %c0_252 = arith.constant 0 : index
    %671 = vector.load %arg23[%c0_251, %c0_252] : memref<128x512xf32, #tpu.memory_space<vmem>>, vector<128x512xf32>
    %cst_253 = arith.constant dense<0.000000e+00> : vector<2x512xf32>
    %672 = tpu.matmul %667, %671, %cst_253 {dimension_numbers = #tpu.dot_dimension_numbers<[1], [0], [0], [1], [0, 0, 1, 1], [], []>} : vector<2x128xf32>, vector<128x512xf32>, vector<2x512xf32> -> vector<2x512xf32>
    %673 = arith.addf %670, %672 : vector<2x512xf32>
    %c0_254 = arith.constant 0 : index
    %c0_255 = arith.constant 0 : index
    %674 = vector.load %arg24[%c0_254, %c0_255] : memref<1x512xf32, #tpu.memory_space<vmem>>, vector<1x512xf32>
    %675 = vector.broadcast %674 : vector<1x512xf32> to vector<2x512xf32>
    %676 = arith.addf %673, %675 : vector<2x512xf32>
    %677 = vector.extract_strided_slice %676 {offsets = [0, 0], sizes = [2, 128], strides = [1, 1]} : vector<2x512xf32> to vector<2x128xf32>
    %678 = arith.negf %677 : vector<2x128xf32>
    %679 = math.exp %678 : vector<2x128xf32>
    %cst_256 = arith.constant 1.000000e+00 : f32
    %680 = vector.broadcast %cst_256 : f32 to vector<2x128xf32>
    %681 = arith.addf %680, %679 : vector<2x128xf32>
    %682 = arith.divf %680, %681 : vector<2x128xf32>
    %683 = vector.extract_strided_slice %676 {offsets = [0, 128], sizes = [2, 128], strides = [1, 1]} : vector<2x512xf32> to vector<2x128xf32>
    %684 = arith.negf %683 : vector<2x128xf32>
    %685 = math.exp %684 : vector<2x128xf32>
    %cst_257 = arith.constant 1.000000e+00 : f32
    %686 = vector.broadcast %cst_257 : f32 to vector<2x128xf32>
    %687 = arith.addf %686, %685 : vector<2x128xf32>
    %688 = arith.divf %686, %687 : vector<2x128xf32>
    %689 = vector.extract_strided_slice %676 {offsets = [0, 256], sizes = [2, 128], strides = [1, 1]} : vector<2x512xf32> to vector<2x128xf32>
    %690 = math.tanh %689 : vector<2x128xf32>
    %691 = vector.extract_strided_slice %676 {offsets = [0, 384], sizes = [2, 128], strides = [1, 1]} : vector<2x512xf32> to vector<2x128xf32>
    %692 = arith.negf %691 : vector<2x128xf32>
    %693 = math.exp %692 : vector<2x128xf32>
    %cst_258 = arith.constant 1.000000e+00 : f32
    %694 = vector.broadcast %cst_258 : f32 to vector<2x128xf32>
    %695 = arith.addf %694, %693 : vector<2x128xf32>
    %696 = arith.divf %694, %695 : vector<2x128xf32>
    %697 = arith.mulf %688, %665 : vector<2x128xf32>
    %698 = arith.mulf %682, %690 : vector<2x128xf32>
    %699 = arith.addf %697, %698 : vector<2x128xf32>
    %700 = math.tanh %699 : vector<2x128xf32>
    %701 = arith.mulf %696, %700 : vector<2x128xf32>
    %702 = vector.extract_strided_slice %461 {offsets = [7, 0], sizes = [1, 512], strides = [1, 1]} : vector<16x512xf32> to vector<1x512xf32>
    %703 = vector.extract_strided_slice %461 {offsets = [15, 0], sizes = [1, 512], strides = [1, 1]} : vector<16x512xf32> to vector<1x512xf32>
    %704 = tpu.concatenate %702, %703 in 0 : vector<1x512xf32>, vector<1x512xf32> -> vector<2x512xf32>
    %c0_259 = arith.constant 0 : index
    %c0_260 = arith.constant 0 : index
    %705 = vector.load %arg23[%c0_259, %c0_260] : memref<128x512xf32, #tpu.memory_space<vmem>>, vector<128x512xf32>
    %cst_261 = arith.constant dense<0.000000e+00> : vector<2x512xf32>
    %706 = tpu.matmul %701, %705, %cst_261 {dimension_numbers = #tpu.dot_dimension_numbers<[1], [0], [0], [1], [0, 0, 1, 1], [], []>} : vector<2x128xf32>, vector<128x512xf32>, vector<2x512xf32> -> vector<2x512xf32>
    %707 = arith.addf %704, %706 : vector<2x512xf32>
    %c0_262 = arith.constant 0 : index
    %c0_263 = arith.constant 0 : index
    %708 = vector.load %arg24[%c0_262, %c0_263] : memref<1x512xf32, #tpu.memory_space<vmem>>, vector<1x512xf32>
    %709 = vector.broadcast %708 : vector<1x512xf32> to vector<2x512xf32>
    %710 = arith.addf %707, %709 : vector<2x512xf32>
    %711 = vector.extract_strided_slice %710 {offsets = [0, 0], sizes = [2, 128], strides = [1, 1]} : vector<2x512xf32> to vector<2x128xf32>
    %712 = arith.negf %711 : vector<2x128xf32>
    %713 = math.exp %712 : vector<2x128xf32>
    %cst_264 = arith.constant 1.000000e+00 : f32
    %714 = vector.broadcast %cst_264 : f32 to vector<2x128xf32>
    %715 = arith.addf %714, %713 : vector<2x128xf32>
    %716 = arith.divf %714, %715 : vector<2x128xf32>
    %717 = vector.extract_strided_slice %710 {offsets = [0, 128], sizes = [2, 128], strides = [1, 1]} : vector<2x512xf32> to vector<2x128xf32>
    %718 = arith.negf %717 : vector<2x128xf32>
    %719 = math.exp %718 : vector<2x128xf32>
    %cst_265 = arith.constant 1.000000e+00 : f32
    %720 = vector.broadcast %cst_265 : f32 to vector<2x128xf32>
    %721 = arith.addf %720, %719 : vector<2x128xf32>
    %722 = arith.divf %720, %721 : vector<2x128xf32>
    %723 = vector.extract_strided_slice %710 {offsets = [0, 256], sizes = [2, 128], strides = [1, 1]} : vector<2x512xf32> to vector<2x128xf32>
    %724 = math.tanh %723 : vector<2x128xf32>
    %725 = vector.extract_strided_slice %710 {offsets = [0, 384], sizes = [2, 128], strides = [1, 1]} : vector<2x512xf32> to vector<2x128xf32>
    %726 = arith.negf %725 : vector<2x128xf32>
    %727 = math.exp %726 : vector<2x128xf32>
    %cst_266 = arith.constant 1.000000e+00 : f32
    %728 = vector.broadcast %cst_266 : f32 to vector<2x128xf32>
    %729 = arith.addf %728, %727 : vector<2x128xf32>
    %730 = arith.divf %728, %729 : vector<2x128xf32>
    %731 = arith.mulf %722, %699 : vector<2x128xf32>
    %732 = arith.mulf %716, %724 : vector<2x128xf32>
    %733 = arith.addf %731, %732 : vector<2x128xf32>
    %734 = math.tanh %733 : vector<2x128xf32>
    %735 = arith.mulf %730, %734 : vector<2x128xf32>
    %736 = vector.extract_strided_slice %497 {offsets = [0, 0], sizes = [1, 128], strides = [1, 1]} : vector<2x128xf32> to vector<1x128xf32>
    %737 = vector.extract_strided_slice %531 {offsets = [0, 0], sizes = [1, 128], strides = [1, 1]} : vector<2x128xf32> to vector<1x128xf32>
    %738 = vector.extract_strided_slice %565 {offsets = [0, 0], sizes = [1, 128], strides = [1, 1]} : vector<2x128xf32> to vector<1x128xf32>
    %739 = vector.extract_strided_slice %599 {offsets = [0, 0], sizes = [1, 128], strides = [1, 1]} : vector<2x128xf32> to vector<1x128xf32>
    %740 = vector.extract_strided_slice %633 {offsets = [0, 0], sizes = [1, 128], strides = [1, 1]} : vector<2x128xf32> to vector<1x128xf32>
    %741 = vector.extract_strided_slice %667 {offsets = [0, 0], sizes = [1, 128], strides = [1, 1]} : vector<2x128xf32> to vector<1x128xf32>
    %742 = vector.extract_strided_slice %701 {offsets = [0, 0], sizes = [1, 128], strides = [1, 1]} : vector<2x128xf32> to vector<1x128xf32>
    %743 = vector.extract_strided_slice %735 {offsets = [0, 0], sizes = [1, 128], strides = [1, 1]} : vector<2x128xf32> to vector<1x128xf32>
    %744 = tpu.concatenate %736, %737, %738, %739, %740, %741, %742, %743 in 0 : vector<1x128xf32>, vector<1x128xf32>, vector<1x128xf32>, vector<1x128xf32>, vector<1x128xf32>, vector<1x128xf32>, vector<1x128xf32>, vector<1x128xf32> -> vector<8x128xf32>
    %c0_267 = arith.constant 0 : index
    %c0_268 = arith.constant 0 : index
    %745 = vector.load %arg25[%c0_267, %c0_268] : memref<128x5xf32, #tpu.memory_space<vmem>>, vector<128x5xf32>
    %cst_269 = arith.constant dense<0.000000e+00> : vector<8x5xf32>
    %746 = tpu.matmul %744, %745, %cst_269 {dimension_numbers = #tpu.dot_dimension_numbers<[1], [0], [0], [1], [0, 0, 1, 1], [], []>} : vector<8x128xf32>, vector<128x5xf32>, vector<8x5xf32> -> vector<8x5xf32>
    %c0_270 = arith.constant 0 : index
    %c0_271 = arith.constant 0 : index
    %747 = vector.load %arg26[%c0_270, %c0_271] : memref<1x5xf32, #tpu.memory_space<vmem>>, vector<1x5xf32>
    %748 = vector.broadcast %747 : vector<1x5xf32> to vector<8x5xf32>
    %749 = arith.addf %746, %748 : vector<8x5xf32>
    %c0_272 = arith.constant 0 : index
    %c0_273 = arith.constant 0 : index
    %c0_274 = arith.constant 0 : index
    %750 = vector.load %arg27[%c0_272, %c0_273, %c0_274] : memref<2x8x5xf32, #tpu.memory_space<vmem>>, vector<1x8x5xf32>
    %751 = vector.shape_cast %750 : vector<1x8x5xf32> to vector<8x5xf32>
    %752 = vector.shape_cast %749 : vector<8x5xf32> to vector<1x8x5xf32>
    tpu.vector_store %arg27[%c0_272, %c0_273, %c0_274], %752 {strides = array<i32>} : memref<2x8x5xf32, #tpu.memory_space<vmem>>, vector<1x8x5xf32>,
    %753 = vector.extract_strided_slice %497 {offsets = [1, 0], sizes = [1, 128], strides = [1, 1]} : vector<2x128xf32> to vector<1x128xf32>
    %754 = vector.extract_strided_slice %531 {offsets = [1, 0], sizes = [1, 128], strides = [1, 1]} : vector<2x128xf32> to vector<1x128xf32>
    %755 = vector.extract_strided_slice %565 {offsets = [1, 0], sizes = [1, 128], strides = [1, 1]} : vector<2x128xf32> to vector<1x128xf32>
    %756 = vector.extract_strided_slice %599 {offsets = [1, 0], sizes = [1, 128], strides = [1, 1]} : vector<2x128xf32> to vector<1x128xf32>
    %757 = vector.extract_strided_slice %633 {offsets = [1, 0], sizes = [1, 128], strides = [1, 1]} : vector<2x128xf32> to vector<1x128xf32>
    %758 = vector.extract_strided_slice %667 {offsets = [1, 0], sizes = [1, 128], strides = [1, 1]} : vector<2x128xf32> to vector<1x128xf32>
    %759 = vector.extract_strided_slice %701 {offsets = [1, 0], sizes = [1, 128], strides = [1, 1]} : vector<2x128xf32> to vector<1x128xf32>
    %760 = vector.extract_strided_slice %735 {offsets = [1, 0], sizes = [1, 128], strides = [1, 1]} : vector<2x128xf32> to vector<1x128xf32>
    %761 = tpu.concatenate %753, %754, %755, %756, %757, %758, %759, %760 in 0 : vector<1x128xf32>, vector<1x128xf32>, vector<1x128xf32>, vector<1x128xf32>, vector<1x128xf32>, vector<1x128xf32>, vector<1x128xf32>, vector<1x128xf32> -> vector<8x128xf32>
    %c0_275 = arith.constant 0 : index
    %c0_276 = arith.constant 0 : index
    %762 = vector.load %arg25[%c0_275, %c0_276] : memref<128x5xf32, #tpu.memory_space<vmem>>, vector<128x5xf32>
    %cst_277 = arith.constant dense<0.000000e+00> : vector<8x5xf32>
    %763 = tpu.matmul %761, %762, %cst_277 {dimension_numbers = #tpu.dot_dimension_numbers<[1], [0], [0], [1], [0, 0, 1, 1], [], []>} : vector<8x128xf32>, vector<128x5xf32>, vector<8x5xf32> -> vector<8x5xf32>
    %c0_278 = arith.constant 0 : index
    %c0_279 = arith.constant 0 : index
    %764 = vector.load %arg26[%c0_278, %c0_279] : memref<1x5xf32, #tpu.memory_space<vmem>>, vector<1x5xf32>
    %765 = vector.broadcast %764 : vector<1x5xf32> to vector<8x5xf32>
    %766 = arith.addf %763, %765 : vector<8x5xf32>
    %c1_280 = arith.constant 1 : index
    %c0_281 = arith.constant 0 : index
    %c0_282 = arith.constant 0 : index
    %767 = vector.load %arg27[%c1_280, %c0_281, %c0_282] : memref<2x8x5xf32, #tpu.memory_space<vmem>>, vector<1x8x5xf32>
    %768 = vector.shape_cast %767 : vector<1x8x5xf32> to vector<8x5xf32>
    %769 = vector.shape_cast %766 : vector<8x5xf32> to vector<1x8x5xf32>
    tpu.vector_store %arg27[%c1_280, %c0_281, %c0_282], %769 {strides = array<i32>} : memref<2x8x5xf32, #tpu.memory_space<vmem>>, vector<1x8x5xf32>,
    return
  }
  func.func @transform_0(%arg0: i32) -> (i32, i32) {
    %c0_i32 = arith.constant 0 : i32
    %c0_i32_0 = arith.constant 0 : i32
    %c0_i32_1 = arith.constant 0 : i32
    return %c0_i32, %c0_i32_0 : i32, i32
  }
  func.func @transform_1(%arg0: i32) -> (i32, i32) {
    %c0_i32 = arith.constant 0 : i32
    %c0_i32_0 = arith.constant 0 : i32
    %c0_i32_1 = arith.constant 0 : i32
    return %c0_i32, %c0_i32_0 : i32, i32
  }
  func.func @transform_2(%arg0: i32) -> (i32, i32) {
    %c0_i32 = arith.constant 0 : i32
    %c0_i32_0 = arith.constant 0 : i32
    %c0_i32_1 = arith.constant 0 : i32
    return %c0_i32, %c0_i32_0 : i32, i32
  }
  func.func @transform_3(%arg0: i32) -> (i32, i32) {
    %c0_i32 = arith.constant 0 : i32
    %c0_i32_0 = arith.constant 0 : i32
    %c0_i32_1 = arith.constant 0 : i32
    return %c0_i32, %c0_i32_0 : i32, i32
  }
  func.func @transform_4(%arg0: i32) -> (i32, i32) {
    %c0_i32 = arith.constant 0 : i32
    %c0_i32_0 = arith.constant 0 : i32
    %c0_i32_1 = arith.constant 0 : i32
    return %c0_i32, %c0_i32_0 : i32, i32
  }
  func.func @transform_5(%arg0: i32) -> (i32, i32) {
    %c0_i32 = arith.constant 0 : i32
    %c0_i32_0 = arith.constant 0 : i32
    %c0_i32_1 = arith.constant 0 : i32
    return %c0_i32, %c0_i32_0 : i32, i32
  }
  func.func @transform_6(%arg0: i32) -> (i32, i32) {
    %c0_i32 = arith.constant 0 : i32
    %c0_i32_0 = arith.constant 0 : i32
    %c0_i32_1 = arith.constant 0 : i32
    return %c0_i32, %c0_i32_0 : i32, i32
  }
  func.func @transform_7(%arg0: i32) -> (i32, i32) {
    %c0_i32 = arith.constant 0 : i32
    %c0_i32_0 = arith.constant 0 : i32
    %c0_i32_1 = arith.constant 0 : i32
    return %c0_i32, %c0_i32_0 : i32, i32
  }
  func.func @transform_8(%arg0: i32) -> (i32, i32, i32) {
    %c0_i32 = arith.constant 0 : i32
    %c0_i32_0 = arith.constant 0 : i32
    %c0_i32_1 = arith.constant 0 : i32
    %c0_i32_2 = arith.constant 0 : i32
    return %c0_i32, %c0_i32_0, %c0_i32_1 : i32, i32, i32
  }
  func.func @transform_9(%arg0: i32) -> (i32, i32, i32) {
    %c0_i32 = arith.constant 0 : i32
    %c0_i32_0 = arith.constant 0 : i32
    %c0_i32_1 = arith.constant 0 : i32
    %c0_i32_2 = arith.constant 0 : i32
    return %c0_i32, %c0_i32_0, %c0_i32_1 : i32, i32, i32
  }
  func.func @transform_10(%arg0: i32) -> (i32, i32, i32) {
    %c0_i32 = arith.constant 0 : i32
    %c0_i32_0 = arith.constant 0 : i32
    %c0_i32_1 = arith.constant 0 : i32
    %c0_i32_2 = arith.constant 0 : i32
    return %c0_i32, %c0_i32_0, %c0_i32_1 : i32, i32, i32
  }
  func.func @transform_11(%arg0: i32) -> (i32, i32, i32) {
    %c0_i32 = arith.constant 0 : i32
    %c0_i32_0 = arith.constant 0 : i32
    %c0_i32_1 = arith.constant 0 : i32
    %c0_i32_2 = arith.constant 0 : i32
    return %c0_i32, %c0_i32_0, %c0_i32_1 : i32, i32, i32
  }
  func.func @transform_12(%arg0: i32) -> (i32, i32, i32) {
    %c0_i32 = arith.constant 0 : i32
    %c0_i32_0 = arith.constant 0 : i32
    %c0_i32_1 = arith.constant 0 : i32
    %c0_i32_2 = arith.constant 0 : i32
    return %c0_i32, %c0_i32_0, %c0_i32_1 : i32, i32, i32
  }
  func.func @transform_13(%arg0: i32) -> (i32, i32, i32) {
    %c0_i32 = arith.constant 0 : i32
    %c0_i32_0 = arith.constant 0 : i32
    %c0_i32_1 = arith.constant 0 : i32
    %c0_i32_2 = arith.constant 0 : i32
    return %c0_i32, %c0_i32_0, %c0_i32_1 : i32, i32, i32
  }
  func.func @transform_14(%arg0: i32) -> (i32, i32, i32) {
    %c0_i32 = arith.constant 0 : i32
    %c0_i32_0 = arith.constant 0 : i32
    %c0_i32_1 = arith.constant 0 : i32
    %c0_i32_2 = arith.constant 0 : i32
    return %c0_i32, %c0_i32_0, %c0_i32_1 : i32, i32, i32
  }
  func.func @transform_15(%arg0: i32) -> (i32, i32, i32) {
    %c0_i32 = arith.constant 0 : i32
    %c0_i32_0 = arith.constant 0 : i32
    %c0_i32_1 = arith.constant 0 : i32
    %c0_i32_2 = arith.constant 0 : i32
    return %c0_i32, %c0_i32_0, %c0_i32_1 : i32, i32, i32
  }
  func.func @transform_16(%arg0: i32) -> (i32, i32, i32) {
    %c0_i32 = arith.constant 0 : i32
    %c0_i32_0 = arith.constant 0 : i32
    %c0_i32_1 = arith.constant 0 : i32
    %c0_i32_2 = arith.constant 0 : i32
    return %c0_i32, %c0_i32_0, %c0_i32_1 : i32, i32, i32
  }
  func.func @transform_17(%arg0: i32) -> (i32, i32, i32) {
    %c0_i32 = arith.constant 0 : i32
    %c0_i32_0 = arith.constant 0 : i32
    %c0_i32_1 = arith.constant 0 : i32
    %c0_i32_2 = arith.constant 0 : i32
    return %c0_i32, %c0_i32_0, %c0_i32_1 : i32, i32, i32
  }
  func.func @transform_18(%arg0: i32) -> (i32, i32, i32) {
    %c0_i32 = arith.constant 0 : i32
    %c0_i32_0 = arith.constant 0 : i32
    %c0_i32_1 = arith.constant 0 : i32
    %c0_i32_2 = arith.constant 0 : i32
    return %c0_i32, %c0_i32_0, %c0_i32_1 : i32, i32, i32
  }
  func.func @transform_19(%arg0: i32) -> (i32, i32, i32) {
    %c0_i32 = arith.constant 0 : i32
    %c0_i32_0 = arith.constant 0 : i32
    %c0_i32_1 = arith.constant 0 : i32
    %c0_i32_2 = arith.constant 0 : i32
    return %c0_i32, %c0_i32_0, %c0_i32_1 : i32, i32, i32
  }
  func.func @transform_20(%arg0: i32) -> (i32, i32) {
    %c0_i32 = arith.constant 0 : i32
    %c0_i32_0 = arith.constant 0 : i32
    %c0_i32_1 = arith.constant 0 : i32
    return %c0_i32, %c0_i32_0 : i32, i32
  }
  func.func @transform_21(%arg0: i32) -> (i32, i32) {
    %c0_i32 = arith.constant 0 : i32
    %c0_i32_0 = arith.constant 0 : i32
    %c0_i32_1 = arith.constant 0 : i32
    return %c0_i32, %c0_i32_0 : i32, i32
  }
  func.func @transform_22(%arg0: i32) -> (i32, i32) {
    %c0_i32 = arith.constant 0 : i32
    %c0_i32_0 = arith.constant 0 : i32
    %c0_i32_1 = arith.constant 0 : i32
    return %c0_i32, %c0_i32_0 : i32, i32
  }
  func.func @transform_23(%arg0: i32) -> (i32, i32) {
    %c0_i32 = arith.constant 0 : i32
    %c0_i32_0 = arith.constant 0 : i32
    %c0_i32_1 = arith.constant 0 : i32
    return %c0_i32, %c0_i32_0 : i32, i32
  }
  func.func @transform_24(%arg0: i32) -> (i32, i32) {
    %c0_i32 = arith.constant 0 : i32
    %c0_i32_0 = arith.constant 0 : i32
    %c0_i32_1 = arith.constant 0 : i32
    return %c0_i32, %c0_i32_0 : i32, i32
  }
  func.func @transform_25(%arg0: i32) -> (i32, i32) {
    %c0_i32 = arith.constant 0 : i32
    %c0_i32_0 = arith.constant 0 : i32
    %c0_i32_1 = arith.constant 0 : i32
    return %c0_i32, %c0_i32_0 : i32, i32
  }
  func.func @transform_26(%arg0: i32) -> (i32, i32, i32) {
    %c0_i32 = arith.constant 0 : i32
    %c0_i32_0 = arith.constant 0 : i32
    %c0_i32_1 = arith.constant 0 : i32
    %c0_i32_2 = arith.constant 0 : i32
    return %c0_i32, %c0_i32_0, %c0_i32_1 : i32, i32, i32
  }
}

</mosaic_0001>

<bundles_post_ra>
// kernel: clue_model_forward.1
= control target key start
LH: loop header
LB: loop body
LE: loop exit
PB: predicated region body
PF: predicated region fallthrough
CT: control target
= control target key end

     0   :  { %s8628_s0 = inlined_call_operand.vmem [shape: s32[16,1], index: 0, kind: input, shape index: {}]   ;;  %s8629_s1 = inlined_call_operand.vmem [shape: s32[16,1], index: 1, kind: input, shape index: {}]   ;;  %s8630_s2 = inlined_call_operand.vmem [shape: f32[2,8], index: 2, kind: input, shape index: {}]   ;;  %s8631_s3 = inlined_call_operand.vmem [shape: f32[64,32], index: 3, kind: input, shape index: {}]   ;;  %s8632_s4 = inlined_call_operand.hbm [shape: f32[16,32], index: 4, kind: input, shape index: {}]   ;;  %s8633_s5 = inlined_call_operand.vmem [shape: f32[1,32], index: 5, kind: input, shape index: {}]   ;;  %s8634_s6 = inlined_call_operand.hbm [shape: f32[1,32], index: 6, kind: input, shape index: {}]   ;;  %s8635_s7 = inlined_call_operand.hbm [shape: f32[1,32], index: 7, kind: input, shape index: {}]   ;;  %s8636_s8 = inlined_call_operand.hbm [shape: f32[2,32,96], index: 8, kind: input, shape index: {}]   ;;  %s8637_s9 = inlined_call_operand.hbm [shape: f32[2,1,96], index: 9, kind: input, shape index: {}]   ;;  %s8638_s10 = inlined_call_operand.hbm [shape: f32[2,32,32], index: 10, kind: input, shape index: {}]   ;;  %s8639_s11 = inlined_call_operand.hbm [shape: f32[2,1,32], index: 11, kind: input, shape index: {}]   ;;  %s8640_s12 = inlined_call_operand.hbm [shape: f32[2,1,32], index: 12, kind: input, shape index: {}]   ;;  %s8641_s13 = inlined_call_operand.hbm [shape: f32[2,1,32], index: 13, kind: input, shape index: {}]   ;;  %s8642_s14 = inlined_call_operand.hbm [shape: f32[2,32,64], index: 14, kind: input, shape index: {}]   ;;  %s8643_s15 = inlined_call_operand.hbm [shape: f32[2,1,64], index: 15, kind: input, shape index: {}]   ;;  %s8644_s16 = inlined_call_operand.vmem [shape: f32[2,64,32], index: 16, kind: input, shape index: {}]   ;;  %s8645_s17 = inlined_call_operand.hbm [shape: f32[2,1,32], index: 17, kind: input, shape index: {}]   ;;  %s8646_s18 = inlined_call_operand.hbm [shape: f32[2,1,32], index: 18, kind: input, shape index: {}]   ;;  %s8647_s19 = inlined_call_operand.hbm [shape: f32[2,1,32], index: 19, kind: input, shape index: {}]   ;;  %s8648_s20 = inlined_call_operand.hbm [shape: f32[32,512], index: 20, kind: input, shape index: {}]   ;;  %s8649_s21 = inlined_call_operand.hbm [shape: f32[1,512], index: 21, kind: input, shape index: {}]   ;;  %s8650_s22 = inlined_call_operand.vmem [shape: f32[128,512], index: 22, kind: input, shape index: {}]   ;;  %s8651_s23 = inlined_call_operand.hbm [shape: f32[1,512], index: 23, kind: input, shape index: {}]   ;;  %s8652_s24 = inlined_call_operand.vmem [shape: f32[128,5], index: 24, kind: input, shape index: {}]   ;;  %s8653_s25 = inlined_call_operand.hbm [shape: f32[1,5], index: 25, kind: input, shape index: {}]   ;;  %s8654_s26 = inlined_call_operand.vmem [shape: f32[2,8,5], index: 26, kind: output, shape index: {}]  }
   0x1   :  { %8678 = sst [smem:[#allocation63_spill]] %s8628_s0 }
   0x2   :  { %8679 = sst [smem:[#allocation64_spill]] %s8629_s1 }
   0x3   :  { %8680 = sst [smem:[#allocation65_spill]] %s8630_s2 }
   0x4   :  { %8681 = sst [smem:[#allocation66_spill]] %s8631_s3 }
   0x5   :  { %8682 = sst [smem:[#allocation67_spill]] %s8632_s4 }
   0x6   :  { %8683 = sst [smem:[#allocation68_spill]] %s8633_s5 }
   0x7   :  { %8684 = sst [smem:[#allocation69_spill]] %s8634_s6 }
   0x8   :  { %8685 = sst [smem:[#allocation70_spill]] %s8635_s7 }
   0x9   :  { %8686 = sst [smem:[#allocation71_spill]] %s8636_s8 }
   0xa   :  { %8687 = sst [smem:[#allocation72_spill]] %s8637_s9 }
   0xb   :  { %8688 = sst [smem:[#allocation73_spill]] %s8638_s10 }
   0xc   :  { %8689 = sst [smem:[#allocation74_spill]] %s8652_s24 }
   0xd   :  { %8690 = sst [smem:[#allocation75_spill]] %s8654_s26 }
   0xe   :  { %31 = vsyncpa [#allocation3], 0 }
   0xf   :  { %32 = vsyncpa [#allocation5], 0 }
  0x10   :  { %33 = vsyncpa [#allocation8], 0 }
  0x11   :  { %34 = vsyncpa [#allocation11], 0 }
  0x12   :  { %35 = vsyncpa [#allocation14], 0 }
  0x13   :  { %36 = vsyncpa [#allocation17], 0 }
  0x14   :  { %37 = vsyncpa [#allocation20], 0 }
  0x15   :  { %38 = vsyncpa [#allocation23], 0 }
  0x16   :  { %39 = vsyncpa [#allocation26], 0 }
  0x17   :  { %40 = vsyncpa [#allocation29], 0  ;;  %s6926_s27 = smov [#allocation4]   ;;  %s8691_s8 = sld [smem:[#allocation69_spill]] }
  0x18   :  { %s69_s3 = sshll.u32 %s6926_s27, 4  ;;  %s70_s3 = int_to_ptr.vmem [resolvable:$true] %s69_s3 }
  0x1d   :  { %s6510_s4 = scalar_lea.hbm %s8691_s8, 16 }
  0x1e   :  { %p6511_p0 = scmp.ne.s32.totalorder %s8691_s8, %s6510_s4  ;;  %p6514_p1 = scmp.lt.u32.totalorder %s6510_s4, %s8691_s8 }
  0x20   :  { %p6516_p2 = pnand %p6514_p1, %p6511_p0 }
  0x22   :  { %6519 = shalt.err (!%p6516_p2)
}
  0x23   :  { %s6520_s2 = scalar_lea.vmem %s70_s3, 16  ;;  %s6524_s5 = scalar_lea.vmem %s70_s3, 32 }
  0x24   :  { %p6521_p3 = scmp.ne.s32.totalorder %s70_s3, %s6520_s2  ;;  %p6525_p4 = scmp.lt.s32.totalorder %s70_s3, %s70_s3 }
  0x25   :  { %p6526_p5 = scmp.lt.s32.totalorder %s6524_s5, %s6520_s2 }
  0x27   :  { %p6527_p6 = por %p6526_p5, %p6525_p4 }
  0x29   :  { %p6528_p7 = pnand %p6527_p6, %p6521_p3 }
  0x2b   :  { %6531 = shalt.err (!%p6528_p7)
}
  0x2c   :  { %72 = dma.hbm_to_vmem [thread:$0]  %s8691_s8, 16, %s70_s3, [#allocation5]  }
  0x2d   :  { %s6927_s1 = smov [#allocation7]   ;;  %s6928_s7 = smov [#allocation10]  }
  0x2e   :  { %s88_s27 = sshll.u32 %s6927_s1, 4  ;;  %s112_s28 = sshll.u32 %s6928_s7, 4  ;;  %s89_s27 = int_to_ptr.vmem [resolvable:$true] %s88_s27  ;;  %s113_s28 = int_to_ptr.vmem [resolvable:$true] %s112_s28 }
  0x2f   :  { %s8692_s0 = sld [smem:[#allocation71_spill]] }
  0x35   :  { %s6532_s9 = scalar_lea.hbm %s8692_s0, 1024 }
  0x36   :  { %p6533_p8 = scmp.ne.s32.totalorder %s8692_s0, %s6532_s9  ;;  %p6536_p9 = scmp.lt.u32.totalorder %s6532_s9, %s8692_s0 }
  0x38   :  { %p6538_p10 = pnand %p6536_p9, %p6533_p8 }
  0x3a   :  { %6541 = shalt.err (!%p6538_p10)
}
  0x3b   :  { %s6542_s3 = scalar_lea.vmem %s89_s27, 1024  ;;  %p6547_p12 = scmp.lt.s32.totalorder %s89_s27, %s89_s27 }
  0x3c   :  { %p6543_p11 = scmp.ne.s32.totalorder %s89_s27, %s6542_s3  ;;  %p6548_p13 = scmp.lt.s32.totalorder %s6542_s3, %s6542_s3 }
  0x3e   :  { %p6549_p0 = por %p6548_p13, %p6547_p12 }
  0x40   :  { %p6550_p1 = pnand %p6549_p0, %p6543_p11 }
  0x42   :  { %6553 = shalt.err (!%p6550_p1)
}
  0x43   :  { %s6929_s8 = smov 128   ;;  %s6930_s10 = smov 8  }
  0x44   :  { %94 = dma.hbm_to_vmem [thread:$0]  %s8692_s0, 1024, %s89_s27, [#allocation8], %s6929_s8, %s6929_s8, %s6930_s10  }
  0x45   :  { %s8693_s4 = sld [smem:[#allocation73_spill]] }
  0x4b   :  { %s6554_s29 = scalar_lea.hbm %s8693_s4, 1024 }
  0x4c   :  { %p6555_p2 = scmp.ne.s32.totalorder %s8693_s4, %s6554_s29  ;;  %p6558_p3 = scmp.lt.u32.totalorder %s6554_s29, %s8693_s4 }
  0x4e   :  { %p6560_p4 = pnand %p6558_p3, %p6555_p2 }
  0x50   :  { %6563 = shalt.err (!%p6560_p4)
}
  0x51   :  { %s6564_s3 = scalar_lea.vmem %s113_s28, 1024  ;;  %p6569_p6 = scmp.lt.s32.totalorder %s113_s28, %s113_s28 }
  0x52   :  { %p6565_p5 = scmp.ne.s32.totalorder %s113_s28, %s6564_s3  ;;  %p6570_p7 = scmp.lt.s32.totalorder %s6564_s3, %s6564_s3 }
  0x54   :  { %p6571_p8 = por %p6570_p7, %p6569_p6 }
  0x56   :  { %p6572_p9 = pnand %p6571_p8, %p6565_p5 }
  0x58   :  { %6575 = shalt.err (!%p6572_p9)
}
  0x59   :  { %118 = dma.hbm_to_vmem [thread:$0]  %s8693_s4, 1024, %s113_s28, [#allocation11], %s6929_s8, %s6929_s8, %s6930_s10  }
  0x5a   :  { %s6931_s26 = smov [#allocation13]   ;;  %s6932_s1 = smov [#allocation16]  }
  0x5b   :  { %s136_s6 = sshll.u32 %s6931_s26, 4  ;;  %s160_s7 = sshll.u32 %s6932_s1, 4  ;;  %s137_s6 = int_to_ptr.vmem [resolvable:$true] %s136_s6  ;;  %s161_s7 = int_to_ptr.vmem [resolvable:$true] %s160_s7 }
  0x5c   :  { %s6576_s30 = scalar_lea.hbm %s8640_s12, 32 }
  0x5d   :  { %p6577_p10 = scmp.ne.s32.totalorder %s8640_s12, %s6576_s30  ;;  %p6580_p11 = scmp.lt.u32.totalorder %s6576_s30, %s8640_s12 }
  0x5f   :  { %p6582_p12 = pnand %p6580_p11, %p6577_p10 }
  0x61   :  { %6585 = shalt.err (!%p6582_p12)
}
  0x62   :  { %s6586_s28 = scalar_lea.vmem %s137_s6, 32  ;;  %p6591_p0 = scmp.lt.s32.totalorder %s137_s6, %s137_s6 }
  0x63   :  { %p6587_p13 = scmp.ne.s32.totalorder %s137_s6, %s6586_s28  ;;  %p6592_p1 = scmp.lt.s32.totalorder %s6586_s28, %s6586_s28 }
  0x65   :  { %p6593_p2 = por %p6592_p1, %p6591_p0 }
  0x67   :  { %p6594_p3 = pnand %p6593_p2, %p6587_p13 }
  0x69   :  { %6597 = shalt.err (!%p6594_p3)
}
  0x6a   :  { %s6933_s4 = smov 16   ;;  %s6934_s27 = smov 1  }
  0x6b   :  { %142 = dma.hbm_to_vmem [thread:$0]  %s8640_s12, 32, %s137_s6, [#allocation14], %s6933_s4, %s6933_s4, %s6934_s27  }
  0x6c   :  { %s6598_s29 = scalar_lea.hbm %s8642_s14, 1024 }
  0x6d   :  { %p6599_p4 = scmp.ne.s32.totalorder %s8642_s14, %s6598_s29  ;;  %p6602_p5 = scmp.lt.u32.totalorder %s6598_s29, %s8642_s14 }
  0x6f   :  { %p6604_p6 = pnand %p6602_p5, %p6599_p4 }
  0x71   :  { %6607 = shalt.err (!%p6604_p6)
}
  0x72   :  { %s6608_s3 = scalar_lea.vmem %s161_s7, 1024  ;;  %p6613_p8 = scmp.lt.s32.totalorder %s161_s7, %s161_s7 }
  0x73   :  { %p6609_p7 = scmp.ne.s32.totalorder %s161_s7, %s6608_s3  ;;  %p6614_p9 = scmp.lt.s32.totalorder %s6608_s3, %s6608_s3 }
  0x75   :  { %p6615_p10 = por %p6614_p9, %p6613_p8 }
  0x77   :  { %p6616_p11 = pnand %p6615_p10, %p6609_p7 }
  0x79   :  { %6619 = shalt.err (!%p6616_p11)
}
  0x7a   :  { %166 = dma.hbm_to_vmem [thread:$0]  %s8642_s14, 1024, %s161_s7, [#allocation17], %s6929_s8, %s6929_s8, %s6930_s10  }
  0x7b   :  { %s6935_s28 = smov [#allocation19]   ;;  %s6936_s26 = smov [#allocation22]  }
  0x7c   :  { %s186_s0 = sshll.u32 %s6935_s28, 4  ;;  %s210_s24 = sshll.u32 %s6936_s26, 4  ;;  %s187_s0 = int_to_ptr.vmem [resolvable:$true] %s186_s0  ;;  %s211_s24 = int_to_ptr.vmem [resolvable:$true] %s210_s24 }
  0x7d   :  { %s6620_s9 = scalar_lea.hbm %s8645_s17, 32 }
  0x7e   :  { %p6621_p12 = scmp.ne.s32.totalorder %s8645_s17, %s6620_s9  ;;  %p6624_p13 = scmp.lt.u32.totalorder %s6620_s9, %s8645_s17 }
  0x80   :  { %p6626_p0 = pnand %p6624_p13, %p6621_p12 }
  0x82   :  { %6629 = shalt.err (!%p6626_p0)
}
  0x83   :  { %s6630_s14 = scalar_lea.vmem %s187_s0, 32  ;;  %p6635_p2 = scmp.lt.s32.totalorder %s187_s0, %s187_s0 }
  0x84   :  { %p6631_p1 = scmp.ne.s32.totalorder %s187_s0, %s6630_s14  ;;  %p6636_p3 = scmp.lt.s32.totalorder %s6630_s14, %s6630_s14 }
  0x86   :  { %p6637_p4 = por %p6636_p3, %p6635_p2 }
  0x88   :  { %p6638_p5 = pnand %p6637_p4, %p6631_p1 }
  0x8a   :  { %6641 = shalt.err (!%p6638_p5)
}
  0x8b   :  { %192 = dma.hbm_to_vmem [thread:$0]  %s8645_s17, 32, %s187_s0, [#allocation20], %s6933_s4, %s6933_s4, %s6934_s27  }
  0x8c   :  { %s6642_s26 = scalar_lea.hbm %s8647_s19, 32 }
  0x8d   :  { %p6643_p6 = scmp.ne.s32.totalorder %s8647_s19, %s6642_s26  ;;  %p6646_p7 = scmp.lt.u32.totalorder %s6642_s26, %s8647_s19 }
  0x8f   :  { %p6648_p8 = pnand %p6646_p7, %p6643_p6 }
  0x91   :  { %6651 = shalt.err (!%p6648_p8)
}
  0x92   :  { %s6652_s2 = scalar_lea.vmem %s211_s24, 32  ;;  %p6657_p10 = scmp.lt.s32.totalorder %s211_s24, %s211_s24 }
  0x93   :  { %p6653_p9 = scmp.ne.s32.totalorder %s211_s24, %s6652_s2  ;;  %p6658_p11 = scmp.lt.s32.totalorder %s6652_s2, %s6652_s2 }
  0x95   :  { %p6659_p12 = por %p6658_p11, %p6657_p10 }
  0x97   :  { %p6660_p13 = pnand %p6659_p12, %p6653_p9 }
  0x99   :  { %6663 = shalt.err (!%p6660_p13)
}
  0x9a   :  { %216 = dma.hbm_to_vmem [thread:$0]  %s8647_s19, 32, %s211_s24, [#allocation23], %s6933_s4, %s6933_s4, %s6934_s27  }
  0x9b   :  { %s6937_s5 = smov [#allocation25]   ;;  %s6938_s14 = smov [#allocation2]  }
  0x9c   :  { %s235_s3 = sshll.u32 %s6937_s5, 4  ;;  %s54_s7 = sshll.u32 %s6938_s14, 4  ;;  %s236_s3 = int_to_ptr.vmem [resolvable:$true] %s235_s3  ;;  %s55_s7 = int_to_ptr.vmem [resolvable:$true] %s54_s7 }
  0x9d   :  { %s6664_s28 = scalar_lea.hbm %s8649_s21, 64 }
  0x9e   :  { %p6665_p0 = scmp.ne.s32.totalorder %s8649_s21, %s6664_s28  ;;  %p6668_p1 = scmp.lt.u32.totalorder %s6664_s28, %s8649_s21 }
  0xa0   :  { %p6670_p2 = pnand %p6668_p1, %p6665_p0 }
  0xa2   :  { %6673 = shalt.err (!%p6670_p2)
}
  0xa3   :  { %s6674_s19 = scalar_lea.vmem %s236_s3, 64  ;;  %p6679_p4 = scmp.lt.s32.totalorder %s236_s3, %s236_s3 }
  0xa4   :  { %p6675_p3 = scmp.ne.s32.totalorder %s236_s3, %s6674_s19  ;;  %p6680_p5 = scmp.lt.s32.totalorder %s6674_s19, %s6674_s19 }
  0xa6   :  { %p6681_p6 = por %p6680_p5, %p6679_p4 }
  0xa8   :  { %p6682_p7 = pnand %p6681_p6, %p6675_p3 }
  0xaa   :  { %6685 = shalt.err (!%p6682_p7)
}
  0xab   :  { %238 = dma.hbm_to_vmem [thread:$0]  %s8649_s21, 64, %s236_s3, [#allocation26]  }
  0xac   :  { %s8694_s0 = sld [smem:[#allocation67_spill]] }
  0xb2   :  { %s6686_s5 = scalar_lea.hbm %s8694_s0, 256 }
  0xb3   :  { %p6687_p8 = scmp.ne.s32.totalorder %s8694_s0, %s6686_s5  ;;  %p6690_p9 = scmp.lt.u32.totalorder %s6686_s5, %s8694_s0 }
  0xb5   :  { %p6692_p10 = pnand %p6690_p9, %p6687_p8 }
  0xb7   :  { %6695 = shalt.err (!%p6692_p10)
}
  0xb8   :  { %s6696_s26 = scalar_lea.vmem %s55_s7, 256  ;;  %p6701_p12 = scmp.lt.s32.totalorder %s55_s7, %s55_s7 }
  0xb9   :  { %p6697_p11 = scmp.ne.s32.totalorder %s55_s7, %s6696_s26  ;;  %p6702_p13 = scmp.lt.s32.totalorder %s6696_s26, %s6696_s26 }
  0xbb   :  { %p6703_p0 = por %p6702_p13, %p6701_p12 }
  0xbd   :  { %p6704_p1 = pnand %p6703_p0, %p6697_p11 }
  0xbf   :  { %6707 = shalt.err (!%p6704_p1)
}
  0xc0   :  { %60 = dma.hbm_to_vmem [thread:$0]  %s8694_s0, 256, %s55_s7, [#allocation3], %s6929_s8, %s6929_s8, %s6930_s10  }
  0xc1   :  { %s6939_s1 = smov [#allocation6]   ;;  %s6940_s9 = smov [#allocation9]  }
  0xc2   :  { %s79_s29 = sshll.u32 %s6939_s1, 4  ;;  %s100_s19 = sshll.u32 %s6940_s9, 4  ;;  %s80_s29 = int_to_ptr.vmem [resolvable:$true] %s79_s29  ;;  %s101_s19 = int_to_ptr.vmem [resolvable:$true] %s100_s19 }
  0xc3   :  { %s8695_s2 = sld [smem:[#allocation70_spill]] }
  0xc9   :  { %s6708_s17 = scalar_lea.hbm %s8695_s2, 16 }
  0xca   :  { %p6709_p2 = scmp.ne.s32.totalorder %s8695_s2, %s6708_s17  ;;  %p6712_p3 = scmp.lt.u32.totalorder %s6708_s17, %s8695_s2 }
  0xcc   :  { %p6714_p4 = pnand %p6712_p3, %p6709_p2 }
  0xce   :  { %6717 = shalt.err (!%p6714_p4)
}
  0xcf   :  { %s6718_s8 = scalar_lea.vmem %s80_s29, 16  ;;  %s6722_s10 = scalar_lea.vmem %s80_s29, 32 }
  0xd0   :  { %p6719_p5 = scmp.ne.s32.totalorder %s80_s29, %s6718_s8  ;;  %p6723_p6 = scmp.lt.s32.totalorder %s80_s29, %s80_s29 }
  0xd1   :  { %p6724_p7 = scmp.lt.s32.totalorder %s6722_s10, %s6718_s8 }
  0xd3   :  { %p6725_p8 = por %p6724_p7, %p6723_p6 }
  0xd5   :  { %p6726_p9 = pnand %p6725_p8, %p6719_p5 }
  0xd7   :  { %6729 = shalt.err (!%p6726_p9)
}
  0xd8   :  { %82 = dma.hbm_to_vmem [thread:$0]  %s8695_s2, 16, %s80_s29, [#allocation5]  }
  0xd9   :  { %s8696_s21 = sld [smem:[#allocation72_spill]] }
  0xdf   :  { %s6730_s3 = scalar_lea.hbm %s8696_s21, 32 }
  0xe0   :  { %p6731_p10 = scmp.ne.s32.totalorder %s8696_s21, %s6730_s3  ;;  %p6734_p11 = scmp.lt.u32.totalorder %s6730_s3, %s8696_s21 }
  0xe2   :  { %p6736_p12 = pnand %p6734_p11, %p6731_p10 }
  0xe4   :  { %6739 = shalt.err (!%p6736_p12)
}
  0xe5   :  { %s6740_s17 = scalar_lea.vmem %s101_s19, 32  ;;  %p6745_p0 = scmp.lt.s32.totalorder %s101_s19, %s101_s19 }
  0xe6   :  { %p6741_p13 = scmp.ne.s32.totalorder %s101_s19, %s6740_s17  ;;  %p6746_p1 = scmp.lt.s32.totalorder %s6740_s17, %s6740_s17 }
  0xe8   :  { %p6747_p2 = por %p6746_p1, %p6745_p0 }
  0xea   :  { %p6748_p3 = pnand %p6747_p2, %p6741_p13 }
  0xec   :  { %6751 = shalt.err (!%p6748_p3)
}
  0xed   :  { %106 = dma.hbm_to_vmem [thread:$0]  %s8696_s21, 32, %s101_s19, [#allocation8], %s6933_s4, %s6933_s4, %s6934_s27  }
  0xee   :  { %s6941_s5 = smov [#allocation12]   ;;  %s6942_s12 = smov [#allocation15]  }
  0xef   :  { %s124_s14 = sshll.u32 %s6941_s5, 4  ;;  %s148_s6 = sshll.u32 %s6942_s12, 4  ;;  %s125_s14 = int_to_ptr.vmem [resolvable:$true] %s124_s14  ;;  %s149_s6 = int_to_ptr.vmem [resolvable:$true] %s148_s6 }
  0xf0   :  { %s6752_s7 = scalar_lea.hbm %s8639_s11, 32 }
  0xf1   :  { %p6753_p4 = scmp.ne.s32.totalorder %s8639_s11, %s6752_s7  ;;  %p6756_p5 = scmp.lt.u32.totalorder %s6752_s7, %s8639_s11 }
  0xf3   :  { %p6758_p6 = pnand %p6756_p5, %p6753_p4 }
  0xf5   :  { %6761 = shalt.err (!%p6758_p6)
}
  0xf6   :  { %s6762_s19 = scalar_lea.vmem %s125_s14, 32  ;;  %p6767_p8 = scmp.lt.s32.totalorder %s125_s14, %s125_s14 }
  0xf7   :  { %p6763_p7 = scmp.ne.s32.totalorder %s125_s14, %s6762_s19  ;;  %p6768_p9 = scmp.lt.s32.totalorder %s6762_s19, %s6762_s19 }
  0xf9   :  { %p6769_p10 = por %p6768_p9, %p6767_p8 }
  0xfb   :  { %p6770_p11 = pnand %p6769_p10, %p6763_p7 }
  0xfd   :  { %6773 = shalt.err (!%p6770_p11)
}
  0xfe   :  { %130 = dma.hbm_to_vmem [thread:$0]  %s8639_s11, 32, %s125_s14, [#allocation11], %s6933_s4, %s6933_s4, %s6934_s27  }
  0xff   :  { %s6774_s30 = scalar_lea.hbm %s8641_s13, 32 }
 0x100   :  { %p6775_p12 = scmp.ne.s32.totalorder %s8641_s13, %s6774_s30  ;;  %p6778_p13 = scmp.lt.u32.totalorder %s6774_s30, %s8641_s13 }
 0x102   :  { %p6780_p0 = pnand %p6778_p13, %p6775_p12 }
 0x104   :  { %6783 = shalt.err (!%p6780_p0)
}
 0x105   :  { %s6784_s12 = scalar_lea.vmem %s149_s6, 32  ;;  %p6789_p2 = scmp.lt.s32.totalorder %s149_s6, %s149_s6 }
 0x106   :  { %p6785_p1 = scmp.ne.s32.totalorder %s149_s6, %s6784_s12  ;;  %p6790_p3 = scmp.lt.s32.totalorder %s6784_s12, %s6784_s12 }
 0x108   :  { %p6791_p4 = por %p6790_p3, %p6789_p2 }
 0x10a   :  { %p6792_p5 = pnand %p6791_p4, %p6785_p1 }
 0x10c   :  { %6795 = shalt.err (!%p6792_p5)
}
 0x10d   :  { %154 = dma.hbm_to_vmem [thread:$0]  %s8641_s13, 32, %s149_s6, [#allocation14], %s6933_s4, %s6933_s4, %s6934_s27  }
 0x10e   :  { %s6943_s8 = smov [#allocation18]   ;;  %s6944_s7 = smov [#allocation21]  }
 0x10f   :  { %s172_s10 = sshll.u32 %s6943_s8, 4  ;;  %s198_s0 = sshll.u32 %s6944_s7, 4  ;;  %s173_s10 = int_to_ptr.vmem [resolvable:$true] %s172_s10  ;;  %s199_s0 = int_to_ptr.vmem [resolvable:$true] %s198_s0 }
 0x110   :  { %s6796_s3 = scalar_lea.hbm %s8643_s15, 32 }
 0x111   :  { %p6797_p6 = scmp.ne.s32.totalorder %s8643_s15, %s6796_s3  ;;  %p6800_p7 = scmp.lt.u32.totalorder %s6796_s3, %s8643_s15 }
 0x113   :  { %p6802_p8 = pnand %p6800_p7, %p6797_p6 }
 0x115   :  { %6805 = shalt.err (!%p6802_p8)
}
 0x116   :  { %s6806_s13 = scalar_lea.vmem %s173_s10, 32  ;;  %p6811_p10 = scmp.lt.s32.totalorder %s173_s10, %s173_s10 }
 0x117   :  { %p6807_p9 = scmp.ne.s32.totalorder %s173_s10, %s6806_s13  ;;  %p6812_p11 = scmp.lt.s32.totalorder %s6806_s13, %s6806_s13 }
 0x119   :  { %p6813_p12 = por %p6812_p11, %p6811_p10 }
 0x11b   :  { %p6814_p13 = pnand %p6813_p12, %p6807_p9 }
 0x11d   :  { %6817 = shalt.err (!%p6814_p13)
}
 0x11e   :  { %178 = dma.hbm_to_vmem [thread:$0]  %s8643_s15, 32, %s173_s10, [#allocation17], %s6933_s4, %s6933_s4, %s6934_s27  }
 0x11f   :  { %s6818_s29 = scalar_lea.hbm %s8646_s18, 32 }
 0x120   :  { %p6819_p0 = scmp.ne.s32.totalorder %s8646_s18, %s6818_s29  ;;  %p6822_p1 = scmp.lt.u32.totalorder %s6818_s29, %s8646_s18 }
 0x122   :  { %p6824_p2 = pnand %p6822_p1, %p6819_p0 }
 0x124   :  { %6827 = shalt.err (!%p6824_p2)
}
 0x125   :  { %s6828_s14 = scalar_lea.vmem %s199_s0, 32  ;;  %p6833_p4 = scmp.lt.s32.totalorder %s199_s0, %s199_s0 }
 0x126   :  { %p6829_p3 = scmp.ne.s32.totalorder %s199_s0, %s6828_s14  ;;  %p6834_p5 = scmp.lt.s32.totalorder %s6828_s14, %s6828_s14 }
 0x128   :  { %p6835_p6 = por %p6834_p5, %p6833_p4 }
 0x12a   :  { %p6836_p7 = pnand %p6835_p6, %p6829_p3 }
 0x12c   :  { %6839 = shalt.err (!%p6836_p7)
}
 0x12d   :  { %204 = dma.hbm_to_vmem [thread:$0]  %s8646_s18, 32, %s199_s0, [#allocation20], %s6933_s4, %s6933_s4, %s6934_s27  }
 0x12e   :  { %s6945_s10 = smov [#allocation24]   ;;  %s6840_s3 = scalar_lea.hbm %s8648_s20, 2048 }
 0x12f   :  { %s222_s7 = sshll.u32 %s6945_s10, 4  ;;  %p6841_p8 = scmp.ne.s32.totalorder %s8648_s20, %s6840_s3  ;;  %s223_s7 = int_to_ptr.vmem [resolvable:$true] %s222_s7 }
 0x130   :  { %p6844_p9 = scmp.lt.u32.totalorder %s6840_s3, %s8648_s20 }
 0x132   :  { %p6846_p10 = pnand %p6844_p9, %p6841_p8 }
 0x134   :  { %6849 = shalt.err (!%p6846_p10)
}
 0x135   :  { %s6850_s13 = scalar_lea.vmem %s223_s7, 2048  ;;  %p6855_p12 = scmp.lt.s32.totalorder %s223_s7, %s223_s7 }
 0x136   :  { %p6851_p11 = scmp.ne.s32.totalorder %s223_s7, %s6850_s13  ;;  %p6856_p13 = scmp.lt.s32.totalorder %s6850_s13, %s6850_s13 }
 0x138   :  { %p6857_p0 = por %p6856_p13, %p6855_p12 }
 0x13a   :  { %p6858_p1 = pnand %p6857_p0, %p6851_p11 }
 0x13c   :  { %6861 = shalt.err (!%p6858_p1)
}
 0x13d   :  { %s6946_s18 = smov 512   ;;  %s6947_s27 = smov 32  }
 0x13e   :  { %228 = dma.hbm_to_vmem [thread:$0]  %s8648_s20, 2048, %s223_s7, [#allocation23], %s6946_s18, %s6946_s18, %s6947_s27  }
 0x13f   :  { %s6948_s24 = smov [#allocation27]   ;;  %s6949_s17 = smov [#allocation28]  }
 0x140   :  { %s247_s30 = sshll.u32 %s6948_s24, 4  ;;  %s259_s29 = sshll.u32 %s6949_s17, 4  ;;  %s248_s30 = int_to_ptr.vmem [resolvable:$true] %s247_s30  ;;  %s260_s29 = int_to_ptr.vmem [resolvable:$true] %s259_s29 }
 0x141   :  { %s6862_s12 = scalar_lea.hbm %s8651_s23, 64 }
 0x142   :  { %p6863_p2 = scmp.ne.s32.totalorder %s8651_s23, %s6862_s12  ;;  %p6866_p3 = scmp.lt.u32.totalorder %s6862_s12, %s8651_s23 }
 0x144   :  { %p6868_p4 = pnand %p6866_p3, %p6863_p2 }
 0x146   :  { %6871 = shalt.err (!%p6868_p4)
}
 0x147   :  { %s6872_s20 = scalar_lea.vmem %s248_s30, 64  ;;  %p6877_p6 = scmp.lt.s32.totalorder %s248_s30, %s248_s30 }
 0x148   :  { %p6873_p5 = scmp.ne.s32.totalorder %s248_s30, %s6872_s20  ;;  %p6878_p7 = scmp.lt.s32.totalorder %s6872_s20, %s6872_s20 }
 0x14a   :  { %p6879_p8 = por %p6878_p7, %p6877_p6 }
 0x14c   :  { %p6880_p9 = pnand %p6879_p8, %p6873_p5 }
 0x14e   :  { %6883 = shalt.err (!%p6880_p9)
}
 0x14f   :  { %250 = dma.hbm_to_vmem [thread:$0]  %s8651_s23, 64, %s248_s30, [#allocation26]  }
 0x150   :  { %s6884_s3 = scalar_lea.hbm %s8653_s25, 16 }
 0x151   :  { %p6885_p10 = scmp.ne.s32.totalorder %s8653_s25, %s6884_s3  ;;  %p6888_p11 = scmp.lt.u32.totalorder %s6884_s3, %s8653_s25 }
 0x153   :  { %p6890_p12 = pnand %p6888_p11, %p6885_p10 }
 0x155   :  { %6893 = shalt.err (!%p6890_p12)
}
 0x156   :  { %s6894_s13 = scalar_lea.vmem %s260_s29, 16  ;;  %s6898_s18 = scalar_lea.vmem %s260_s29, 32 }
 0x157   :  { %p6895_p13 = scmp.ne.s32.totalorder %s260_s29, %s6894_s13  ;;  %p6899_p0 = scmp.lt.s32.totalorder %s260_s29, %s260_s29 }
 0x158   :  { %p6900_p1 = scmp.lt.s32.totalorder %s6898_s18, %s6894_s13 }
 0x15a   :  { %p6901_p2 = por %p6900_p1, %p6899_p0 }
 0x15c   :  { %p6902_p3 = pnand %p6901_p2, %p6895_p13 }
 0x15e   :  { %6905 = shalt.err (!%p6902_p3)
}
 0x15f   :  { %262 = dma.hbm_to_vmem [thread:$0]  %s8653_s25, 16, %s260_s29, [#allocation29]  }
 0x160   :  { %6906 = dma.done.wait [#allocation3], 256  }
 0x161   :  { %6907 = vsyncadd [#allocation3], 4294967040 }
 0x162   :  { %6908 = dma.done.wait [#allocation5], 32  }
 0x163   :  { %6909 = vsyncadd [#allocation5], 4294967264 }
 0x164   :  { %6910 = dma.done.wait [#allocation8], 1056  }
 0x165   :  { %6911 = vsyncadd [#allocation8], 4294966240 }
 0x166   :  { %6912 = dma.done.wait [#allocation11], 1056  }
 0x167   :  { %6913 = vsyncadd [#allocation11], 4294966240 }
 0x168   :  { %6914 = dma.done.wait [#allocation14], 64  }
 0x169   :  { %6915 = vsyncadd [#allocation14], 4294967232 }
 0x16a   :  { %6916 = dma.done.wait [#allocation17], 1056  }
 0x16b   :  { %6917 = vsyncadd [#allocation17], 4294966240 }
 0x16c   :  { %6918 = dma.done.wait [#allocation20], 64  }
 0x16d   :  { %6919 = vsyncadd [#allocation20], 4294967232 }
 0x16e   :  { %6920 = dma.done.wait [#allocation23], 2080  }
 0x16f   :  { %6921 = vsyncadd [#allocation23], 4294965216 }
 0x170   :  { %6922 = dma.done.wait [#allocation26], 128  }
 0x171   :  { %6923 = vsyncadd [#allocation26], 4294967168 }
 0x172   :  { %6924 = dma.done.wait [#allocation29], 16  }
 0x173   :  { %6925 = vsyncadd [#allocation29], 4294967280  ;;  %v6950_v0 = vmov 0   ;;  %s8697_s6 = sld [smem:[#allocation64_spill]]  ;;  %s8698_s17 = sld [smem:[#allocation63_spill]]  ;;  %v356_v3 = vld [vmem:[#allocation2] sm:$0xff]  ;;  %v322_v11 = vlaneseq }
 0x174   :  { %6312 = vset.pattern.permute.xlu0 %v6950_v0  ;;  %6313 = vset.pattern.permute.xlu1 %v6950_v0  ;;  %v357_v4 = vld [vmem:[#allocation2 + $0x8] sm:$0xff]  ;;  %s8699_s15 = sld [smem:[#allocation66_spill]]  ;;  %vm358_vm0 = vcmask 130048   ;;  %v8666_v15 = vmov 0.0   ;;  %vm440_vm4 = vcmask 523264   ;;  %s8700_s0 = sld [smem:[#allocation68_spill]] }
 0x175   :  { %v5600_v7 = vpack.c.bf16 %v357_v4, %v356_v3  ;;  %v323_v12 = vand.u32 127, %v322_v11  ;;  %vm533_vm6 = vcmask 261120   ;;  %v579_v48 = vld [vmem:[#allocation7] sm:$0xff]  ;;  %v580_v49 = vld [vmem:[#allocation7 + $0x8] sm:$0xff]  ;;  %v581_v50 = vld [vmem:[#allocation7 + $0x10] sm:$0xff]  ;;  %vm6952_vm7 = vmmov 0  }
 0x176   :  { %v5620_v51 = vpack.c.bf16 %v580_v49, %v579_v48  ;;  %v582_v52 = vld [vmem:[#allocation7 + $0x18] sm:$0xff]  ;;  %s6954_s24 = smov 80   ;;  %s6955_s30 = smov 112   ;;  %vm754_vm8 = vcmask 64512   ;;  %vm3198_vm13 = vcmask 1040384   ;;  %vm4839_vm14 = vcmask 1041408  }
 0x177   :  { %5601 = vmatprep.subr.bf16.mxu0 %v5600_v7  ;;  %v5624_v53 = vpack.c.bf16 %v582_v52, %v581_v50  ;;  %v5086_v61 = vld [vmem:[#allocation4] ss:$0 sm:$0xff]  ;;  %v5087_v63 = vld [vmem:[#allocation6] ss:$0 sm:$0xff]  ;;  %s8701_s2 = sld [smem:[#allocation65_spill]]  ;;  %s6956_s5 = smov 64  }
 0x178   :  { %5603 = vmatpush3.bf16.msra.mxu0 %v5600_v7  ;;  %5621 = vmatprep.subr.bf16.mxu1 %v5620_v51  ;;  %s6957_s12 = smov 48   ;;  %vm4841_vm15 = vcmask 1042432   ;;  %s8753_s21 = sld [smem:[#allocation74_spill]] }
 0x179   :  { %v319_v1 = vld [vmem:[%s8697_s6] sm:$0xff]  ;;  %v320_v5 = vld [vmem:[%s8697_s6 + $0x8] sm:$0xff]  ;;  %5623 = vmatpush3.bf16.msra.mxu1 %v5620_v51  ;;  %s6953_s6 = smov 96   ;;  %s8758_s9 = sld [smem:[#allocation75_spill]] }
 0x17a   :  { %v317_v2 = vld [vmem:[%s8698_s17] sm:$0xff]  ;;  %337 = vperm.xlu0 %6312, %v319_v1   ;;  %v318_v6 = vld [vmem:[%s8698_s17 + $0x8] sm:$0xff]  ;;  %v350_v17 = vld [vmem:[%s8699_s15 + $0x10] sm:$0xff]  ;;  %5625 = vmatprep.subr.bf16.mxu1 %v5624_v53 }
 0x17b   :  { %325 = vperm.xlu1 %6313, %v317_v2   ;;  %v348_v8 = vld [vmem:[%s8699_s15] sm:$0xff]  ;;  %v349_v9 = vld [vmem:[%s8699_s15 + $0x8] sm:$0xff]  ;;  %v351_v18 = vld [vmem:[%s8699_s15 + $0x18] sm:$0xff] }
 0x17c   :  { %v5604_v10 = vpack.c.bf16 %v349_v9, %v348_v8  ;;  %v5608_v20 = vpack.c.bf16 %v351_v18, %v350_v17  ;;  %v352_v23 = vld [vmem:[%s8699_s15 + $0x20] sm:$0xff]  ;;  %v353_v24 = vld [vmem:[%s8699_s15 + $0x28] sm:$0xff]  ;;  %v354_v26 = vld [vmem:[%s8699_s15 + $0x30] sm:$0xff] }
 0x17d   :  { %v5612_v25 = vpack.c.bf16 %v353_v24, %v352_v23  ;;  %v355_v27 = vld [vmem:[%s8699_s15 + $0x38] sm:$0xff]  ;;  %v5085_v31 = vld [vmem:[%s8700_s0] ss:$0 sm:$0xff]  ;;  %5627 = vmatpush3.bf16.msra.mxu1 %v5624_v53 }
 0x17e   :  { %340 = vperm.xlu0 %6312, %v320_v5   ;;  %5605 = vmatprep.subr.bf16.mxu0 %v5604_v10  ;;  %v5616_v28 = vpack.c.bf16 %v355_v27, %v354_v26 }
 0x17f   :  { %328 = vperm.xlu1 %6313, %v318_v6   ;;  %5357 = vmatprep.subr.mxu1 %v8666_v15  ;;  %v5089_v6 = vld [vmem:[#allocation9] ss:$0 sm:$0xff] }
 0x1f9   :  { %v338_v13 = vpop.permute.xlu0 %337 }
 0x1fa   :  { %vm342_vm1 = vcmp.eq.s32.totalorder %v323_v12, %v338_v13  ;;  %v326_v14 = vpop.permute.xlu1 %325  ;;  %v321_v13 = vld [vmem:[%s8701_s2] sm:$0x3] }
 0x1fb   :  { %v5079_v16 = vsel %vm342_vm1, 1.0, %v8666_v15  ;;  %vm330_vm2 = vcmp.eq.s32.totalorder %v323_v12, %v326_v14  ;;  %v7437_v14 = vshrl.u32 %v322_v11, 7  ;;  %vm4845_vm1 = vcmask 1044480  }
 0x1fc   :  { %5324 = vmatprep.mubr.msk.f32.mxu0 %vm358_vm0, %v5079_v16  ;;  %v5077_v21 = vsel %vm330_vm2, 1.0, %v8666_v15  ;;  %v5088_v16 = vadd.f32 -1.0, %v321_v13  ;;  %vm4847_vm2 = vcmask 1045504  }
 0x1fd   :  { %v341_v19 = vpop.permute.xlu0 %340  ;;  %v7440_v18 = vsub.s32 0, %v7437_v14 }
 0x1fe   :  { %vm343_vm3 = vcmp.eq.s32.totalorder %v323_v12, %v341_v19  ;;  %v329_v29 = vpop.permute.xlu1 %328  ;;  %v578_v17 = vmul.f32 1e+09, %v5088_v16 }
 0x1ff   :  { %v5080_v22 = vsel %vm343_vm3, 1.0, %v8666_v15  ;;  %vm331_vm5 = vcmp.eq.s32.totalorder %v323_v12, %v329_v29  ;;  %vm4849_vm3 = vcmask 1046528  }
 0x200   :  { %5325 = vmatmul.mubr.msk.f32.vlgmr.msra.gmra.mrb[0].mxu0 %vm358_vm0, %v5080_v22  ;;  %v5078_v30 = vsel %vm331_vm5, 1.0, %v8666_v15  ;;  %v7443_v19 = vrot.slane %v578_v17, %v7440_v18 }
 0x201   :  { %5607 = vmatpush3.bf16.msra.mxu0 %v5604_v10  ;;  %5343 = vmatprep.mubr.msk.f32.mxu0 %vm440_vm4, %v5077_v21 }
 0x202   :  { %5609 = vmatprep.subr.bf16.mxu0 %v5608_v20 }
 0x205   :  { %5611 = vmatpush3.bf16.msra.mxu0 %v5608_v20 }
 0x206   :  { %5613 = vmatprep.subr.bf16.mxu0 %v5612_v25 }
 0x209   :  { %5615 = vmatpush3.bf16.msra.mxu0 %v5612_v25 }
 0x20a   :  { %5617 = vmatprep.subr.bf16.mxu0 %v5616_v28 }
 0x20d   :  { %5619 = vmatpush3.bf16.msra.mxu0 %v5616_v28 }
 0x20e   :  { %5372 = vmatprep.subr.mxu0 %v8666_v15 }
 0x210   :  { %5344 = vmatmul.mubr.msk.f32.vlgmr.msra.gmra.mrb[0].mxu0 %vm440_vm4, %v5078_v30 }
 0x211   :  { %5374 = vmatprep.mubr.msk.f32.mxu0 %vm6952_vm7, %v8666_v15 }
 0x2e3   :  { %v5345_v32 = vpop.f32.mrb[0].mxu0 }
 0x2e4   :  { %v530_v33 = vadd.f32 %v5345_v32, %v5085_v31  ;;  %v513_v34 = vpop.f32.mrb[1].mxu0 }
 0x2e5   :  { %v529_v35 = vadd.f32 %v5085_v31, %v513_v34 }
 0x2e6   :  { %v537_v36 = vsel %vm533_vm6, %v530_v33, 0.0 }
 0x2e7   :  { %538 = vadd.xlane.f32.xlu1 %v537_v36  ;;  %v534_v37 = vsel %vm533_vm6, %v529_v35, 0.0 }
 0x2e8   :  { %535 = vadd.xlane.f32.xlu0 %v534_v37 }
 0x374   :  { %v539_v38 = vpop.xlane.xlu1 %538 }
 0x375   :  { %v542_v39 = vmul.f32 0.03125, %v539_v38  ;;  %v536_v40 = vpop.xlane.xlu0 %535 }
 0x376   :  { %v541_v41 = vmul.f32 0.03125, %v536_v40  ;;  %v7472_v40 = vsub.s32 1, %v7437_v14 }
 0x377   :  { %v544_v42 = vsub.f32 %v530_v33, %v542_v39 }
 0x378   :  { %v543_v43 = vsub.f32 %v529_v35, %v541_v41 }
 0x379   :  { %v546_v46 = vmul.f32 %v544_v42, %v544_v42 }
 0x37a   :  { %v545_v44 = vmul.f32 %v543_v43, %v543_v43 }
 0x37b   :  { %v550_v47 = vsel %vm533_vm6, %v546_v46, 0.0 }
 0x37c   :  { %v547_v45 = vsel %vm533_vm6, %v545_v44, 0.0 }
 0x37d   :  { %548 = vadd.xlane.f32.xlu0 %v547_v45  ;;  %v7476_v45 = vrot.slane %v578_v17, %v7472_v40 }
 0x381   :  { %551 = vadd.xlane.f32.xlu0 %v550_v47 }
 0x40a   :  { %v549_v54 = vpop.xlane.xlu0 %548 }
 0x40b   :  { %v553_v55 = vmul.f32 0.03125, %v549_v54 }
 0x40d   :  { %v555_v56 = vadd.f32 1e-05, %v553_v55 }
 0x40e   :  { %v552_v57 = vpop.xlane.xlu0 %551 }
 0x40f   :  { %6314 = vrsqrt.f32 %v555_v56  ;;  %v554_v58 = vmul.f32 0.03125, %v552_v57 }
 0x411   :  { %v556_v59 = vadd.f32 1e-05, %v554_v58 }
 0x413   :  { %6316 = vrsqrt.f32 %v556_v59 }
 0x419   :  { %v6315_v60 = vpop.eup %6314 }
 0x41a   :  { %v559_v62 = vmul.f32 %v6315_v60, %v543_v43 }
 0x41c   :  { %v567_v0 = vmul.f32 %v5086_v61, %v559_v62 }
 0x41d   :  { %v6317_v1 = vpop.eup %6316 }
 0x41e   :  { %v560_v2 = vmul.f32 %v6317_v1, %v544_v42  ;;  %v7401_v3 = vadd.f32 %v5087_v63, %v567_v0 }
 0x420   :  { %v568_v4 = vmul.f32 %v5086_v61, %v560_v2  ;;  %5354 = vmatprep.mubr.msk.f32.mxu1 %vm533_vm6, %v7401_v3 }
 0x422   :  { %v7405_v5 = vadd.f32 %v5087_v63, %v568_v4 }
 0x424   :  { %5355 = vmatmul.mubr.msk.f32.vlgmr.msra.gmra.mrb[0].mxu1 %vm533_vm6, %v7405_v5 }
 0x425   :  { %5359 = vmatprep.mubr.msk.f32.mxu1 %vm6952_vm7, %v8666_v15 }
 0x4f7   :  { %v5356_v7 = vpop.f32.mrb[0].mxu1 }
 0x4f8   :  { %v662_v8 = vpop.f32.mrb[1].mxu1  ;;  %v7421_v10 = vadd.f32 %v5356_v7, %v5089_v6 }
 0x4f9   :  { %v7413_v9 = vadd.f32 %v5089_v6, %v662_v8 }
 0x4fb   :  { %672 = vrot.lane.b32.xlu1 %v7413_v9, %s6953_s6 }
 0x4ff   :  { %844 = vrot.lane.b32.xlu1 %v7413_v9, %s6954_s24 }
 0x503   :  { %842 = vrot.lane.b32.xlu1 %v7413_v9, %s6955_s30 }
 0x507   :  { %1015 = vrot.lane.b32.xlu1 %v7421_v10, %s6953_s6 }
 0x50b   :  { %1186 = vrot.lane.b32.xlu1 %v7421_v10, %s6954_s24 }
 0x56d   :  { %v673_v12 = vpop.permute.xlu1 %672 }
 0x56e   :  { %5358 = vmatpush3.xpose.msk.msra.mxu1 %vm358_vm0, %v673_v12 }
 0x56f   :  { %5362 = vmatprep.subr.mxu1 %v8666_v15 }
 0x571   :  { %5360 = vmatmul.mubr.msk.f32.vlgmr.msra.gmra.mrb[2].mxu1 %vm358_vm0, %v7413_v9  ;;  %v845_v30 = vpop.permute.xlu1 %844 }
 0x572   :  { %5364 = vmatprep.mubr.msk.f32.mxu1 %vm6952_vm7, %v8666_v15 }
 0x575   :  { %v843_v32 = vpop.permute.xlu1 %842 }
 0x579   :  { %v1016_v35 = vpop.permute.xlu1 %1015 }
 0x57d   :  { %v1187_v36 = vpop.permute.xlu1 %1186 }
 0x644   :  { %v744_v20 = vpop.f32.mrb[2].mxu1 }
 0x645   :  { %v748_v21 = vmul.f32 0.25, %v744_v20  ;;  %v5361_v22 = vpop.f32.mrb[3].mxu1 }
 0x647   :  { %v753_v23 = vadd.f32 %v7443_v19, %v748_v21 }
 0x649   :  { %v755_v24 = vsel %vm754_vm8, %v753_v23, -inf }
 0x64a   :  { %756 = vmax.xlane.f32.xlu0 %v755_v24 }
 0x6d7   :  { %v757_v25 = vpop.xlane.xlu0 %756 }
 0x6d8   :  { %v758_v11 = vsub.f32 %v753_v23, %v757_v25 }
 0x6da   :  { %v759_v26 = vmul.f32 1.442695, %v758_v11 }
 0x6dc   :  { %6318 = vpow2.f32 %v759_v26  ;;  %v1356_v26 = vld [vmem:[#allocation10] sm:$0xff] }
 0x6e6   :  { %v6319_v27 = vpop.eup %6318 }
 0x6e7   :  { %v761_v28 = vsel %vm754_vm8, %v6319_v27, 0.0 }
 0x6e8   :  { %762 = vadd.xlane.f32.xlu0 %v761_v28  ;;  %v1358_v28 = vld [vmem:[#allocation10 + $0x10] sm:$0xff] }
 0x6fe   :  { %766 = vrot.lane.b32.xlu0 %v7413_v9, %s6956_s5 }
 0x702   :  { %1184 = vrot.lane.b32.xlu0 %v7421_v10, %s6955_s30 }
 0x775   :  { %v763_v29 = vpop.xlane.xlu0 %762 }
 0x776   :  { %6320 = vrcp.f32 %v763_v29 }
 0x779   :  { %v767_v31 = vpop.permute.xlu0 %766 }
 0x77a   :  { %5363 = vmatpush3.msra.mxu1 %v767_v31 }
 0x77b   :  { %5367 = vmatprep.subr.mxu1 %v8666_v15 }
 0x77d   :  { %v1185_v37 = vpop.permute.xlu0 %1184 }
 0x780   :  { %v6321_v33 = vpop.eup %6320 }
 0x781   :  { %v765_v34 = vmul.f32 %v6321_v33, %v6319_v27  ;;  %v1357_v27 = vld [vmem:[#allocation10 + $0x8] sm:$0xff] }
 0x782   :  { %v5628_v29 = vpack.c.bf16 %v1357_v27, %v1356_v26  ;;  %v1641_v26 = vld [vmem:[%s8644_s16 + $0x8] sm:$0xff] }
 0x783   :  { %5365 = vmatmul.mubr.msk.f32.vlgmr.msra.gmra.mrb[4].mxu1 %vm754_vm8, %v765_v34 }
 0x784   :  { %5368 = vmatpush3.xpose.msk.msra.mxu1 %vm358_vm0, %v845_v30  ;;  %5369 = vmatprep.mubr.msk.f32.mxu1 %vm6952_vm7, %v8666_v15  ;;  %v1359_v30 = vld [vmem:[#allocation10 + $0x18] sm:$0xff] }
 0x785   :  { %5377 = vmatprep.subr.mxu1 %v8666_v15  ;;  %v5632_v31 = vpack.c.bf16 %v1359_v30, %v1358_v28  ;;  %v1642_v28 = vld [vmem:[%s8644_s16 + $0x10] sm:$0xff] }
 0x787   :  { %5370 = vmatmul.mubr.msk.f32.vlgmr.msra.gmra.mrb[6].mxu1 %vm358_vm0, %v843_v32 }
 0x788   :  { %5378 = vmatpush3.xpose.msk.msra.mxu1 %vm358_vm0, %v1016_v35  ;;  %5379 = vmatprep.mubr.msk.f32.mxu1 %vm6952_vm7, %v8666_v15 }
 0x789   :  { %5387 = vmatprep.subr.mxu1 %v8666_v15 }
 0x78b   :  { %5380 = vmatmul.mubr.msk.f32.vlgmr.msra.gmra.mrb[8].mxu1 %vm358_vm0, %v7421_v10 }
 0x78c   :  { %5388 = vmatpush3.xpose.msk.msra.mxu1 %vm358_vm0, %v1187_v36  ;;  %5389 = vmatprep.mubr.msk.f32.mxu1 %vm6952_vm7, %v8666_v15 }
 0x78d   :  { %5629 = vmatprep.subr.bf16.mxu1 %v5628_v29 }
 0x78f   :  { %5390 = vmatmul.mubr.msk.f32.vlgmr.msra.gmra.mrb[10].mxu1 %vm358_vm0, %v1185_v37 }
 0x790   :  { %5631 = vmatpush3.bf16.msra.mxu1 %v5628_v29  ;;  %v1643_v29 = vld [vmem:[%s8644_s16 + $0x18] sm:$0xff] }
 0x791   :  { %5633 = vmatprep.subr.bf16.mxu1 %v5632_v31  ;;  %v5648_v30 = vpack.c.bf16 %v1643_v29, %v1642_v28 }
 0x794   :  { %5635 = vmatpush3.bf16.msra.mxu1 %v5632_v31  ;;  %v1644_v31 = vld [vmem:[%s8644_s16 + $0x20] sm:$0xff] }
 0x856   :  { %v7469_v38 = vpop.f32.mrb[4].mxu1 }
 0x857   :  { %v5366_v39 = vpop.f32.mrb[5].mxu1 }
 0x85a   :  { %v916_v41 = vpop.f32.mrb[6].mxu1 }
 0x85b   :  { %v920_v42 = vmul.f32 0.25, %v916_v41  ;;  %v5371_v43 = vpop.f32.mrb[7].mxu1 }
 0x85d   :  { %v921_v44 = vadd.f32 %v920_v42, %v7443_v19 }
 0x85e   :  { %v1087_v46 = vpop.f32.mrb[8].mxu1 }
 0x85f   :  { %v1091_v47 = vmul.f32 0.25, %v1087_v46  ;;  %v5381_v48 = vpop.f32.mrb[9].mxu1  ;;  %v922_v49 = vsel %vm754_vm8, %v921_v44, -inf }
 0x860   :  { %923 = vmax.xlane.f32.xlu1 %v922_v49 }
 0x861   :  { %v1096_v50 = vadd.f32 %v7476_v45, %v1091_v47 }
 0x862   :  { %v1258_v51 = vpop.f32.mrb[10].mxu1 }
 0x863   :  { %v1262_v52 = vmul.f32 0.25, %v1258_v51  ;;  %v5391_v53 = vpop.f32.mrb[11].mxu1  ;;  %v1097_v54 = vsel %vm754_vm8, %v1096_v50, -inf }
 0x864   :  { %1098 = vmax.xlane.f32.xlu0 %v1097_v54 }
 0x865   :  { %v1263_v55 = vadd.f32 %v1262_v52, %v7476_v45 }
 0x867   :  { %v1264_v56 = vsel %vm754_vm8, %v1263_v55, -inf }
 0x868   :  { %1265 = vmax.xlane.f32.xlu0 %v1264_v56 }
 0x8ed   :  { %v924_v57 = vpop.xlane.xlu1 %923 }
 0x8ee   :  { %v925_v58 = vsub.f32 %v921_v44, %v924_v57  ;;  %v5104_v44 = vld [vmem:[#allocation12] ss:$0 sm:$0xff] }
 0x8f0   :  { %v926_v59 = vmul.f32 1.442695, %v925_v58 }
 0x8f1   :  { %v1099_v60 = vpop.xlane.xlu0 %1098 }
 0x8f2   :  { %6322 = vpow2.f32 %v926_v59  ;;  %v1100_v61 = vsub.f32 %v1096_v50, %v1099_v60 }
 0x8f4   :  { %v1101_v62 = vmul.f32 1.442695, %v1100_v61 }
 0x8f5   :  { %v1266_v4 = vpop.xlane.xlu0 %1265 }
 0x8f6   :  { %6324 = vpow2.f32 %v1101_v62  ;;  %v1267_v6 = vsub.f32 %v1263_v55, %v1266_v4  ;;  %v1495_v62 = vld [vmem:[#allocation16 + $0x8] sm:$0xff] }
 0x8f8   :  { %v1268_v7 = vmul.f32 1.442695, %v1267_v6 }
 0x8fa   :  { %6326 = vpow2.f32 %v1268_v7 }
 0x8fc   :  { %v6323_v63 = vpop.eup %6322 }
 0x8fd   :  { %v928_v0 = vsel %vm754_vm8, %v6323_v63, 0.0 }
 0x8fe   :  { %929 = vadd.xlane.f32.xlu1 %v928_v0  ;;  %v1496_v0 = vld [vmem:[#allocation16 + $0x10] sm:$0xff] }
 0x900   :  { %v6325_v1 = vpop.eup %6324 }
 0x901   :  { %v1103_v2 = vsel %vm754_vm8, %v6325_v1, 0.0 }
 0x902   :  { %1104 = vadd.xlane.f32.xlu0 %v1103_v2 }
 0x904   :  { %v6327_v8 = vpop.eup %6326 }
 0x905   :  { %v1270_v12 = vsel %vm754_vm8, %v6327_v8, 0.0 }
 0x90f   :  { %1108 = vrot.lane.b32.xlu1 %v7421_v10, %s6956_s5 }
 0x918   :  { %933 = vrot.lane.b32.xlu0 %v7413_v9, %s6957_s12 }
 0x933   :  { %1271 = vadd.xlane.f32.xlu1 %v1270_v12 }
 0x944   :  { %1275 = vrot.lane.b32.xlu1 %v7421_v10, %s6957_s12 }
 0x98b   :  { %v930_v13 = vpop.xlane.xlu1 %929 }
 0x98c   :  { %6328 = vrcp.f32 %v930_v13 }
 0x98f   :  { %v1105_v16 = vpop.xlane.xlu0 %1104  ;;  %v1109_v21 = vpop.permute.xlu1 %1108 }
 0x990   :  { %6330 = vrcp.f32 %v1105_v16 }
 0x993   :  { %v934_v17 = vpop.permute.xlu0 %933 }
 0x994   :  { %5373 = vmatpush3.msra.mxu0 %v934_v17  ;;  %v5107_v17 = vld [vmem:[#allocation13] ss:$0 sm:$0xff] }
 0x995   :  { %5382 = vmatprep.subr.mxu0 %v8666_v15 }
 0x996   :  { %v6329_v9 = vpop.eup %6328 }
 0x997   :  { %v932_v20 = vmul.f32 %v6329_v9, %v6323_v63 }
 0x999   :  { %5375 = vmatmul.mubr.msk.f32.vlgmr.msra.gmra.mrb[2].mxu0 %vm754_vm8, %v932_v20  ;;  %v5108_v20 = vld [vmem:[#allocation15] ss:$0 sm:$0xff] }
 0x99a   :  { %v6331_v22 = vpop.eup %6330  ;;  %5383 = vmatpush3.msra.mxu0 %v1109_v21  ;;  %5384 = vmatprep.mubr.msk.f32.mxu0 %vm6952_vm7, %v8666_v15 }
 0x99b   :  { %v1107_v23 = vmul.f32 %v6331_v22, %v6325_v1  ;;  %5392 = vmatprep.subr.mxu0 %v8666_v15  ;;  %v1497_v1 = vld [vmem:[#allocation16 + $0x18] sm:$0xff] }
 0x99c   :  { %v5640_v2 = vpack.c.bf16 %v1497_v1, %v1496_v0 }
 0x99d   :  { %5385 = vmatmul.mubr.msk.f32.vlgmr.msra.gmra.mrb[4].mxu0 %vm754_vm8, %v1107_v23 }
 0x99e   :  { %5394 = vmatprep.mubr.msk.f32.mxu0 %vm6952_vm7, %v8666_v15 }
 0x9c0   :  { %v1272_v10 = vpop.xlane.xlu1 %1271 }
 0x9c1   :  { %6332 = vrcp.f32 %v1272_v10 }
 0x9c4   :  { %v1276_v24 = vpop.permute.xlu1 %1275 }
 0x9c5   :  { %5393 = vmatpush3.msra.mxu0 %v1276_v24 }
 0x9cb   :  { %v6333_v25 = vpop.eup %6332 }
 0x9cc   :  { %v1274_v11 = vmul.f32 %v6333_v25, %v6327_v8 }
 0x9ce   :  { %5395 = vmatmul.mubr.msk.f32.vlgmr.msra.gmra.mrb[6].mxu0 %vm754_vm8, %v1274_v11  ;;  %v1640_v11 = vld [vmem:[%s8644_s16] sm:$0xff] }
 0x9cf   :  { %v5644_v27 = vpack.c.bf16 %v1641_v26, %v1640_v11  ;;  %v6958_v11 = vmov 1.0  }
 0x9d1   :  { %5645 = vmatprep.subr.bf16.mxu1 %v5644_v27 }
 0xa6c   :  { %v1005_v32 = vpop.f32.mrb[2].mxu0 }
 0xa6d   :  { %1010 = vrot.lane.b32.xlu0 %v1005_v32, %s6933_s4  ;;  %v5376_v33 = vpop.f32.mrb[3].mxu0  ;;  %v1645_v32 = vld [vmem:[%s8644_s16 + $0x28] sm:$0xff] }
 0xa6e   :  { %v5652_v33 = vpack.c.bf16 %v1645_v32, %v1644_v31 }
 0xa70   :  { %v1180_v34 = vpop.f32.mrb[4].mxu0 }
 0xa71   :  { %v5386_v35 = vpop.f32.mrb[5].mxu0 }
 0xa72   :  { %v1647_v35 = vld [vmem:[%s8644_s16 + $0x38] sm:$0xff] }
 0xaa1   :  { %v1347_v36 = vpop.f32.mrb[6].mxu0 }
 0xaa2   :  { %1352 = vrot.lane.b32.xlu1 %v1347_v36, %s6933_s4  ;;  %v5396_v37 = vpop.f32.mrb[7].mxu0 }
 0xaa3   :  { %v5109_v37 = vld [vmem:[#allocation18] ss:$0 sm:$0xff] }
 0xadf   :  { %v1011_v39 = vpop.permute.xlu0 %1010 }
 0xae0   :  { %v1013_v41 = vsel %vm358_vm0, %v7469_v38, %v1011_v39 }
 0xae1   :  { %5405 = vmatprep.mubr.msk.f32.mxu1 %vm533_vm6, %v1013_v41 }
 0xb14   :  { %v1353_v42 = vpop.permute.xlu1 %1352 }
 0xb15   :  { %v1355_v43 = vsel %vm358_vm0, %v1180_v34, %v1353_v42  ;;  %v1646_v34 = vld [vmem:[%s8644_s16 + $0x30] sm:$0xff] }
 0xb16   :  { %5406 = vmatmul.mubr.msk.f32.vlgmr.msra.gmra.mrb[12].mxu1 %vm533_vm6, %v1355_v43  ;;  %v5656_v36 = vpack.c.bf16 %v1647_v35, %v1646_v34 }
 0xb17   :  { %5647 = vmatpush3.bf16.msra.mxu1 %v5644_v27 }
 0xb18   :  { %5649 = vmatprep.subr.bf16.mxu1 %v5648_v30 }
 0xb1b   :  { %5651 = vmatpush3.bf16.msra.mxu1 %v5648_v30 }
 0xb1c   :  { %5653 = vmatprep.subr.bf16.mxu1 %v5652_v33 }
 0xb1f   :  { %5655 = vmatpush3.bf16.msra.mxu1 %v5652_v33 }
 0xb20   :  { %5657 = vmatprep.subr.bf16.mxu1 %v5656_v36 }
 0xb23   :  { %5659 = vmatpush3.bf16.msra.mxu1 %v5656_v36 }
 0xb24   :  { %5459 = vmatprep.subr.mxu1 %v8666_v15 }
 0xbe9   :  { %v5407_v46 = vpop.f32.mrb[12].mxu1 }
 0xbea   :  { %v1445_v47 = vadd.f32 %v5407_v46, %v5104_v44  ;;  %v1439_v48 = vpop.f32.mrb[13].mxu1 }
 0xbeb   :  { %v1440_v49 = vadd.f32 %v5104_v44, %v1439_v48 }
 0xbec   :  { %v1449_v50 = vadd.f32 %v1445_v47, %v7405_v5 }
 0xbed   :  { %v1448_v51 = vadd.f32 %v1440_v49, %v7401_v3  ;;  %v1494_v3 = vld [vmem:[#allocation16] sm:$0xff] }
 0xbee   :  { %v1455_v52 = vsel %vm533_vm6, %v1449_v50, 0.0  ;;  %v5636_v63 = vpack.c.bf16 %v1495_v62, %v1494_v3 }
 0xbef   :  { %1456 = vadd.xlane.f32.xlu1 %v1455_v52  ;;  %v1452_v38 = vsel %vm533_vm6, %v1448_v51, 0.0 }
 0xbf0   :  { %1453 = vadd.xlane.f32.xlu0 %v1452_v38  ;;  %5637 = vmatprep.subr.bf16.mxu0 %v5636_v63 }
 0xbf1   :  { %5639 = vmatpush3.bf16.msra.mxu0 %v5636_v63 }
 0xbf2   :  { %5641 = vmatprep.subr.bf16.mxu0 %v5640_v2 }
 0xbf5   :  { %5643 = vmatpush3.bf16.msra.mxu0 %v5640_v2 }
 0xc7c   :  { %v1457_v53 = vpop.xlane.xlu1 %1456 }
 0xc7d   :  { %v1459_v54 = vmul.f32 0.03125, %v1457_v53  ;;  %v1454_v55 = vpop.xlane.xlu0 %1453 }
 0xc7e   :  { %v1458_v56 = vmul.f32 0.03125, %v1454_v55 }
 0xc7f   :  { %v1461_v57 = vsub.f32 %v1449_v50, %v1459_v54 }
 0xc80   :  { %v1460_v58 = vsub.f32 %v1448_v51, %v1458_v56 }
 0xc81   :  { %v1463_v61 = vmul.f32 %v1461_v57, %v1461_v57 }
 0xc82   :  { %v1462_v59 = vmul.f32 %v1460_v58, %v1460_v58 }
 0xc83   :  { %v1467_v5 = vsel %vm533_vm6, %v1463_v61, 0.0 }
 0xc84   :  { %v1464_v60 = vsel %vm533_vm6, %v1462_v59, 0.0 }
 0xc85   :  { %1465 = vadd.xlane.f32.xlu0 %v1464_v60 }
 0xc89   :  { %1468 = vadd.xlane.f32.xlu0 %v1467_v5 }
 0xd12   :  { %v1466_v4 = vpop.xlane.xlu0 %1465 }
 0xd13   :  { %v1470_v6 = vmul.f32 0.03125, %v1466_v4 }
 0xd15   :  { %v1472_v7 = vadd.f32 1e-05, %v1470_v6 }
 0xd16   :  { %v1469_v8 = vpop.xlane.xlu0 %1468 }
 0xd17   :  { %6334 = vrsqrt.f32 %v1472_v7  ;;  %v1471_v12 = vmul.f32 0.03125, %v1469_v8 }
 0xd19   :  { %v1473_v13 = vadd.f32 1e-05, %v1471_v12 }
 0xd1b   :  { %6336 = vrsqrt.f32 %v1473_v13 }
 0xd21   :  { %v6335_v16 = vpop.eup %6334 }
 0xd22   :  { %v1476_v9 = vmul.f32 %v6335_v16, %v1460_v58 }
 0xd24   :  { %v1484_v21 = vmul.f32 %v5107_v17, %v1476_v9 }
 0xd25   :  { %v6337_v22 = vpop.eup %6336 }
 0xd26   :  { %v1477_v23 = vmul.f32 %v6337_v22, %v1461_v57  ;;  %v7514_v10 = vadd.f32 %v5108_v20, %v1484_v21 }
 0xd28   :  { %v1485_v24 = vmul.f32 %v5107_v17, %v1477_v23  ;;  %5416 = vmatprep.mubr.msk.f32.mxu0 %vm533_vm6, %v7514_v10 }
 0xd2a   :  { %v7518_v25 = vadd.f32 %v5108_v20, %v1485_v24 }
 0xd2c   :  { %5417 = vmatmul.mubr.msk.f32.vlgmr.msra.gmra.mrb[8].mxu0 %vm533_vm6, %v7518_v25 }
 0xdff   :  { %v5418_v39 = vpop.f32.mrb[8].mxu0 }
 0xe00   :  { %v1583_v41 = vadd.f32 %v5418_v39, %v5109_v37  ;;  %v1577_v42 = vpop.f32.mrb[9].mxu0 }
 0xe01   :  { %v1578_v43 = vadd.f32 %v5109_v37, %v1577_v42  ;;  %v5112_v37 = vld [vmem:[#allocation19] ss:$0 sm:$0xff] }
 0xe02   :  { %v1589_v44 = vmul.f32 0.70710677, %v1583_v41  ;;  %v1587_v34 = vmul.f32 0.5, %v1583_v41 }
 0xe03   :  { %v1588_v46 = vmul.f32 0.70710677, %v1578_v43  ;;  %v1586_v32 = vmul.f32 0.5, %v1578_v43 }
 0xe04   :  { %v1595_v47 = vand.u32 2147483647, %v1589_v44  ;;  %vm1591_vm9 = vcmp.lt.f32.partialorder %v1589_v44, 0.0 }
 0xe05   :  { %v1594_v48 = vand.u32 2147483647, %v1588_v46  ;;  %vm1590_vm10 = vcmp.lt.f32.partialorder %v1588_v46, 0.0  ;;  %v1593_v26 = vsel %vm1591_vm9, -1.0, %v6958_v11 }
 0xe06   :  { %v1597_v49 = vmul.f32 0.3275911, %v1595_v47  ;;  %v1623_v38 = vsub.f32 0.0, %v1595_v47  ;;  %v1592_v29 = vsel %vm1590_vm10, -1.0, %v6958_v11 }
 0xe07   :  { %v1596_v50 = vmul.f32 0.3275911, %v1594_v48  ;;  %v1622_v53 = vsub.f32 0.0, %v1594_v48 }
 0xe08   :  { %v1599_v51 = vadd.f32 1.0, %v1597_v49  ;;  %v1625_v55 = vmul.f32 %v1623_v38, %v1595_v47 }
 0xe09   :  { %v1598_v52 = vadd.f32 1.0, %v1596_v50  ;;  %v1624_v58 = vmul.f32 %v1622_v53, %v1594_v48 }
 0xe0a   :  { %6338 = vrcp.f32 %v1599_v51  ;;  %v1628_v61 = vmul.f32 1.442695, %v1625_v55 }
 0xe0b   :  { %6340 = vrcp.f32 %v1598_v52  ;;  %v1626_v62 = vmul.f32 1.442695, %v1624_v58 }
 0xe0c   :  { %6342 = vpow2.f32 %v1628_v61 }
 0xe0d   :  { %6344 = vpow2.f32 %v1626_v62 }
 0xe14   :  { %v6339_v54 = vpop.eup %6338 }
 0xe15   :  { %v6341_v56 = vpop.eup %6340  ;;  %v1605_v57 = vmul.f32 1.0614054, %v6339_v54 }
 0xe16   :  { %v1604_v59 = vmul.f32 1.0614054, %v6341_v56  ;;  %v6343_v9 = vpop.eup %6342 }
 0xe17   :  { %v1607_v60 = vadd.f32 -1.4531521, %v1605_v57  ;;  %v6345_v21 = vpop.eup %6344  ;;  %v1784_v57 = vld [vmem:[#allocation7 + $0x28] sm:$0xff] }
 0xe18   :  { %v1606_v5 = vadd.f32 -1.4531521, %v1604_v59  ;;  %v1785_v59 = vld [vmem:[#allocation7 + $0x30] sm:$0xff] }
 0xe19   :  { %v1609_v3 = vmul.f32 %v6339_v54, %v1607_v60  ;;  %v1786_v60 = vld [vmem:[#allocation7 + $0x38] sm:$0xff] }
 0xe1a   :  { %v1608_v63 = vmul.f32 %v6341_v56, %v1606_v5  ;;  %v5664_v61 = vpack.c.bf16 %v1786_v60, %v1785_v59 }
 0xe1b   :  { %v1611_v0 = vadd.f32 1.4214138, %v1609_v3 }
 0xe1c   :  { %v1610_v1 = vadd.f32 1.4214138, %v1608_v63 }
 0xe1d   :  { %v1613_v2 = vmul.f32 %v6339_v54, %v1611_v0 }
 0xe1e   :  { %v1612_v4 = vmul.f32 %v6341_v56, %v1610_v1 }
 0xe1f   :  { %v1615_v6 = vadd.f32 -0.28449672, %v1613_v2 }
 0xe20   :  { %v1614_v7 = vadd.f32 -0.28449672, %v1612_v4  ;;  %v5115_v4 = vld [vmem:[#allocation21] ss:$0 sm:$0xff] }
 0xe21   :  { %v1617_v8 = vmul.f32 %v6339_v54, %v1615_v6 }
 0xe22   :  { %v1616_v12 = vmul.f32 %v6341_v56, %v1614_v7 }
 0xe23   :  { %v1619_v13 = vadd.f32 0.2548296, %v1617_v8 }
 0xe24   :  { %v1618_v16 = vadd.f32 0.2548296, %v1616_v12  ;;  %v5116_v12 = vld [vmem:[#allocation22] ss:$0 sm:$0xff] }
 0xe25   :  { %v1621_v17 = vmul.f32 %v6339_v54, %v1619_v13 }
 0xe26   :  { %v1620_v20 = vmul.f32 %v6341_v56, %v1618_v16 }
 0xe27   :  { %v1631_v22 = vmul.f32 %v6343_v9, %v1621_v17 }
 0xe28   :  { %v1630_v23 = vmul.f32 %v6345_v21, %v1620_v20  ;;  %v5117_v20 = vld [vmem:[#allocation9 + $0x1] ss:$0 sm:$0xff] }
 0xe29   :  { %v1633_v24 = vsub.f32 1.0, %v1631_v22 }
 0xe2a   :  { %v1632_v27 = vsub.f32 1.0, %v1630_v23 }
 0xe2b   :  { %v1635_v28 = vmul.f32 %v1633_v24, %v1593_v26 }
 0xe2c   :  { %v1634_v30 = vmul.f32 %v1632_v27, %v1592_v29 }
 0xe2d   :  { %v1637_v31 = vadd.f32 1.0, %v1635_v28 }
 0xe2e   :  { %v1636_v33 = vadd.f32 1.0, %v1634_v30 }
 0xe2f   :  { %v1639_v36 = vmul.f32 %v1637_v31, %v1587_v34 }
 0xe30   :  { %v1638_v35 = vmul.f32 %v1636_v33, %v1586_v32 }
 0xe32   :  { %5435 = vmatprep.mubr.msk.f32.mxu1 %vm440_vm4, %v1638_v35 }
 0xe33   :  { %5436 = vmatmul.mubr.msk.f32.vlgmr.msra.gmra.mrb[14].mxu1 %vm440_vm4, %v1639_v36 }
 0xe34   :  { %5461 = vmatprep.mubr.msk.f32.mxu1 %vm6952_vm7, %v8666_v15 }
 0xf06   :  { %v5437_v39 = vpop.f32.mrb[14].mxu1 }
 0xf07   :  { %v1733_v42 = vadd.f32 %v5437_v39, %v5112_v37  ;;  %v1727_v44 = vpop.f32.mrb[15].mxu1 }
 0xf08   :  { %v1728_v46 = vadd.f32 %v5112_v37, %v1727_v44 }
 0xf09   :  { %v1737_v47 = vadd.f32 %v1733_v42, %v7518_v25 }
 0xf0a   :  { %v1736_v43 = vadd.f32 %v1728_v46, %v7514_v10  ;;  %v1783_v10 = vld [vmem:[#allocation7 + $0x20] sm:$0xff] }
 0xf0b   :  { %v1743_v41 = vsel %vm533_vm6, %v1737_v47, 0.0  ;;  %v5660_v58 = vpack.c.bf16 %v1784_v57, %v1783_v10 }
 0xf0c   :  { %1744 = vadd.xlane.f32.xlu0 %v1743_v41  ;;  %v1740_v48 = vsel %vm533_vm6, %v1736_v43, 0.0 }
 0xf0d   :  { %1741 = vadd.xlane.f32.xlu1 %v1740_v48  ;;  %5661 = vmatprep.subr.bf16.mxu0 %v5660_v58 }
 0xf0e   :  { %5663 = vmatpush3.bf16.msra.mxu0 %v5660_v58 }
 0xf0f   :  { %5665 = vmatprep.subr.bf16.mxu0 %v5664_v61 }
 0xf12   :  { %5667 = vmatpush3.bf16.msra.mxu0 %v5664_v61 }
 0xf13   :  { %5449 = vmatprep.subr.mxu0 %v8666_v15 }
 0xf99   :  { %v1745_v49 = vpop.xlane.xlu0 %1744 }
 0xf9a   :  { %v1747_v50 = vmul.f32 0.03125, %v1745_v49  ;;  %v1742_v51 = vpop.xlane.xlu1 %1741 }
 0xf9b   :  { %v1746_v52 = vmul.f32 0.03125, %v1742_v51 }
 0xf9c   :  { %v1749_v38 = vsub.f32 %v1737_v47, %v1747_v50 }
 0xf9d   :  { %v1748_v53 = vsub.f32 %v1736_v43, %v1746_v52 }
 0xf9e   :  { %v1751_v54 = vmul.f32 %v1749_v38, %v1749_v38 }
 0xf9f   :  { %v1750_v55 = vmul.f32 %v1748_v53, %v1748_v53 }
 0xfa0   :  { %v1755_v56 = vsel %vm533_vm6, %v1751_v54, 0.0 }
 0xfa1   :  { %1756 = vadd.xlane.f32.xlu0 %v1755_v56  ;;  %v1752_v25 = vsel %vm533_vm6, %v1750_v55, 0.0 }
 0xfa2   :  { %1753 = vadd.xlane.f32.xlu1 %v1752_v25 }
0x102e   :  { %v1757_v5 = vpop.xlane.xlu0 %1756 }
0x102f   :  { %v1759_v3 = vmul.f32 0.03125, %v1757_v5  ;;  %v1754_v62 = vpop.xlane.xlu1 %1753 }
0x1030   :  { %v1758_v63 = vmul.f32 0.03125, %v1754_v62 }
0x1031   :  { %v1761_v0 = vadd.f32 1e-05, %v1759_v3 }
0x1032   :  { %v1760_v1 = vadd.f32 1e-05, %v1758_v63 }
0x1033   :  { %6346 = vrsqrt.f32 %v1761_v0 }
0x1034   :  { %6348 = vrsqrt.f32 %v1760_v1 }
0x103d   :  { %v6347_v2 = vpop.eup %6346 }
0x103e   :  { %v6349_v6 = vpop.eup %6348  ;;  %v1765_v7 = vmul.f32 %v6347_v2, %v1749_v38 }
0x103f   :  { %v1764_v8 = vmul.f32 %v6349_v6, %v1748_v53 }
0x1040   :  { %v1773_v13 = vmul.f32 %v5115_v4, %v1765_v7 }
0x1041   :  { %v1772_v16 = vmul.f32 %v5115_v4, %v1764_v8 }
0x1042   :  { %v7562_v9 = vadd.f32 %v5116_v12, %v1773_v13 }
0x1043   :  { %v7560_v17 = vadd.f32 %v5116_v12, %v1772_v16 }
0x1045   :  { %5446 = vmatprep.mubr.msk.f32.mxu0 %vm533_vm6, %v7560_v17 }
0x1046   :  { %5447 = vmatmul.mubr.msk.f32.vlgmr.msra.gmra.mrb[10].mxu0 %vm533_vm6, %v7562_v9 }
0x1047   :  { %5451 = vmatprep.mubr.msk.f32.mxu0 %vm6952_vm7, %v8666_v15 }
0x1119   :  { %v5448_v21 = vpop.f32.mrb[10].mxu0 }
0x111a   :  { %v1867_v22 = vpop.f32.mrb[11].mxu0  ;;  %v7576_v24 = vadd.f32 %v5448_v21, %v5117_v20 }
0x111b   :  { %v7570_v23 = vadd.f32 %v5117_v20, %v1867_v22 }
0x111d   :  { %2044 = vrot.lane.b32.xlu0 %v7570_v23, %s6954_s24  ;;  %1877 = vrot.lane.b32.xlu1 %v7570_v23, %s6953_s6 }
0x1121   :  { %2382 = vrot.lane.b32.xlu0 %v7576_v24, %s6954_s24  ;;  %2042 = vrot.lane.b32.xlu1 %v7570_v23, %s6955_s30 }
0x1125   :  { %2215 = vrot.lane.b32.xlu1 %v7576_v24, %s6953_s6 }
0x1129   :  { %2380 = vrot.lane.b32.xlu1 %v7576_v24, %s6955_s30 }
0x118f   :  { %v2045_v26 = vpop.permute.xlu0 %2044  ;;  %v1878_v27 = vpop.permute.xlu1 %1877 }
0x1190   :  { %5450 = vmatpush3.xpose.msk.msra.mxu0 %vm358_vm0, %v1878_v27  ;;  %5460 = vmatpush3.xpose.msk.msra.mxu1 %vm358_vm0, %v2045_v26 }
0x1191   :  { %5469 = vmatprep.subr.mxu1 %v8666_v15  ;;  %5454 = vmatprep.subr.mxu0 %v8666_v15 }
0x1193   :  { %5452 = vmatmul.mubr.msk.f32.vlgmr.msra.gmra.mrb[12].mxu0 %vm358_vm0, %v7570_v23  ;;  %v2043_v28 = vpop.permute.xlu1 %2042  ;;  %v2383_v30 = vpop.permute.xlu0 %2382 }
0x1194   :  { %5462 = vmatmul.mubr.msk.f32.vlgmr.msra.gmra.mrb[16].mxu1 %vm358_vm0, %v2043_v28  ;;  %5456 = vmatprep.mubr.msk.f32.mxu0 %vm6952_vm7, %v8666_v15 }
0x1195   :  { %5471 = vmatprep.mubr.msk.f32.mxu1 %vm6952_vm7, %v8666_v15 }
0x1197   :  { %v2216_v29 = vpop.permute.xlu1 %2215 }
0x1198   :  { %5470 = vmatpush3.xpose.msk.msra.mxu1 %vm358_vm0, %v2216_v29 }
0x1199   :  { %5479 = vmatprep.subr.mxu1 %v8666_v15 }
0x119b   :  { %5472 = vmatmul.mubr.msk.f32.vlgmr.msra.gmra.mrb[18].mxu1 %vm358_vm0, %v7576_v24  ;;  %v2381_v31 = vpop.permute.xlu1 %2380 }
0x119c   :  { %5480 = vmatpush3.xpose.msk.msra.mxu1 %vm358_vm0, %v2383_v30  ;;  %5481 = vmatprep.mubr.msk.f32.mxu1 %vm6952_vm7, %v8666_v15 }
0x119f   :  { %5482 = vmatmul.mubr.msk.f32.vlgmr.msra.gmra.mrb[20].mxu1 %vm358_vm0, %v2381_v31  ;;  %v2553_v31 = vld [vmem:[#allocation10 + $0x20] sm:$0xff] }
0x1266   :  { %v1949_v32 = vpop.f32.mrb[12].mxu0 }
0x1267   :  { %v1953_v33 = vmul.f32 0.25, %v1949_v32  ;;  %v5453_v34 = vpop.f32.mrb[13].mxu0  ;;  %v2116_v35 = vpop.f32.mrb[16].mxu1  ;;  %v2554_v32 = vld [vmem:[#allocation10 + $0x28] sm:$0xff] }
0x1268   :  { %v2120_v36 = vmul.f32 0.25, %v2116_v35  ;;  %v5463_v37 = vpop.f32.mrb[17].mxu1  ;;  %v2555_v34 = vld [vmem:[#allocation10 + $0x30] sm:$0xff]  ;;  %v2556_v35 = vld [vmem:[#allocation10 + $0x38] sm:$0xff] }
0x1269   :  { %v1954_v39 = vadd.f32 %v1953_v33, %v7443_v19  ;;  %v5668_v33 = vpack.c.bf16 %v2554_v32, %v2553_v31  ;;  %v5140_v31 = vld [vmem:[%s8644_s16 + $0x40] sm:$0xff]  ;;  %v5141_v32 = vld [vmem:[%s8644_s16 + $0x48] sm:$0xff] }
0x126a   :  { %v2121_v42 = vadd.f32 %v2120_v36, %v7443_v19  ;;  %v5672_v36 = vpack.c.bf16 %v2556_v35, %v2555_v34  ;;  %v5142_v34 = vld [vmem:[%s8644_s16 + $0x50] sm:$0xff]  ;;  %v5143_v35 = vld [vmem:[%s8644_s16 + $0x58] sm:$0xff] }
0x126b   :  { %v1955_v44 = vsel %vm754_vm8, %v1954_v39, -inf  ;;  %5669 = vmatprep.subr.bf16.mxu1 %v5668_v33 }
0x126c   :  { %1956 = vmax.xlane.f32.xlu0 %v1955_v44  ;;  %v2122_v46 = vsel %vm754_vm8, %v2121_v42, -inf  ;;  %5671 = vmatpush3.bf16.msra.mxu1 %v5668_v33  ;;  %v5684_v33 = vpack.c.bf16 %v5141_v32, %v5140_v31 }
0x126d   :  { %2123 = vmax.xlane.f32.xlu1 %v2122_v46  ;;  %5673 = vmatprep.subr.bf16.mxu1 %v5672_v36 }
0x126e   :  { %v2287_v47 = vpop.f32.mrb[18].mxu1 }
0x126f   :  { %v2291_v43 = vmul.f32 0.25, %v2287_v47  ;;  %v5473_v41 = vpop.f32.mrb[19].mxu1 }
0x1270   :  { %5675 = vmatpush3.bf16.msra.mxu1 %v5672_v36  ;;  %v5688_v36 = vpack.c.bf16 %v5143_v35, %v5142_v34 }
0x1271   :  { %v2292_v48 = vadd.f32 %v2291_v43, %v7476_v45  ;;  %5685 = vmatprep.subr.bf16.mxu1 %v5684_v33 }
0x1272   :  { %v2454_v49 = vpop.f32.mrb[20].mxu1 }
0x1273   :  { %v2458_v50 = vmul.f32 0.25, %v2454_v49  ;;  %v5483_v51 = vpop.f32.mrb[21].mxu1  ;;  %v2293_v52 = vsel %vm754_vm8, %v2292_v48, -inf }
0x1274   :  { %2294 = vmax.xlane.f32.xlu0 %v2293_v52  ;;  %v5132_v52 = vld [vmem:[#allocation12 + $0x1] ss:$0 sm:$0xff] }
0x1275   :  { %v2459_v38 = vadd.f32 %v2458_v50, %v7476_v45 }
0x1277   :  { %v2460_v19 = vsel %vm754_vm8, %v2459_v38, -inf }
0x1278   :  { %2461 = vmax.xlane.f32.xlu0 %v2460_v19 }
0x127e   :  { %1966 = vrot.lane.b32.xlu1 %v7570_v23, %s6956_s5 }
0x12f9   :  { %v1957_v53 = vpop.xlane.xlu0 %1956 }
0x12fa   :  { %v1958_v54 = vsub.f32 %v1954_v39, %v1957_v53  ;;  %v2124_v55 = vpop.xlane.xlu1 %2123 }
0x12fb   :  { %v2125_v56 = vsub.f32 %v2121_v42, %v2124_v55 }
0x12fc   :  { %v1959_v25 = vmul.f32 1.442695, %v1958_v54 }
0x12fd   :  { %v2126_v10 = vmul.f32 1.442695, %v2125_v56 }
0x12fe   :  { %6350 = vpow2.f32 %v1959_v25  ;;  %v1967_v57 = vpop.permute.xlu1 %1966 }
0x12ff   :  { %6352 = vpow2.f32 %v2126_v10  ;;  %5455 = vmatpush3.msra.mxu0 %v1967_v57 }
0x1300   :  { %5464 = vmatprep.subr.mxu0 %v8666_v15 }
0x1301   :  { %v2295_v58 = vpop.xlane.xlu0 %2294 }
0x1302   :  { %v2296_v45 = vsub.f32 %v2292_v48, %v2295_v58 }
0x1304   :  { %v2297_v59 = vmul.f32 1.442695, %v2296_v45 }
0x1305   :  { %v2462_v60 = vpop.xlane.xlu0 %2461 }
0x1306   :  { %6354 = vpow2.f32 %v2297_v59  ;;  %v2463_v61 = vsub.f32 %v2459_v38, %v2462_v60 }
0x1308   :  { %v6351_v5 = vpop.eup %6350  ;;  %v2464_v3 = vmul.f32 1.442695, %v2463_v61 }
0x1309   :  { %v6353_v62 = vpop.eup %6352  ;;  %v1961_v63 = vsel %vm754_vm8, %v6351_v5, 0.0 }
0x130a   :  { %6356 = vpow2.f32 %v2464_v3  ;;  %1962 = vadd.xlane.f32.xlu1 %v1961_v63  ;;  %v2128_v0 = vsel %vm754_vm8, %v6353_v62, 0.0  ;;  %v2696_v63 = vld [vmem:[#allocation16 + $0x28] sm:$0xff] }
0x130b   :  { %2129 = vadd.xlane.f32.xlu0 %v2128_v0 }
0x1310   :  { %v6355_v1 = vpop.eup %6354 }
0x1311   :  { %v2299_v2 = vsel %vm754_vm8, %v6355_v1, 0.0 }
0x1312   :  { %2300 = vadd.xlane.f32.xlu1 %v2299_v2  ;;  %v2698_v2 = vld [vmem:[#allocation16 + $0x38] sm:$0xff] }
0x1314   :  { %v6357_v4 = vpop.eup %6356 }
0x1315   :  { %v2466_v6 = vsel %vm754_vm8, %v6357_v4, 0.0 }
0x1316   :  { %2467 = vadd.xlane.f32.xlu0 %v2466_v6 }
0x1323   :  { %2304 = vrot.lane.b32.xlu1 %v7576_v24, %s6956_s5 }
0x1327   :  { %2471 = vrot.lane.b32.xlu1 %v7576_v24, %s6957_s12 }
0x132c   :  { %2133 = vrot.lane.b32.xlu0 %v7570_v23, %s6957_s12 }
0x1397   :  { %v1963_v7 = vpop.xlane.xlu1 %1962 }
0x1398   :  { %6358 = vrcp.f32 %v1963_v7  ;;  %v2130_v8 = vpop.xlane.xlu0 %2129 }
0x1399   :  { %6360 = vrcp.f32 %v2130_v8 }
0x139f   :  { %v2301_v12 = vpop.xlane.xlu1 %2300 }
0x13a0   :  { %6362 = vrcp.f32 %v2301_v12 }
0x13a2   :  { %v6359_v13 = vpop.eup %6358 }
0x13a3   :  { %v1965_v16 = vmul.f32 %v6359_v13, %v6351_v5  ;;  %v2468_v20 = vpop.xlane.xlu0 %2467  ;;  %v6361_v21 = vpop.eup %6360 }
0x13a4   :  { %6364 = vrcp.f32 %v2468_v20  ;;  %v2132_v22 = vmul.f32 %v6361_v21, %v6353_v62  ;;  %v2305_v24 = vpop.permute.xlu1 %2304  ;;  %v5135_v21 = vld [vmem:[#allocation13 + $0x1] ss:$0 sm:$0xff] }
0x13a5   :  { %5457 = vmatmul.mubr.msk.f32.vlgmr.msra.gmra.mrb[14].mxu0 %vm754_vm8, %v1965_v16 }
0x13a6   :  { %5466 = vmatprep.mubr.msk.f32.mxu0 %vm6952_vm7, %v8666_v15 }
0x13a7   :  { %v2134_v26 = vpop.permute.xlu0 %2133 }
0x13a8   :  { %5465 = vmatpush3.msra.mxu0 %v2134_v26  ;;  %v2472_v28 = vpop.permute.xlu1 %2471 }
0x13a9   :  { %5467 = vmatmul.mubr.msk.f32.vlgmr.msra.gmra.mrb[16].mxu0 %vm754_vm8, %v2132_v22  ;;  %5474 = vmatprep.subr.mxu0 %v8666_v15 }
0x13aa   :  { %v6363_v23 = vpop.eup %6362  ;;  %5475 = vmatpush3.msra.mxu0 %v2305_v24  ;;  %5476 = vmatprep.mubr.msk.f32.mxu0 %vm6952_vm7, %v8666_v15  ;;  %v5136_v24 = vld [vmem:[#allocation15 + $0x1] ss:$0 sm:$0xff] }
0x13ab   :  { %v2303_v27 = vmul.f32 %v6363_v23, %v6355_v1  ;;  %5484 = vmatprep.subr.mxu0 %v8666_v15  ;;  %v2697_v1 = vld [vmem:[#allocation16 + $0x30] sm:$0xff] }
0x13ad   :  { %5477 = vmatmul.mubr.msk.f32.vlgmr.msra.gmra.mrb[18].mxu0 %vm754_vm8, %v2303_v27 }
0x13ae   :  { %v6365_v29 = vpop.eup %6364  ;;  %5485 = vmatpush3.msra.mxu0 %v2472_v28  ;;  %5486 = vmatprep.mubr.msk.f32.mxu0 %vm6952_vm7, %v8666_v15 }
0x13af   :  { %v2470_v30 = vmul.f32 %v6365_v29, %v6357_v4  ;;  %v5680_v4 = vpack.c.bf16 %v2698_v2, %v2697_v1 }
0x13b1   :  { %5487 = vmatmul.mubr.msk.f32.vlgmr.msra.gmra.mrb[20].mxu0 %vm754_vm8, %v2470_v30 }
0x1478   :  { %v2038_v37 = vpop.f32.mrb[14].mxu0 }
0x1479   :  { %v5458_v39 = vpop.f32.mrb[15].mxu0 }
0x147a   :  { %v5145_v39 = vld [vmem:[%s8644_s16 + $0x68] sm:$0xff] }
0x147c   :  { %v2205_v42 = vpop.f32.mrb[16].mxu0 }
0x147d   :  { %2210 = vrot.lane.b32.xlu0 %v2205_v42, %s6933_s4  ;;  %v5468_v44 = vpop.f32.mrb[17].mxu0 }
0x147e   :  { %v5146_v44 = vld [vmem:[%s8644_s16 + $0x70] sm:$0xff] }
0x1480   :  { %v2376_v46 = vpop.f32.mrb[18].mxu0 }
0x1481   :  { %v5478_v47 = vpop.f32.mrb[19].mxu0 }
0x1484   :  { %v2543_v43 = vpop.f32.mrb[20].mxu0 }
0x1485   :  { %2548 = vrot.lane.b32.xlu1 %v2543_v43, %s6933_s4  ;;  %v5488_v41 = vpop.f32.mrb[21].mxu0  ;;  %v5137_v43 = vld [vmem:[#allocation18 + $0x1] ss:$0 sm:$0xff] }
0x14ef   :  { %v2211_v48 = vpop.permute.xlu0 %2210 }
0x14f0   :  { %v2213_v49 = vsel %vm358_vm0, %v2038_v37, %v2211_v48  ;;  %v5144_v37 = vld [vmem:[%s8644_s16 + $0x60] sm:$0xff] }
0x14f1   :  { %5497 = vmatprep.mubr.msk.f32.mxu1 %vm533_vm6, %v2213_v49  ;;  %v5692_v42 = vpack.c.bf16 %v5145_v39, %v5144_v37 }
0x14f7   :  { %v2549_v50 = vpop.permute.xlu1 %2548 }
0x14f8   :  { %v2551_v51 = vsel %vm358_vm0, %v2376_v46, %v2549_v50  ;;  %v5147_v46 = vld [vmem:[%s8644_s16 + $0x78] sm:$0xff]  ;;  %vm4843_vm0 = vcmask 1043456  }
0x14f9   :  { %5498 = vmatmul.mubr.msk.f32.vlgmr.msra.gmra.mrb[22].mxu1 %vm533_vm6, %v2551_v51  ;;  %v5696_v47 = vpack.c.bf16 %v5147_v46, %v5146_v44  ;;  %v5148_v46 = vld [vmem:[#allocation19 + $0x1] ss:$0 sm:$0xff] }
0x14fa   :  { %5687 = vmatpush3.bf16.msra.mxu1 %v5684_v33 }
0x14fb   :  { %5689 = vmatprep.subr.bf16.mxu1 %v5688_v36 }
0x14fe   :  { %5691 = vmatpush3.bf16.msra.mxu1 %v5688_v36 }
0x14ff   :  { %5693 = vmatprep.subr.bf16.mxu1 %v5692_v42 }
0x1502   :  { %5695 = vmatpush3.bf16.msra.mxu1 %v5692_v42 }
0x1503   :  { %5697 = vmatprep.subr.bf16.mxu1 %v5696_v47 }
0x1506   :  { %5699 = vmatpush3.bf16.msra.mxu1 %v5696_v47 }
0x15cc   :  { %v5499_v38 = vpop.f32.mrb[22].mxu1 }
0x15cd   :  { %v2643_v19 = vadd.f32 %v5499_v38, %v5132_v52  ;;  %v2637_v53 = vpop.f32.mrb[23].mxu1 }
0x15ce   :  { %v2638_v54 = vadd.f32 %v5132_v52, %v2637_v53 }
0x15cf   :  { %v2647_v55 = vadd.f32 %v2643_v19, %v7562_v9 }
0x15d0   :  { %v2646_v56 = vadd.f32 %v2638_v54, %v7560_v17  ;;  %v2695_v17 = vld [vmem:[#allocation16 + $0x20] sm:$0xff] }
0x15d1   :  { %v2655_v25 = vsel %vm533_vm6, %v2647_v55, 0.0  ;;  %v5676_v0 = vpack.c.bf16 %v2696_v63, %v2695_v17 }
0x15d2   :  { %2656 = vadd.xlane.f32.xlu1 %v2655_v25  ;;  %v2652_v10 = vsel %vm533_vm6, %v2646_v56, 0.0 }
0x15d3   :  { %2653 = vadd.xlane.f32.xlu0 %v2652_v10  ;;  %5677 = vmatprep.subr.bf16.mxu0 %v5676_v0 }
0x15d4   :  { %5679 = vmatpush3.bf16.msra.mxu0 %v5676_v0 }
0x15d5   :  { %5681 = vmatprep.subr.bf16.mxu0 %v5680_v4 }
0x15d8   :  { %5683 = vmatpush3.bf16.msra.mxu0 %v5680_v4 }
0x165f   :  { %v2657_v57 = vpop.xlane.xlu1 %2656 }
0x1660   :  { %v2659_v58 = vmul.f32 0.03125, %v2657_v57  ;;  %v2654_v45 = vpop.xlane.xlu0 %2653 }
0x1661   :  { %v2658_v59 = vmul.f32 0.03125, %v2654_v45 }
0x1662   :  { %v2661_v60 = vsub.f32 %v2647_v55, %v2659_v58 }
0x1663   :  { %v2660_v61 = vsub.f32 %v2646_v56, %v2658_v59 }
0x1664   :  { %v2663_v62 = vmul.f32 %v2661_v60, %v2661_v60 }
0x1665   :  { %v2662_v5 = vmul.f32 %v2660_v61, %v2660_v61 }
0x1666   :  { %v2667_v9 = vsel %vm533_vm6, %v2663_v62, 0.0 }
0x1667   :  { %v2664_v3 = vsel %vm533_vm6, %v2662_v5, 0.0 }
0x1668   :  { %2665 = vadd.xlane.f32.xlu0 %v2664_v3 }
0x166c   :  { %2668 = vadd.xlane.f32.xlu0 %v2667_v9 }
0x16f5   :  { %v2666_v6 = vpop.xlane.xlu0 %2665 }
0x16f6   :  { %v2670_v7 = vmul.f32 0.03125, %v2666_v6 }
0x16f8   :  { %v2672_v8 = vadd.f32 1e-05, %v2670_v7 }
0x16f9   :  { %v2669_v12 = vpop.xlane.xlu0 %2668 }
0x16fa   :  { %6366 = vrsqrt.f32 %v2672_v8  ;;  %v2671_v13 = vmul.f32 0.03125, %v2669_v12 }
0x16fc   :  { %v2673_v16 = vadd.f32 1e-05, %v2671_v13 }
0x16fe   :  { %6368 = vrsqrt.f32 %v2673_v16 }
0x1704   :  { %v6367_v20 = vpop.eup %6366 }
0x1705   :  { %v2676_v22 = vmul.f32 %v6367_v20, %v2660_v61 }
0x1707   :  { %v2684_v26 = vmul.f32 %v5135_v21, %v2676_v22 }
0x1708   :  { %v6369_v23 = vpop.eup %6368 }
0x1709   :  { %v2677_v27 = vmul.f32 %v6369_v23, %v2661_v60  ;;  %v7650_v28 = vadd.f32 %v5136_v24, %v2684_v26 }
0x170b   :  { %v2685_v29 = vmul.f32 %v5135_v21, %v2677_v27  ;;  %5508 = vmatprep.mubr.msk.f32.mxu0 %vm533_vm6, %v7650_v28 }
0x170d   :  { %v7654_v30 = vadd.f32 %v5136_v24, %v2685_v29 }
0x170f   :  { %5509 = vmatmul.mubr.msk.f32.vlgmr.msra.gmra.mrb[22].mxu0 %vm533_vm6, %v7654_v30 }
0x1710   :  { %3096 = vmatprep.mubr.f32.mxu0 %v8666_v15 }
0x17e2   :  { %v5510_v41 = vpop.f32.mrb[22].mxu0 }
0x17e3   :  { %v2785_v48 = vadd.f32 %v5510_v41, %v5137_v43  ;;  %v2779_v49 = vpop.f32.mrb[23].mxu0 }
0x17e4   :  { %v2780_v50 = vadd.f32 %v5137_v43, %v2779_v49 }
0x17e5   :  { %v2791_v51 = vmul.f32 0.70710677, %v2785_v48  ;;  %v2789_v39 = vmul.f32 0.5, %v2785_v48 }
0x17e6   :  { %v2790_v52 = vmul.f32 0.70710677, %v2780_v50  ;;  %v2788_v36 = vmul.f32 0.5, %v2780_v50 }
0x17e7   :  { %v2797_v38 = vand.u32 2147483647, %v2791_v51  ;;  %vm2793_vm11 = vcmp.lt.f32.partialorder %v2791_v51, 0.0 }
0x17e8   :  { %v2796_v19 = vand.u32 2147483647, %v2790_v52  ;;  %vm2792_vm12 = vcmp.lt.f32.partialorder %v2790_v52, 0.0  ;;  %v2795_v29 = vsel %vm2793_vm11, -1.0, %v6958_v11  ;;  %v3204_v52 = vld [vmem:[%s8650_s22 + $0x8] sm:$0xff] }
0x17e9   :  { %v2799_v53 = vmul.f32 0.3275911, %v2797_v38  ;;  %v2825_v25 = vsub.f32 0.0, %v2797_v38  ;;  %v2794_v33 = vsel %vm2792_vm12, -1.0, %v6958_v11 }
0x17ea   :  { %v2798_v54 = vmul.f32 0.3275911, %v2796_v19  ;;  %v2824_v10 = vsub.f32 0.0, %v2796_v19 }
0x17eb   :  { %v2801_v55 = vadd.f32 1.0, %v2799_v53  ;;  %v2827_v58 = vmul.f32 %v2825_v25, %v2797_v38  ;;  %v3208_v38 = vld [vmem:[%s8650_s22 + $0x28] sm:$0xff] }
0x17ec   :  { %v2800_v56 = vadd.f32 1.0, %v2798_v54  ;;  %v2826_v60 = vmul.f32 %v2824_v10, %v2796_v19  ;;  %v7698_v19 = vpack.c.bf16 %v3208_v38, %v3204_v52  ;;  %v3252_v38 = vld [vmem:[%s8650_s22 + $0x188] sm:$0xff] }
0x17ed   :  { %6370 = vrcp.f32 %v2801_v55  ;;  %v2830_v3 = vmul.f32 1.442695, %v2827_v58 }
0x17ee   :  { %6372 = vrcp.f32 %v2800_v56  ;;  %v2828_v17 = vmul.f32 1.442695, %v2826_v60  ;;  %8702 = vst [vmem:[#allocation40_spill] sm:$0xff] %v7698_v19  ;;  %5717 = vmatprep.subr.bf16.mxu1 %v7698_v19 }
0x17ef   :  { %6374 = vpow2.f32 %v2830_v3 }
0x17f0   :  { %6376 = vpow2.f32 %v2828_v17 }
0x17f7   :  { %v6371_v57 = vpop.eup %6370 }
0x17f8   :  { %v6373_v45 = vpop.eup %6372  ;;  %v2807_v59 = vmul.f32 1.0614054, %v6371_v57 }
0x17f9   :  { %v2806_v61 = vmul.f32 1.0614054, %v6373_v45  ;;  %v6375_v21 = vpop.eup %6374 }
0x17fa   :  { %v2809_v5 = vadd.f32 -1.4531521, %v2807_v59  ;;  %v6377_v24 = vpop.eup %6376  ;;  %v3207_v59 = vld [vmem:[%s8650_s22 + $0x20] sm:$0xff] }
0x17fb   :  { %v2808_v62 = vadd.f32 -1.4531521, %v2806_v61  ;;  %v3212_v61 = vld [vmem:[%s8650_s22 + $0x48] sm:$0xff] }
0x17fc   :  { %v2811_v9 = vmul.f32 %v6371_v57, %v2809_v5  ;;  %v3216_v5 = vld [vmem:[%s8650_s22 + $0x68] sm:$0xff] }
0x17fd   :  { %v2810_v63 = vmul.f32 %v6373_v45, %v2808_v62  ;;  %v7726_v3 = vpack.c.bf16 %v3216_v5, %v3212_v61  ;;  %v3211_v62 = vld [vmem:[%s8650_s22 + $0x40] sm:$0xff] }
0x17fe   :  { %v2813_v0 = vadd.f32 1.4214138, %v2811_v9  ;;  %v3215_v9 = vld [vmem:[%s8650_s22 + $0x60] sm:$0xff] }
0x17ff   :  { %v2812_v1 = vadd.f32 1.4214138, %v2810_v63  ;;  %v7734_v17 = vpack.c.bf16 %v3215_v9, %v3211_v62  ;;  %v3220_v63 = vld [vmem:[%s8650_s22 + $0x88] sm:$0xff] }
0x1800   :  { %v2815_v2 = vmul.f32 %v6371_v57, %v2813_v0  ;;  %v3224_v0 = vld [vmem:[%s8650_s22 + $0xa8] sm:$0xff] }
0x1801   :  { %v2814_v4 = vmul.f32 %v6373_v45, %v2812_v1  ;;  %v7744_v1 = vpack.c.bf16 %v3224_v0, %v3220_v63 }
0x1802   :  { %v2817_v6 = vadd.f32 -0.28449672, %v2815_v2  ;;  %v3219_v2 = vld [vmem:[%s8650_s22 + $0x80] sm:$0xff] }
0x1803   :  { %v2816_v7 = vadd.f32 -0.28449672, %v2814_v4  ;;  %v3223_v4 = vld [vmem:[%s8650_s22 + $0xa0] sm:$0xff] }
0x1804   :  { %v2819_v8 = vmul.f32 %v6371_v57, %v2817_v6  ;;  %v7752_v6 = vpack.c.bf16 %v3223_v4, %v3219_v2 }
0x1805   :  { %v2818_v12 = vmul.f32 %v6373_v45, %v2816_v7  ;;  %v3228_v7 = vld [vmem:[%s8650_s22 + $0xc8] sm:$0xff] }
0x1806   :  { %v2821_v13 = vadd.f32 0.2548296, %v2819_v8  ;;  %v3232_v8 = vld [vmem:[%s8650_s22 + $0xe8] sm:$0xff] }
0x1807   :  { %v2820_v16 = vadd.f32 0.2548296, %v2818_v12  ;;  %v7762_v12 = vpack.c.bf16 %v3232_v8, %v3228_v7  ;;  %v5151_v8 = vld [vmem:[#allocation21 + $0x1] ss:$0 sm:$0xff] }
0x1808   :  { %v2823_v20 = vmul.f32 %v6371_v57, %v2821_v13  ;;  %v3227_v13 = vld [vmem:[%s8650_s22 + $0xc0] sm:$0xff] }
0x1809   :  { %v2822_v22 = vmul.f32 %v6373_v45, %v2820_v16  ;;  %v3203_v45 = vld [vmem:[%s8650_s22] sm:$0xff] }
0x180a   :  { %v2833_v26 = vmul.f32 %v6375_v21, %v2823_v20  ;;  %v7717_v60 = vpack.c.bf16 %v3207_v59, %v3203_v45  ;;  %v3231_v16 = vld [vmem:[%s8650_s22 + $0xe0] sm:$0xff]  ;;  %v2989_v21 = vld [vmem:[#allocation24 + $0x8] sm:$0xff] }
0x180b   :  { %v2832_v23 = vmul.f32 %v6377_v24, %v2822_v22  ;;  %v7770_v20 = vpack.c.bf16 %v3231_v16, %v3227_v13  ;;  %v2993_v22 = vld [vmem:[#allocation24 + $0x28] sm:$0xff]  ;;  %v3259_v45 = vld [vmem:[%s8650_s22 + $0x1c0] sm:$0xff]  ;;  %v2990_v16 = vld [vmem:[#allocation24 + $0x10] sm:$0xff] }
0x180c   :  { %v2835_v27 = vsub.f32 1.0, %v2833_v26  ;;  %v5700_v24 = vpack.c.bf16 %v2993_v22, %v2989_v21  ;;  %v2988_v26 = vld [vmem:[#allocation24] sm:$0xff]  ;;  %v2994_v21 = vld [vmem:[#allocation24 + $0x30] sm:$0xff] }
0x180d   :  { %v2834_v31 = vsub.f32 1.0, %v2832_v23  ;;  %v2992_v23 = vld [vmem:[#allocation24 + $0x20] sm:$0xff] }
0x180e   :  { %v2837_v32 = vmul.f32 %v2835_v27, %v2795_v29  ;;  %v5702_v27 = vpack.c.bf16 %v2992_v23, %v2988_v26  ;;  %v3236_v29 = vld [vmem:[%s8650_s22 + $0x108] sm:$0xff]  ;;  %5701 = vmatprep.subr.bf16.mxu0 %v5700_v24  ;;  %v3263_v59 = vld [vmem:[%s8650_s22 + $0x1e0] sm:$0xff] }
0x180f   :  { %v2836_v34 = vmul.f32 %v2834_v31, %v2794_v33  ;;  %v3240_v31 = vld [vmem:[%s8650_s22 + $0x128] sm:$0xff]  ;;  %v3235_v33 = vld [vmem:[%s8650_s22 + $0x100] sm:$0xff]  ;;  %v7842_v61 = vpack.c.bf16 %v3263_v59, %v3259_v45  ;;  %v3230_v45 = vld [vmem:[%s8650_s22 + $0xd8] sm:$0xff] }
0x1810   :  { %v2839_v35 = vadd.f32 1.0, %v2837_v32  ;;  %v7780_v32 = vpack.c.bf16 %v3240_v31, %v3236_v29  ;;  %5703 = vmatpush1.bf16.msra.mxu0 %v5702_v27  ;;  %v5152_v24 = vld [vmem:[#allocation22 + $0x1] ss:$0 sm:$0xff]  ;;  %v5710_v29 = vpack.c.bf16 %v2994_v21, %v2990_v16  ;;  %v3234_v59 = vld [vmem:[%s8650_s22 + $0xf8] sm:$0xff] }
0x1811   :  { %v2838_v37 = vadd.f32 1.0, %v2836_v34  ;;  %v3239_v34 = vld [vmem:[%s8650_s22 + $0x120] sm:$0xff]  ;;  %v3246_v16 = vld [vmem:[%s8650_s22 + $0x158] sm:$0xff] }
0x1812   :  { %v2841_v44 = vmul.f32 %v2839_v35, %v2789_v39  ;;  %v7788_v35 = vpack.c.bf16 %v3239_v34, %v3235_v33  ;;  %v2999_v26 = vld [vmem:[#allocation24 + $0x58] sm:$0xff] }
0x1813   :  { %v2840_v42 = vmul.f32 %v2838_v37, %v2788_v36  ;;  %v2997_v36 = vld [vmem:[#allocation24 + $0x48] sm:$0xff]  ;;  %v3003_v23 = vld [vmem:[#allocation24 + $0x78] sm:$0xff] }
0x1814   :  { %v3001_v37 = vld [vmem:[#allocation24 + $0x68] sm:$0xff]  ;;  %v5712_v33 = vpack.c.bf16 %v3003_v23, %v2999_v26  ;;  %v3250_v21 = vld [vmem:[%s8650_s22 + $0x178] sm:$0xff] }
0x1815   :  { %5527 = vmatprep.mubr.msk.f32.mxu1 %vm440_vm4, %v2840_v42  ;;  %v5704_v39 = vpack.c.bf16 %v3001_v37, %v2997_v36  ;;  %v2996_v42 = vld [vmem:[#allocation24 + $0x40] sm:$0xff]  ;;  %v2998_v36 = vld [vmem:[#allocation24 + $0x50] sm:$0xff] }
0x1816   :  { %5528 = vmatmul.mubr.msk.f32.vlgmr.msra.gmra.mrb[24].mxu1 %vm440_vm4, %v2841_v44  ;;  %v3000_v44 = vld [vmem:[#allocation24 + $0x60] sm:$0xff]  ;;  %v3002_v37 = vld [vmem:[#allocation24 + $0x70] sm:$0xff]  ;;  %vm4944_vm4 = vcmask 39936  }
0x1817   :  { %3331 = vmatprep.mubr.f32.mxu1 %v8666_v15  ;;  %5719 = vmatpush1.bf16.msra.mxu1 %v7717_v60  ;;  %v3245_v26 = vld [vmem:[%s8650_s22 + $0x150] sm:$0xff] }
0x1818   :  { %5721 = vmatprep.subr.bf16.mxu1 %v7726_v3  ;;  %5705 = vmatprep.subr.bf16.mxu0 %v5704_v39  ;;  %v3206_v39 = vld [vmem:[%s8650_s22 + $0x18] sm:$0xff]  ;;  %v3249_v23 = vld [vmem:[%s8650_s22 + $0x170] sm:$0xff] }
0x181b   :  { %5723 = vmatpush1.bf16.msra.mxu1 %v7734_v17 }
0x181c   :  { %5725 = vmatprep.subr.bf16.mxu1 %v7744_v1 }
0x181f   :  { %5727 = vmatpush1.bf16.msra.mxu1 %v7752_v6 }
0x1820   :  { %5729 = vmatprep.subr.bf16.mxu1 %v7762_v12 }
0x1823   :  { %5731 = vmatpush1.bf16.msra.mxu1 %v7770_v20 }
0x1824   :  { %5733 = vmatprep.subr.bf16.mxu1 %v7780_v32 }
0x1827   :  { %5735 = vmatpush1.bf16.msra.mxu1 %v7788_v35 }
0x18e9   :  { %v5529_v47 = vpop.f32.mrb[24].mxu1 }
0x18ea   :  { %v2937_v43 = vadd.f32 %v5529_v47, %v5148_v46  ;;  %v2931_v41 = vpop.f32.mrb[25].mxu1  ;;  %v3244_v47 = vld [vmem:[%s8650_s22 + $0x148] sm:$0xff] }
0x18eb   :  { %v2932_v49 = vadd.f32 %v5148_v46, %v2931_v41  ;;  %v5706_v46 = vpack.c.bf16 %v3000_v44, %v2996_v42 }
0x18ec   :  { %v2941_v11 = vadd.f32 %v2937_v43, %v7654_v30  ;;  %v3248_v43 = vld [vmem:[%s8650_s22 + $0x168] sm:$0xff] }
0x18ed   :  { %v2940_v51 = vadd.f32 %v2932_v49, %v7650_v28  ;;  %v7798_v41 = vpack.c.bf16 %v3248_v43, %v3244_v47  ;;  %v3243_v49 = vld [vmem:[%s8650_s22 + $0x140] sm:$0xff]  ;;  %5707 = vmatpush1.bf16.msra.mxu0 %v5706_v46  ;;  %v3205_v46 = vld [vmem:[%s8650_s22 + $0x10] sm:$0xff]  ;;  %v3214_v43 = vld [vmem:[%s8650_s22 + $0x58] sm:$0xff] }
0x18ee   :  { %v2949_v50 = vsel %vm533_vm6, %v2941_v11, 0.0  ;;  %v3209_v47 = vld [vmem:[%s8650_s22 + $0x30] sm:$0xff] }
0x18ef   :  { %2950 = vadd.xlane.f32.xlu0 %v2949_v50  ;;  %v2946_v48 = vsel %vm533_vm6, %v2940_v51, 0.0  ;;  %5737 = vmatprep.subr.bf16.mxu1 %v7798_v41 }
0x18f0   :  { %2947 = vadd.xlane.f32.xlu1 %v2946_v48  ;;  %v2995_v48 = vld [vmem:[#allocation24 + $0x38] sm:$0xff] }
0x197c   :  { %v2951_v30 = vpop.xlane.xlu0 %2950 }
0x197d   :  { %v2953_v28 = vmul.f32 0.03125, %v2951_v30  ;;  %v2948_v53 = vpop.xlane.xlu1 %2947  ;;  %v3256_v30 = vld [vmem:[%s8650_s22 + $0x1a8] sm:$0xff] }
0x197e   :  { %v2952_v54 = vmul.f32 0.03125, %v2948_v53  ;;  %v3251_v53 = vld [vmem:[%s8650_s22 + $0x180] sm:$0xff] }
0x197f   :  { %v7701_v55 = vsub.f32 %v2941_v11, %v2953_v28  ;;  %v3247_v11 = vld [vmem:[%s8650_s22 + $0x160] sm:$0xff]  ;;  %v7816_v28 = vpack.c.bf16 %v3256_v30, %v3252_v38  ;;  %v3222_v38 = vld [vmem:[%s8650_s22 + $0x98] sm:$0xff] }
0x1980   :  { %v7703_v56 = vsub.f32 %v2940_v51, %v2952_v54  ;;  %v2991_v51 = vld [vmem:[#allocation24 + $0x18] sm:$0xff]  ;;  %v7806_v50 = vpack.c.bf16 %v3247_v11, %v3243_v49  ;;  %v7891_v11 = vpack.c.bf16 %v3209_v47, %v3205_v46  ;;  %v3265_v46 = vld [vmem:[%s8650_s22 + $0x1f0] sm:$0xff] }
0x1981   :  { %v2957_v25 = vmul.f32 %v7701_v55, %v7701_v55  ;;  %v5708_v52 = vpack.c.bf16 %v2995_v48, %v2991_v51  ;;  %v3255_v54 = vld [vmem:[%s8650_s22 + $0x1a0] sm:$0xff]  ;;  %v3218_v49 = vld [vmem:[%s8650_s22 + $0x78] sm:$0xff]  ;;  %v3213_v48 = vld [vmem:[%s8650_s22 + $0x50] sm:$0xff] }
0x1982   :  { %v2956_v10 = vmul.f32 %v7703_v56, %v7703_v56  ;;  %5739 = vmatpush1.bf16.msra.mxu1 %v7806_v50  ;;  %v7894_v51 = vpack.c.bf16 %v3218_v49, %v3214_v43  ;;  %v3226_v30 = vld [vmem:[%s8650_s22 + $0xb8] sm:$0xff] }
0x1983   :  { %v2961_v57 = vsel %vm533_vm6, %v2957_v25, 0.0  ;;  %5709 = vmatprep.subr.bf16.mxu0 %v5708_v52  ;;  %v7824_v25 = vpack.c.bf16 %v3255_v54, %v3251_v53  ;;  %5741 = vmatprep.subr.bf16.mxu1 %v7816_v28  ;;  %v3217_v52 = vld [vmem:[%s8650_s22 + $0x70] sm:$0xff]  ;;  %v7914_v54 = vpack.c.bf16 %v3226_v30, %v3222_v38  ;;  %v8669_v30 = vsub.s32 2, %v7437_v14 }
0x1984   :  { %2962 = vadd.xlane.f32.xlu0 %v2961_v57  ;;  %v2958_v58 = vsel %vm533_vm6, %v2956_v10, 0.0  ;;  %v3260_v10 = vld [vmem:[%s8650_s22 + $0x1c8] sm:$0xff]  ;;  %v7911_v53 = vpack.c.bf16 %v3217_v52, %v3213_v48  ;;  %v3004_v48 = vld [vmem:[#allocation25] sm:$0xf] }
0x1985   :  { %2959 = vadd.xlane.f32.xlu1 %v2958_v58  ;;  %v3264_v57 = vld [vmem:[%s8650_s22 + $0x1e8] sm:$0xff]  ;;  %v3009_v52 = vrot.slane %v3004_v48, %v7440_v18  ;;  %v3013_v38 = vrot.slane %v3004_v48, %v7472_v40 }
0x1986   :  { %5743 = vmatpush1.bf16.msra.mxu1 %v7824_v25  ;;  %v7834_v58 = vpack.c.bf16 %v3264_v57, %v3260_v10  ;;  %v3221_v10 = vld [vmem:[%s8650_s22 + $0x90] sm:$0xff] }
0x1987   :  { %v3225_v57 = vld [vmem:[%s8650_s22 + $0xb0] sm:$0xff] }
0x1988   :  { %5745 = vmatprep.subr.bf16.mxu1 %v7834_v58 }
0x198a   :  { %5747 = vmatpush1.bf16.msra.mxu1 %v7842_v61 }
0x198b   :  { %5781 = vmatprep.subr.bf16.mxu1 %v7698_v19 }
0x198d   :  { %3332 = vmatmul.mubr.f32.vlgmr.msra.gmra.mrb[26].mxu1 %v8666_v15 }
0x198e   :  { %5783 = vmatpush1.bf16.msra.mxu1 %v7717_v60  ;;  %3543 = vmatprep.mubr.f32.mxu1 %v8666_v15 }
0x198f   :  { %5785 = vmatprep.subr.bf16.mxu1 %v7726_v3 }
0x1992   :  { %5787 = vmatpush1.bf16.msra.mxu1 %v7734_v17 }
0x1993   :  { %5789 = vmatprep.subr.bf16.mxu1 %v7744_v1 }
0x1996   :  { %5791 = vmatpush1.bf16.msra.mxu1 %v7752_v6 }
0x1997   :  { %5793 = vmatprep.subr.bf16.mxu1 %v7762_v12 }
0x199a   :  { %5795 = vmatpush1.bf16.msra.mxu1 %v7770_v20 }
0x199b   :  { %5797 = vmatprep.subr.bf16.mxu1 %v7780_v32 }
0x199e   :  { %5799 = vmatpush1.bf16.msra.mxu1 %v7788_v35 }
0x199f   :  { %5801 = vmatprep.subr.bf16.mxu1 %v7798_v41 }
0x19a2   :  { %5803 = vmatpush1.bf16.msra.mxu1 %v7806_v50 }
0x19a3   :  { %5805 = vmatprep.subr.bf16.mxu1 %v7816_v28 }
0x19a6   :  { %5807 = vmatpush1.bf16.msra.mxu1 %v7824_v25 }
0x19a7   :  { %5809 = vmatprep.subr.bf16.mxu1 %v7834_v58 }
0x19aa   :  { %5811 = vmatpush1.bf16.msra.mxu1 %v7842_v61 }
0x19ab   :  { %5845 = vmatprep.subr.bf16.mxu1 %v7698_v19 }
0x1a11   :  { %v2963_v5 = vpop.xlane.xlu0 %2962 }
0x1a12   :  { %v2965_v62 = vmul.f32 0.03125, %v2963_v5  ;;  %v2960_v9 = vpop.xlane.xlu1 %2959  ;;  %v7930_v5 = vpack.c.bf16 %v3225_v57, %v3221_v10  ;;  %v8668_v10 = vsub.s32 3, %v7437_v14  ;;  %v8042_v57 = vld [vmem:[#allocation27] sm:$0xf] }
0x1a13   :  { %v2964_v63 = vmul.f32 0.03125, %v2960_v9  ;;  %v3229_v9 = vld [vmem:[%s8650_s22 + $0xd0] sm:$0xff] }
0x1a14   :  { %v2967_v0 = vadd.f32 1e-05, %v2965_v62  ;;  %v7934_v62 = vpack.c.bf16 %v3234_v59, %v3230_v45 }
0x1a15   :  { %v2966_v2 = vadd.f32 1e-05, %v2964_v63  ;;  %v3233_v63 = vld [vmem:[%s8650_s22 + $0xf0] sm:$0xff] }
0x1a16   :  { %6378 = vrsqrt.f32 %v2967_v0  ;;  %v3238_v0 = vld [vmem:[%s8650_s22 + $0x118] sm:$0xff] }
0x1a17   :  { %6380 = vrsqrt.f32 %v2966_v2  ;;  %v3242_v2 = vld [vmem:[%s8650_s22 + $0x138] sm:$0xff] }
0x1a20   :  { %v6379_v4 = vpop.eup %6378 }
0x1a21   :  { %v6381_v7 = vpop.eup %6380  ;;  %v2971_v22 = vmul.f32 %v6379_v4, %v7701_v55  ;;  %v5714_v55 = vpack.c.bf16 %v3002_v37, %v2998_v36  ;;  %v7949_v4 = vpack.c.bf16 %v3233_v63, %v3229_v9  ;;  %v3257_v36 = vld [vmem:[%s8650_s22 + $0x1b0] sm:$0xff]  ;;  %v3262_v37 = vld [vmem:[%s8650_s22 + $0x1d8] sm:$0xff] }
0x1a22   :  { %v2970_v13 = vmul.f32 %v6381_v7, %v7703_v56  ;;  %v3210_v56 = vld [vmem:[%s8650_s22 + $0x38] sm:$0xff]  ;;  %v7952_v7 = vpack.c.bf16 %v3242_v2, %v3238_v0  ;;  %v3017_v0 = vrot.slane %v3004_v48, %v8669_v30  ;;  %v8052_v2 = vrot.slane %v8042_v57, %v7440_v18 }
0x1a23   :  { %v2979_v34 = vmul.f32 %v5151_v8, %v2971_v22  ;;  %v7875_v44 = vpack.c.bf16 %v3210_v56, %v3206_v39  ;;  %v3266_v39 = vld [vmem:[%s8650_s22 + $0x1f8] sm:$0xff] }
0x1a24   :  { %v2978_v27 = vmul.f32 %v5151_v8, %v2970_v13  ;;  %v3237_v8 = vld [vmem:[%s8650_s22 + $0x110] sm:$0xff] }
0x1a25   :  { %v2987_v42 = vadd.f32 %v5152_v24, %v2979_v34  ;;  %8703 = vst [vmem:[#allocation41_spill] sm:$0xff] %v7875_v44  ;;  %v3241_v13 = vld [vmem:[%s8650_s22 + $0x130] sm:$0xff] }
0x1a26   :  { %v2986_v31 = vadd.f32 %v5152_v24, %v2978_v27  ;;  %v7967_v22 = vpack.c.bf16 %v3241_v13, %v3237_v8  ;;  %v7970_v24 = vpack.c.bf16 %v3250_v21, %v3246_v16  ;;  %v3254_v27 = vld [vmem:[%s8650_s22 + $0x198] sm:$0xff]  ;;  %v3253_v34 = vld [vmem:[%s8650_s22 + $0x190] sm:$0xff]  ;;  %v3021_v8 = vrot.slane %v3004_v48, %v8668_v10 }
0x1a27   :  { %v8003_v56 = vpack.c.bf16 %v3257_v36, %v3253_v34  ;;  %v8058_v13 = vrot.slane %v8042_v57, %v7472_v40 }
0x1a28   :  { %5153 = vmatmul.mubr.msk.f32.vlgmr.msra.gmra.mrb[24].mxu0 %vm533_vm6, %v2986_v31 }
0x1a29   :  { %5711 = vmatpush1.bf16.msra.mxu0 %v5710_v29  ;;  %3102 = vmatprep.mubr.f32.mxu0 %v8666_v15  ;;  %v3258_v29 = vld [vmem:[%s8650_s22 + $0x1b8] sm:$0xff]  ;;  %8705 = vst [vmem:[#allocation43_spill] sm:$0xff] %v8058_v13 }
0x1a2a   :  { %5713 = vmatprep.subr.bf16.mxu0 %v5712_v33  ;;  %v7988_v33 = vpack.c.bf16 %v3258_v29, %v3254_v27 }
0x1a2c   :  { %5154 = vmatmul.mubr.msk.f32.gmra.mrb[26].mxu0 %vm533_vm6, %v2987_v42 }
0x1a2d   :  { %5715 = vmatpush1.bf16.msra.mxu0 %v5714_v55  ;;  %3173 = vmatprep.mubr.f32.mxu0 %v8666_v15  ;;  %v8006_v55 = vpack.c.bf16 %v3266_v39, %v3262_v37 }
0x1a2e   :  { %5749 = vmatprep.subr.bf16.mxu0 %v7875_v44 }
0x1a30   :  { %5155 = vmatmul.mubr.msk.f32.vlgmr.msra.gmra.mrb[28].mxu0 %vm533_vm6, %v2986_v31  ;;  %v7985_v31 = vpack.c.bf16 %v3249_v23, %v3245_v26 }
0x1a31   :  { %5751 = vmatpush1.bf16.msra.mxu0 %v7891_v11  ;;  %3179 = vmatprep.mubr.f32.mxu0 %v8666_v15 }
0x1a32   :  { %5753 = vmatprep.subr.bf16.mxu0 %v7894_v51 }
0x1a34   :  { %5156 = vmatmul.mubr.msk.f32.gmra.mrb[30].mxu0 %vm533_vm6, %v2987_v42  ;;  %v3261_v42 = vld [vmem:[%s8650_s22 + $0x1d0] sm:$0xff] }
0x1a35   :  { %5755 = vmatpush1.bf16.msra.mxu0 %v7911_v53  ;;  %3402 = vmatprep.mubr.f32.mxu0 %v8666_v15  ;;  %v8015_v47 = vpack.c.bf16 %v3265_v46, %v3261_v42 }
0x1a36   :  { %5757 = vmatprep.subr.bf16.mxu0 %v7914_v54 }
0x1a37   :  { %8704 = vst [vmem:[#allocation42_spill] sm:$0xff] %v8015_v47 }
0x1a39   :  { %5759 = vmatpush1.bf16.msra.mxu0 %v7930_v5 }
0x1a3a   :  { %5761 = vmatprep.subr.bf16.mxu0 %v7934_v62 }
0x1a3d   :  { %5763 = vmatpush1.bf16.msra.mxu0 %v7949_v4 }
0x1a3e   :  { %5765 = vmatprep.subr.bf16.mxu0 %v7952_v7 }
0x1a41   :  { %5767 = vmatpush1.bf16.msra.mxu0 %v7967_v22 }
0x1a42   :  { %5769 = vmatprep.subr.bf16.mxu0 %v7970_v24 }
0x1a45   :  { %5771 = vmatpush1.bf16.msra.mxu0 %v7985_v31 }
0x1a46   :  { %5773 = vmatprep.subr.bf16.mxu0 %v7988_v33 }
0x1a49   :  { %5775 = vmatpush1.bf16.msra.mxu0 %v8003_v56 }
0x1a4a   :  { %5777 = vmatprep.subr.bf16.mxu0 %v8006_v55 }
0x1a4d   :  { %5779 = vmatpush1.bf16.msra.mxu0 %v8015_v47 }
0x1a4e   :  { %5813 = vmatprep.subr.bf16.mxu0 %v7875_v44 }
0x1a50   :  { %3403 = vmatmul.mubr.f32.vlgmr.msra.gmra.mrb[32].mxu0 %v8666_v15 }
0x1a51   :  { %5815 = vmatpush1.bf16.msra.mxu0 %v7891_v11  ;;  %3614 = vmatprep.mubr.f32.mxu0 %v8666_v15 }
0x1a52   :  { %5817 = vmatprep.subr.bf16.mxu0 %v7894_v51 }
0x1a55   :  { %5819 = vmatpush1.bf16.msra.mxu0 %v7911_v53 }
0x1a56   :  { %5821 = vmatprep.subr.bf16.mxu0 %v7914_v54 }
0x1a59   :  { %5823 = vmatpush1.bf16.msra.mxu0 %v7930_v5 }
0x1a5a   :  { %5825 = vmatprep.subr.bf16.mxu0 %v7934_v62 }
0x1a5d   :  { %5827 = vmatpush1.bf16.msra.mxu0 %v7949_v4 }
0x1a5e   :  { %5829 = vmatprep.subr.bf16.mxu0 %v7952_v7 }
0x1a60   :  { %v3333_v43 = vpop.f32.mrb[26].mxu1 }
0x1a61   :  { %5831 = vmatpush1.bf16.msra.mxu0 %v7967_v22  ;;  %v3335_v49 = vpop.f32.mrb[27].mxu1 }
0x1a62   :  { %5833 = vmatprep.subr.bf16.mxu0 %v7970_v24 }
0x1a65   :  { %5835 = vmatpush1.bf16.msra.mxu0 %v7985_v31 }
0x1a66   :  { %5837 = vmatprep.subr.bf16.mxu0 %v7988_v33 }
0x1a69   :  { %5839 = vmatpush1.bf16.msra.mxu0 %v8003_v56 }
0x1a6a   :  { %5841 = vmatprep.subr.bf16.mxu0 %v8006_v55 }
0x1a6d   :  { %5843 = vmatpush1.bf16.msra.mxu0 %v8015_v47 }
0x1a6e   :  { %5877 = vmatprep.subr.bf16.mxu0 %v7875_v44 }
0x1afb   :  { %v3098_v45 = vpop.f32.mrb[24].mxu0 }
0x1afc   :  { %v8044_v59 = vadd.f32 %v3098_v45, %v3009_v52  ;;  %v3100_v9 = vpop.f32.mrb[25].mxu0 }
0x1afd   :  { %v8046_v63 = vadd.f32 %v3100_v9, %v3013_v38 }
0x1afe   :  { %v3467_v16 = vrot.slane %v8044_v59, 1  ;;  %v3653_v21 = vrot.slane %v8044_v59, 2  ;;  %v3847_v26 = vrot.slane %v8044_v59, 3  ;;  %v4041_v34 = vrot.slane %v8044_v59, 4 }
0x1aff   :  { %v3104_v23 = vpop.f32.mrb[26].mxu0  ;;  %v3468_v27 = vrot.slane %v8046_v63, 1  ;;  %v3654_v29 = vrot.slane %v8046_v63, 2  ;;  %v3848_v18 = vrot.slane %v8046_v63, 3  ;;  %v4042_v40 = vrot.slane %v8046_v63, 4 }
0x1b00   :  { %v8067_v36 = vadd.f32 %v3104_v23, %v3009_v52  ;;  %v3106_v37 = vpop.f32.mrb[27].mxu0 }
0x1b01   :  { %v8072_v46 = vadd.f32 %v3106_v37, %v3013_v38 }
0x1b02   :  { %v3190_v15 = vrot.slane %v8067_v36, 7  ;;  %v8080_v52 = vsel %vm3198_vm13, %v3467_v16, %v8067_v36  ;;  %v3661_v23 = vrot.slane %v8067_v36, 1  ;;  %v3855_v10 = vrot.slane %v8067_v36, 2 }
0x1b03   :  { %8706 = vst [vmem:[#allocation44_spill] sm:$0xff] %v8080_v52  ;;  %v3175_v30 = vpop.f32.mrb[28].mxu0  ;;  %v3191_v38 = vrot.slane %v8072_v46, 7  ;;  %v8087_v37 = vsel %vm3198_vm13, %v3468_v27, %v8072_v46  ;;  %v3662_v45 = vrot.slane %v8072_v46, 1  ;;  %v3856_v9 = vrot.slane %v8072_v46, 2 }
0x1b04   :  { %8707 = vst [vmem:[#allocation45_spill] sm:$0xff] %v8087_v37  ;;  %v8091_v48 = vadd.f32 %v3175_v30, %v3017_v0  ;;  %v3177_v42 = vpop.f32.mrb[29].mxu0  ;;  %v3199_v16 = vsel %vm3198_vm13, %v8044_v59, %v3190_v15  ;;  %v8096_v39 = vsel %vm3198_vm13, %v3653_v21, %v3661_v23  ;;  %v8099_v52 = vsel %vm3198_vm13, %v3847_v26, %v3855_v10 }
0x1b05   :  { %8708 = vst [vmem:[#allocation46_spill] sm:$0xff] %v8096_v39  ;;  %8709 = vst [vmem:[#allocation47_spill] sm:$0xff] %v8099_v52  ;;  %v8101_v44 = vadd.f32 %v3177_v42, %v3021_v8  ;;  %v3409_v27 = vadd.f32 %v3333_v43, %v3199_v16  ;;  %v3200_v37 = vsel %vm3198_vm13, %v8046_v63, %v3191_v38 }
0x1b06   :  { %v8106_v19 = vsel %vm3198_vm13, %v3654_v29, %v3662_v45  ;;  %v3410_v30 = vadd.f32 %v3335_v49, %v3200_v37  ;;  %v3469_v47 = vrot.slane %v8091_v48, 1  ;;  %v3655_v15 = vrot.slane %v8091_v48, 2 }
0x1b07   :  { %8710 = vst [vmem:[#allocation48_spill] sm:$0xff] %v8106_v19  ;;  %v3435_v23 = vadd.f32 %v8052_v2, %v3409_v27  ;;  %v3181_v10 = vpop.f32.mrb[30].mxu0  ;;  %v3470_v26 = vrot.slane %v8101_v44, 1  ;;  %v3849_v43 = vrot.slane %v8091_v48, 3  ;;  %v8115_v42 = vsel %vm3198_vm13, %v3848_v18, %v3856_v9 }
0x1b08   :  { %8711 = vst [vmem:[#allocation49_spill] sm:$0xff] %v8115_v42  ;;  %v3436_v29 = vadd.f32 %v8058_v13, %v3410_v30  ;;  %v8118_v45 = vadd.f32 %v3181_v10, %v3017_v0  ;;  %v3183_v49 = vpop.f32.mrb[31].mxu0  ;;  %v3656_v38 = vrot.slane %v8101_v44, 2  ;;  %v3850_v37 = vrot.slane %v8101_v44, 3 }
0x1b09   :  { %v5157_v16 = vmul.f32 -1.442695, %v3435_v23  ;;  %v3184_v21 = vadd.f32 %v3183_v49, %v3021_v8  ;;  %v4049_v27 = vrot.slane %v8067_v36, 3  ;;  %v4043_v52 = vrot.slane %v8091_v48, 4 }
0x1b0a   :  { %v3192_v19 = vrot.slane %v8118_v45, 7  ;;  %v8127_v18 = vsel %vm3198_vm13, %v3469_v47, %v8118_v45  ;;  %v3663_v0 = vrot.slane %v8118_v45, 1  ;;  %v4050_v9 = vrot.slane %v8072_v46, 3 }
0x1b0b   :  { %v5158_v30 = vmul.f32 -1.442695, %v3436_v29  ;;  %v3193_v10 = vrot.slane %v3184_v21, 7  ;;  %v8132_v42 = vsel %vm3198_vm13, %v3470_v26, %v3184_v21  ;;  %v3664_v8 = vrot.slane %v3184_v21, 1 }
0x1b0c   :  { %6382 = vpow2.f32 %v5157_v16  ;;  %v3201_v23 = vsel %vm3198_vm13, %v8091_v48, %v3192_v19  ;;  %v8137_v49 = vsel %vm3198_vm13, %v3655_v15, %v3663_v0  ;;  %v3857_v47 = vrot.slane %v8118_v45, 2 }
0x1b0d   :  { %8712 = vst [vmem:[#allocation50_spill] sm:$0xff] %v8137_v49  ;;  %v3202_v39 = vsel %vm3198_vm13, %v8101_v44, %v3193_v10  ;;  %v8143_v13 = vsel %vm3198_vm13, %v3656_v38, %v3664_v8  ;;  %v3858_v29 = vrot.slane %v3184_v21, 2  ;;  %v8146_v26 = vsel %vm3198_vm13, %v4041_v34, %v4049_v27 }
0x1b0e   :  { %8713 = vst [vmem:[#allocation51_spill] sm:$0xff] %v8146_v26  ;;  %v8149_v16 = vsel %vm3198_vm13, %v3849_v43, %v3857_v47  ;;  %v4051_v19 = vrot.slane %v8118_v45, 3  ;;  %v8153_v15 = vsel %vm3198_vm13, %v4042_v40, %v4050_v9  ;;  %v4044_v0 = vrot.slane %v8101_v44, 4 }
0x1b0f   :  { %8714 = vst [vmem:[#allocation52_spill] sm:$0xff] %v8153_v15  ;;  %v8157_v49 = vsel %vm3198_vm13, %v3850_v37, %v3858_v29  ;;  %v4052_v10 = vrot.slane %v3184_v21, 3  ;;  %v4243_v38 = vrot.slane %v8067_v36, 4  ;;  %v4237_v8 = vrot.slane %v8091_v48, 5 }
0x1b10   :  { %v8162_v34 = vsel %vm3198_vm13, %v4043_v52, %v4051_v19  ;;  %v4245_v43 = vrot.slane %v8118_v45, 4  ;;  %v4244_v27 = vrot.slane %v8072_v46, 4  ;;  %v4238_v40 = vrot.slane %v8101_v44, 5 }
0x1b11   :  { %8715 = vst [vmem:[#allocation53_spill] sm:$0xff] %v8162_v34  ;;  %v8168_v9 = vsel %vm3198_vm13, %v4044_v0, %v4052_v10  ;;  %v8716_v37 = vrot.slane %v8044_v59, 5  ;;  %v4246_v29 = vrot.slane %v3184_v21, 4  ;;  %v4437_v15 = vrot.slane %v8067_v36, 5 }
0x1b12   :  { %v8177_v52 = vsel %vm3198_vm13, %v4237_v8, %v4245_v43  ;;  %v8717_v19 = vrot.slane %v8046_v63, 5  ;;  %v4431_v26 = vrot.slane %v8091_v48, 6  ;;  %v4439_v0 = vrot.slane %v8118_v45, 5 }
0x1b13   :  { %v8173_v47 = vsel %vm3198_vm13, %v8716_v37, %v4243_v38  ;;  %6384 = vpow2.f32 %v5158_v30  ;;  %v8187_v10 = vsel %vm3198_vm13, %v4238_v40, %v4246_v29  ;;  %v8720_v38 = vrot.slane %v8044_v59, 6 }
0x1b14   :  { %v8182_v34 = vsel %vm3198_vm13, %v8717_v19, %v4244_v27  ;;  %8719 = vst [vmem:[#allocation55_spill] sm:$0xff] %v8187_v10  ;;  %v4438_v8 = vrot.slane %v8072_v46, 5  ;;  %v8196_v43 = vsel %vm3198_vm13, %v4431_v26, %v4439_v0  ;;  %v4432_v27 = vrot.slane %v8101_v44, 6 }
0x1b15   :  { %8718 = vst [vmem:[#allocation54_spill] sm:$0xff] %v8182_v34  ;;  %v8192_v37 = vsel %vm3198_vm13, %v8720_v38, %v4437_v15  ;;  %8722 = vst [vmem:[#allocation57_spill] sm:$0xff] %v8196_v43  ;;  %v4440_v19 = vrot.slane %v3184_v21, 5  ;;  %v4631_v34 = vrot.slane %v8067_v36, 6  ;;  %v8723_v30 = vrot.slane %v8046_v63, 6 }
0x1b16   :  { %8721 = vst [vmem:[#allocation56_spill] sm:$0xff] %v8192_v37  ;;  %v4625_v29 = vrot.slane %v8091_v48, 7  ;;  %v4633_v15 = vrot.slane %v8118_v45, 6  ;;  %v4632_v38 = vrot.slane %v8072_v46, 6  ;;  %v6383_v37 = vpop.eup %6382  ;;  %v8725_v0 = vrot.slane %v8044_v59, 7 }
0x1b17   :  { %v8203_v40 = vsel %vm3198_vm13, %v8723_v30, %v4438_v8  ;;  %v8209_v26 = vsel %vm3198_vm13, %v4432_v27, %v4440_v19  ;;  %v4626_v36 = vrot.slane %v8101_v44, 7  ;;  %v4634_v10 = vrot.slane %v3184_v21, 6 }
0x1b18   :  { %8724 = vst [vmem:[#allocation58_spill] sm:$0xff] %v8209_v26  ;;  %v8214_v43 = vsel %vm3198_vm13, %v8725_v0, %v4631_v34  ;;  %v8218_v8 = vsel %vm3198_vm13, %v4625_v29, %v4633_v15  ;;  %v8728_v48 = vrot.slane %v8046_v63, 7  ;;  %v8731_v59 = vsub.s32 2, %v7437_v14 }
0x1b19   :  { %8726 = vst [vmem:[#allocation59_spill] sm:$0xff] %v8214_v43  ;;  %8727 = vst [vmem:[#allocation60_spill] sm:$0xff] %v8218_v8  ;;  %v8226_v46 = vsel %vm3198_vm13, %v4626_v36, %v4634_v10  ;;  %v8732_v44 = vsub.s32 3, %v7437_v14  ;;  %v3442_v30 = vadd.f32 1.0, %v6383_v37 }
0x1b1a   :  { %v8223_v45 = vsel %vm3198_vm13, %v8728_v48, %v4632_v38  ;;  %8730 = vst [vmem:[#allocation62_spill] sm:$0xff] %v8226_v46  ;;  %v8231_v34 = vrot.slane %v8042_v57, %v8731_v59 }
0x1b1b   :  { %8729 = vst [vmem:[#allocation61_spill] sm:$0xff] %v8223_v45  ;;  %v8236_v21 = vrot.slane %v8042_v57, %v8732_v44 }
0x1b1d   :  { %v6385_v27 = vpop.eup %6384 }
0x1b1e   :  { %v3448_v19 = vadd.f32 1.0, %v6385_v27 }
0x1b20   :  { %6386 = vrcp.f32 %v3448_v19 }
0x1b21   :  { %6388 = vrcp.f32 %v3442_v30 }
0x1b23   :  { %v3404_v63 = vpop.f32.mrb[32].mxu0 }
0x1b24   :  { %v3411_v29 = vadd.f32 %v3404_v63, %v3201_v23  ;;  %v3406_v15 = vpop.f32.mrb[33].mxu0  ;;  %v8733_v63 = vmov 0.0  }
0x1b25   :  { %v3412_v38 = vadd.f32 %v3406_v15, %v3202_v39  ;;  %v8735_v15 = vld [vmem:[#allocation40_spill] sm:$0xff] }
0x1b26   :  { %v3437_v10 = vadd.f32 %v8231_v34, %v3411_v29  ;;  %v8734_v29 = vld [vmem:[#allocation42_spill] sm:$0xff] }
0x1b27   :  { %v3438_v0 = vadd.f32 %v8236_v21, %v3412_v38  ;;  %v8736_v38 = vld [vmem:[#allocation41_spill] sm:$0xff] }
0x1b28   :  { %6390 = vtanh.f32 %v3437_v10 }
0x1b29   :  { %v5159_v36 = vmul.f32 -1.442695, %v3438_v0 }
0x1b2a   :  { %v6387_v48 = vpop.eup %6386 }
0x1b2b   :  { %6392 = vpow2.f32 %v5159_v36  ;;  %v6389_v27 = vpop.eup %6388  ;;  %v3458_v59 = vmul.f32 0.0, %v6387_v48  ;;  %v8737_v36 = vld [vmem:[#allocation44_spill] sm:$0xff] }
0x1b32   :  { %v6391_v14 = vpop.eup %6390 }
0x1b33   :  { %v3459_v57 = vmul.f32 %v6391_v14, %v6389_v27 }
0x1b35   :  { %v6393_v44 = vpop.eup %6392  ;;  %v8240_v37 = vadd.f32 %v3459_v57, %v3458_v59  ;;  %v8738_v57 = vld [vmem:[#allocation45_spill] sm:$0xff] }
0x1b36   :  { %v3455_v23 = vadd.f32 1.0, %v6393_v44 }
0x1b37   :  { %6394 = vtanh.f32 %v8240_v37 }
0x1b38   :  { %6396 = vrcp.f32 %v3455_v23 }
0x1b41   :  { %v6395_v39 = vpop.eup %6394 }
0x1b42   :  { %v6397_v19 = vpop.eup %6396 }
0x1b43   :  { %v8243_v30 = vmul.f32 %v6397_v19, %v6395_v39  ;;  %v8739_v19 = vld [vmem:[#allocation43_spill] sm:$0xff] }
0x1b45   :  { %3544 = vmatmul.mubr.f32.vlgmr.msra.gmra.mrb[28].mxu1 %v8243_v30  ;;  %3615 = vmatmul.mubr.f32.vlgmr.msra.gmra.mrb[34].mxu0 %v8243_v30 }
0x1b46   :  { %5847 = vmatpush1.bf16.msra.mxu1 %v7717_v60  ;;  %5879 = vmatpush1.bf16.msra.mxu0 %v7891_v11 }
0x1b47   :  { %5849 = vmatprep.subr.bf16.mxu1 %v7726_v3  ;;  %5881 = vmatprep.subr.bf16.mxu0 %v7894_v51 }
0x1b48   :  { %3737 = vmatprep.mubr.f32.mxu1 %v8733_v63  ;;  %3808 = vmatprep.mubr.f32.mxu0 %v8733_v63 }
0x1b4a   :  { %5851 = vmatpush1.bf16.msra.mxu1 %v7734_v17  ;;  %5883 = vmatpush1.bf16.msra.mxu0 %v7911_v53 }
0x1b4b   :  { %5853 = vmatprep.subr.bf16.mxu1 %v7744_v1  ;;  %5885 = vmatprep.subr.bf16.mxu0 %v7914_v54 }
0x1b4e   :  { %5855 = vmatpush1.bf16.msra.mxu1 %v7752_v6  ;;  %5887 = vmatpush1.bf16.msra.mxu0 %v7930_v5 }
0x1b4f   :  { %5857 = vmatprep.subr.bf16.mxu1 %v7762_v12  ;;  %5889 = vmatprep.subr.bf16.mxu0 %v7934_v62 }
0x1b52   :  { %5859 = vmatpush1.bf16.msra.mxu1 %v7770_v20  ;;  %5891 = vmatpush1.bf16.msra.mxu0 %v7949_v4 }
0x1b53   :  { %5861 = vmatprep.subr.bf16.mxu1 %v7780_v32  ;;  %5893 = vmatprep.subr.bf16.mxu0 %v7952_v7 }
0x1b56   :  { %5863 = vmatpush1.bf16.msra.mxu1 %v7788_v35  ;;  %5895 = vmatpush1.bf16.msra.mxu0 %v7967_v22 }
0x1b57   :  { %5865 = vmatprep.subr.bf16.mxu1 %v7798_v41  ;;  %5897 = vmatprep.subr.bf16.mxu0 %v7970_v24 }
0x1b5a   :  { %5867 = vmatpush1.bf16.msra.mxu1 %v7806_v50  ;;  %5899 = vmatpush1.bf16.msra.mxu0 %v7985_v31 }
0x1b5b   :  { %5869 = vmatprep.subr.bf16.mxu1 %v7816_v28  ;;  %5901 = vmatprep.subr.bf16.mxu0 %v7988_v33 }
0x1b5e   :  { %5871 = vmatpush1.bf16.msra.mxu1 %v7824_v25  ;;  %5903 = vmatpush1.bf16.msra.mxu0 %v8003_v56 }
0x1b5f   :  { %5873 = vmatprep.subr.bf16.mxu1 %v7834_v58  ;;  %5905 = vmatprep.subr.bf16.mxu0 %v8006_v55 }
0x1b62   :  { %5875 = vmatpush1.bf16.msra.mxu1 %v7842_v61  ;;  %5907 = vmatpush1.bf16.msra.mxu0 %v8734_v29 }
0x1b63   :  { %5909 = vmatprep.subr.bf16.mxu1 %v8735_v15  ;;  %5941 = vmatprep.subr.bf16.mxu0 %v8736_v38 }
0x1c18   :  { %v3545_v10 = vpop.f32.mrb[28].mxu1  ;;  %v3616_v0 = vpop.f32.mrb[34].mxu0 }
0x1c19   :  { %v3621_v48 = vadd.f32 %v3545_v10, %v8737_v36  ;;  %v3623_v27 = vadd.f32 %v3616_v0, %v8127_v18  ;;  %v3547_v14 = vpop.f32.mrb[29].mxu1  ;;  %v3618_v59 = vpop.f32.mrb[35].mxu0 }
0x1c1a   :  { %v3622_v44 = vadd.f32 %v3547_v14, %v8738_v57  ;;  %v3624_v23 = vadd.f32 %v3618_v59, %v8132_v42 }
0x1c1b   :  { %v3625_v39 = vadd.f32 %v3621_v48, %v8052_v2  ;;  %v3627_v10 = vadd.f32 %v3623_v27, %v8231_v34 }
0x1c1c   :  { %v3626_v46 = vadd.f32 %v3622_v44, %v8739_v19  ;;  %v3628_v43 = vadd.f32 %v3624_v23, %v8236_v21 }
0x1c1d   :  { %v5160_v45 = vmul.f32 -1.442695, %v3625_v39  ;;  %v8740_v39 = vld [vmem:[#allocation46_spill] sm:$0xff] }
0x1c1e   :  { %v5161_v8 = vmul.f32 -1.442695, %v3626_v46  ;;  %v5162_v26 = vmul.f32 -1.442695, %v3628_v43 }
0x1c1f   :  { %6398 = vpow2.f32 %v5160_v45 }
0x1c20   :  { %6400 = vpow2.f32 %v5161_v8 }
0x1c21   :  { %6402 = vpow2.f32 %v5162_v26 }
0x1c22   :  { %6404 = vtanh.f32 %v3627_v10 }
0x1c29   :  { %v6399_v18 = vpop.eup %6398 }
0x1c2a   :  { %v6401_v0 = vpop.eup %6400  ;;  %v3632_v36 = vadd.f32 1.0, %v6399_v18  ;;  %v8741_v18 = vld [vmem:[#allocation50_spill] sm:$0xff] }
0x1c2b   :  { %v3638_v14 = vadd.f32 1.0, %v6401_v0  ;;  %v6403_v42 = vpop.eup %6402 }
0x1c2c   :  { %6406 = vrcp.f32 %v3632_v36  ;;  %v6405_v48 = vpop.eup %6404  ;;  %v3645_v45 = vadd.f32 1.0, %v6403_v42  ;;  %v8742_v42 = vld [vmem:[#allocation48_spill] sm:$0xff] }
0x1c2d   :  { %6408 = vrcp.f32 %v3638_v14 }
0x1c2e   :  { %6410 = vrcp.f32 %v3645_v45 }
0x1c36   :  { %v6407_v59 = vpop.eup %6406 }
0x1c37   :  { %v6409_v57 = vpop.eup %6408  ;;  %v3649_v46 = vmul.f32 %v6407_v59, %v6405_v48 }
0x1c38   :  { %v3648_v8 = vmul.f32 %v6409_v57, %v8240_v37  ;;  %v6411_v43 = vpop.eup %6410 }
0x1c3a   :  { %v8290_v44 = vadd.f32 %v3649_v46, %v3648_v8 }
0x1c3c   :  { %6412 = vtanh.f32 %v8290_v44 }
0x1c46   :  { %v6413_v27 = vpop.eup %6412 }
0x1c47   :  { %v8293_v26 = vmul.f32 %v6413_v27, %v6411_v43 }
0x1c49   :  { %3738 = vmatmul.mubr.f32.vlgmr.msra.gmra.mrb[30].mxu1 %v8293_v26  ;;  %3809 = vmatmul.mubr.f32.vlgmr.msra.gmra.mrb[36].mxu0 %v8293_v26 }
0x1c4a   :  { %5911 = vmatpush1.bf16.msra.mxu1 %v7717_v60  ;;  %5943 = vmatpush1.bf16.msra.mxu0 %v7891_v11 }
0x1c4b   :  { %5913 = vmatprep.subr.bf16.mxu1 %v7726_v3  ;;  %5945 = vmatprep.subr.bf16.mxu0 %v7894_v51 }
0x1c4c   :  { %3931 = vmatprep.mubr.f32.mxu1 %v8733_v63  ;;  %4002 = vmatprep.mubr.f32.mxu0 %v8733_v63 }
0x1c4e   :  { %5915 = vmatpush1.bf16.msra.mxu1 %v7734_v17  ;;  %5947 = vmatpush1.bf16.msra.mxu0 %v7911_v53 }
0x1c4f   :  { %5917 = vmatprep.subr.bf16.mxu1 %v7744_v1  ;;  %5949 = vmatprep.subr.bf16.mxu0 %v7914_v54 }
0x1c52   :  { %5919 = vmatpush1.bf16.msra.mxu1 %v7752_v6  ;;  %5951 = vmatpush1.bf16.msra.mxu0 %v7930_v5 }
0x1c53   :  { %5921 = vmatprep.subr.bf16.mxu1 %v7762_v12  ;;  %5953 = vmatprep.subr.bf16.mxu0 %v7934_v62 }
0x1c56   :  { %5923 = vmatpush1.bf16.msra.mxu1 %v7770_v20  ;;  %5955 = vmatpush1.bf16.msra.mxu0 %v7949_v4 }
0x1c57   :  { %5925 = vmatprep.subr.bf16.mxu1 %v7780_v32  ;;  %5957 = vmatprep.subr.bf16.mxu0 %v7952_v7 }
0x1c5a   :  { %5927 = vmatpush1.bf16.msra.mxu1 %v7788_v35  ;;  %5959 = vmatpush1.bf16.msra.mxu0 %v7967_v22 }
0x1c5b   :  { %5929 = vmatprep.subr.bf16.mxu1 %v7798_v41  ;;  %5961 = vmatprep.subr.bf16.mxu0 %v7970_v24 }
0x1c5e   :  { %5931 = vmatpush1.bf16.msra.mxu1 %v7806_v50  ;;  %5963 = vmatpush1.bf16.msra.mxu0 %v7985_v31 }
0x1c5f   :  { %5933 = vmatprep.subr.bf16.mxu1 %v7816_v28  ;;  %5965 = vmatprep.subr.bf16.mxu0 %v7988_v33 }
0x1c62   :  { %5935 = vmatpush1.bf16.msra.mxu1 %v7824_v25  ;;  %5967 = vmatpush1.bf16.msra.mxu0 %v8003_v56 }
0x1c63   :  { %5937 = vmatprep.subr.bf16.mxu1 %v7834_v58  ;;  %5969 = vmatprep.subr.bf16.mxu0 %v8006_v55 }
0x1c66   :  { %5939 = vmatpush1.bf16.msra.mxu1 %v7842_v61  ;;  %5971 = vmatpush1.bf16.msra.mxu0 %v8734_v29 }
0x1c67   :  { %5973 = vmatprep.subr.bf16.mxu1 %v8735_v15  ;;  %6005 = vmatprep.subr.bf16.mxu0 %v8736_v38 }
0x1d1c   :  { %v3739_v37 = vpop.f32.mrb[30].mxu1  ;;  %v3810_v23 = vpop.f32.mrb[36].mxu0 }
0x1d1d   :  { %v3815_v10 = vadd.f32 %v3739_v37, %v8740_v39  ;;  %v3817_v0 = vadd.f32 %v3810_v23, %v8741_v18  ;;  %v3741_v36 = vpop.f32.mrb[31].mxu1  ;;  %v3812_v14 = vpop.f32.mrb[37].mxu0 }
0x1d1e   :  { %v3816_v48 = vadd.f32 %v3741_v36, %v8742_v42  ;;  %v3818_v59 = vadd.f32 %v3812_v14, %v8143_v13 }
0x1d1f   :  { %v3819_v57 = vadd.f32 %v3815_v10, %v8052_v2  ;;  %v3821_v37 = vadd.f32 %v3817_v0, %v8231_v34 }
0x1d20   :  { %v3820_v46 = vadd.f32 %v3816_v48, %v8739_v19  ;;  %v3822_v43 = vadd.f32 %v3818_v59, %v8236_v21 }
0x1d21   :  { %v5163_v45 = vmul.f32 -1.442695, %v3819_v57 }
0x1d22   :  { %v5164_v8 = vmul.f32 -1.442695, %v3820_v46  ;;  %v5165_v27 = vmul.f32 -1.442695, %v3822_v43 }
0x1d23   :  { %6414 = vpow2.f32 %v5163_v45 }
0x1d24   :  { %6416 = vpow2.f32 %v5164_v8  ;;  %v4818_v8 = vrot.slane %v8293_v26, 7 }
0x1d25   :  { %6418 = vpow2.f32 %v5165_v27  ;;  %v4947_v27 = vrot.slane %v8243_v30, 1 }
0x1d26   :  { %6420 = vtanh.f32 %v3821_v37 }
0x1d2d   :  { %v6415_v23 = vpop.eup %6414 }
0x1d2e   :  { %v6417_v39 = vpop.eup %6416  ;;  %v3826_v18 = vadd.f32 1.0, %v6415_v23 }
0x1d2f   :  { %v3832_v36 = vadd.f32 1.0, %v6417_v39  ;;  %v6419_v13 = vpop.eup %6418  ;;  %v4838_v39 = vsel %vm3198_vm13, %v8243_v30, %v4818_v8 }
0x1d30   :  { %6422 = vrcp.f32 %v3826_v18  ;;  %v6421_v10 = vpop.eup %6420  ;;  %v3839_v57 = vadd.f32 1.0, %v6419_v13  ;;  %v8743_v13 = vld [vmem:[#allocation47_spill] sm:$0xff] }
0x1d31   :  { %6424 = vrcp.f32 %v3832_v36 }
0x1d32   :  { %6426 = vrcp.f32 %v3839_v57  ;;  %v8744_v57 = vld [vmem:[#allocation49_spill] sm:$0xff] }
0x1d3a   :  { %v6423_v14 = vpop.eup %6422 }
0x1d3b   :  { %v6425_v42 = vpop.eup %6424  ;;  %v3843_v48 = vmul.f32 %v6423_v14, %v6421_v10 }
0x1d3c   :  { %v3842_v46 = vmul.f32 %v6425_v42, %v8290_v44  ;;  %v6427_v0 = vpop.eup %6426  ;;  %v4961_v44 = vsel %vm3198_vm13, %v4947_v27, %v8293_v26 }
0x1d3e   :  { %v8340_v59 = vadd.f32 %v3843_v48, %v3842_v46 }
0x1d40   :  { %6428 = vtanh.f32 %v8340_v59 }
0x1d4a   :  { %v6429_v45 = vpop.eup %6428 }
0x1d4b   :  { %v3846_v43 = vmul.f32 %v6429_v45, %v6427_v0 }
0x1d4d   :  { %3932 = vmatmul.mubr.f32.vlgmr.msra.gmra.mrb[32].mxu1 %v3846_v43  ;;  %v4821_v37 = vrot.slane %v3846_v43, 6  ;;  %v4949_v23 = vrot.slane %v3846_v43, 7  ;;  %4003 = vmatmul.mubr.f32.vlgmr.msra.gmra.mrb[38].mxu0 %v3846_v43 }
0x1d4e   :  { %5975 = vmatpush1.bf16.msra.mxu1 %v7717_v60  ;;  %6007 = vmatpush1.bf16.msra.mxu0 %v7891_v11 }
0x1d4f   :  { %5977 = vmatprep.subr.bf16.mxu1 %v7726_v3  ;;  %6009 = vmatprep.subr.bf16.mxu0 %v7894_v51  ;;  %v8353_v18 = vsel %vm4839_vm14, %v4838_v39, %v4821_v37  ;;  %v8355_v36 = vsel %vm4839_vm14, %v4961_v44, %v4949_v23 }
0x1d50   :  { %4125 = vmatprep.mubr.f32.mxu1 %v8733_v63  ;;  %4196 = vmatprep.mubr.f32.mxu0 %v8733_v63 }
0x1d52   :  { %5979 = vmatpush1.bf16.msra.mxu1 %v7734_v17  ;;  %6011 = vmatpush1.bf16.msra.mxu0 %v7911_v53 }
0x1d53   :  { %5981 = vmatprep.subr.bf16.mxu1 %v7744_v1  ;;  %6013 = vmatprep.subr.bf16.mxu0 %v7914_v54 }
0x1d56   :  { %5983 = vmatpush1.bf16.msra.mxu1 %v7752_v6  ;;  %6015 = vmatpush1.bf16.msra.mxu0 %v7930_v5 }
0x1d57   :  { %5985 = vmatprep.subr.bf16.mxu1 %v7762_v12  ;;  %6017 = vmatprep.subr.bf16.mxu0 %v7934_v62 }
0x1d5a   :  { %5987 = vmatpush1.bf16.msra.mxu1 %v7770_v20  ;;  %6019 = vmatpush1.bf16.msra.mxu0 %v7949_v4 }
0x1d5b   :  { %5989 = vmatprep.subr.bf16.mxu1 %v7780_v32  ;;  %6021 = vmatprep.subr.bf16.mxu0 %v7952_v7 }
0x1d5e   :  { %5991 = vmatpush1.bf16.msra.mxu1 %v7788_v35  ;;  %6023 = vmatpush1.bf16.msra.mxu0 %v7967_v22 }
0x1d5f   :  { %5993 = vmatprep.subr.bf16.mxu1 %v7798_v41  ;;  %6025 = vmatprep.subr.bf16.mxu0 %v7970_v24 }
0x1d62   :  { %5995 = vmatpush1.bf16.msra.mxu1 %v7806_v50  ;;  %6027 = vmatpush1.bf16.msra.mxu0 %v7985_v31 }
0x1d63   :  { %5997 = vmatprep.subr.bf16.mxu1 %v7816_v28  ;;  %6029 = vmatprep.subr.bf16.mxu0 %v7988_v33 }
0x1d66   :  { %5999 = vmatpush1.bf16.msra.mxu1 %v7824_v25  ;;  %6031 = vmatpush1.bf16.msra.mxu0 %v8003_v56 }
0x1d67   :  { %6001 = vmatprep.subr.bf16.mxu1 %v7834_v58  ;;  %6033 = vmatprep.subr.bf16.mxu0 %v8006_v55 }
0x1d6a   :  { %6003 = vmatpush1.bf16.msra.mxu1 %v7842_v61  ;;  %6035 = vmatpush1.bf16.msra.mxu0 %v8734_v29 }
0x1d6b   :  { %6037 = vmatprep.subr.bf16.mxu1 %v8735_v15  ;;  %6069 = vmatprep.subr.bf16.mxu0 %v8736_v38 }
0x1e20   :  { %v3933_v30 = vpop.f32.mrb[32].mxu1  ;;  %v4004_v26 = vpop.f32.mrb[38].mxu0 }
0x1e21   :  { %v4009_v10 = vadd.f32 %v3933_v30, %v8743_v13  ;;  %v4011_v14 = vadd.f32 %v4004_v26, %v8149_v16  ;;  %v3935_v42 = vpop.f32.mrb[33].mxu1  ;;  %v4006_v48 = vpop.f32.mrb[39].mxu0 }
0x1e22   :  { %v4010_v46 = vadd.f32 %v3935_v42, %v8744_v57  ;;  %v4012_v0 = vadd.f32 %v4006_v48, %v8157_v49 }
0x1e23   :  { %v4013_v45 = vadd.f32 %v4009_v10, %v8052_v2  ;;  %v4015_v44 = vadd.f32 %v4011_v14, %v8231_v34 }
0x1e24   :  { %v4014_v8 = vadd.f32 %v4010_v46, %v8739_v19  ;;  %v4016_v37 = vadd.f32 %v4012_v0, %v8236_v21 }
0x1e25   :  { %v5166_v43 = vmul.f32 -1.442695, %v4013_v45 }
0x1e26   :  { %v5167_v27 = vmul.f32 -1.442695, %v4014_v8  ;;  %v5168_v23 = vmul.f32 -1.442695, %v4016_v37 }
0x1e27   :  { %6430 = vpow2.f32 %v5166_v43 }
0x1e28   :  { %6432 = vpow2.f32 %v5167_v27 }
0x1e29   :  { %6434 = vpow2.f32 %v5168_v23  ;;  %v8745_v23 = vld [vmem:[#allocation51_spill] sm:$0xff] }
0x1e2a   :  { %6436 = vtanh.f32 %v4015_v44 }
0x1e31   :  { %v6431_v16 = vpop.eup %6430 }
0x1e32   :  { %v6433_v39 = vpop.eup %6432  ;;  %v4020_v30 = vadd.f32 1.0, %v6431_v16  ;;  %v8746_v16 = vld [vmem:[#allocation53_spill] sm:$0xff] }
0x1e33   :  { %v4026_v26 = vadd.f32 1.0, %v6433_v39  ;;  %v6435_v49 = vpop.eup %6434 }
0x1e34   :  { %6438 = vrcp.f32 %v4020_v30  ;;  %v6437_v13 = vpop.eup %6436  ;;  %v4033_v57 = vadd.f32 1.0, %v6435_v49  ;;  %v8747_v49 = vld [vmem:[#allocation52_spill] sm:$0xff] }
0x1e35   :  { %6440 = vrcp.f32 %v4026_v26 }
0x1e36   :  { %6442 = vrcp.f32 %v4033_v57 }
0x1e3e   :  { %v6439_v10 = vpop.eup %6438 }
0x1e3f   :  { %v6441_v42 = vpop.eup %6440  ;;  %v4037_v48 = vmul.f32 %v6439_v10, %v6437_v13 }
0x1e40   :  { %v4036_v46 = vmul.f32 %v6441_v42, %v8340_v59  ;;  %v6443_v14 = vpop.eup %6442 }
0x1e42   :  { %v8396_v0 = vadd.f32 %v4037_v48, %v4036_v46 }
0x1e44   :  { %6444 = vtanh.f32 %v8396_v0 }
0x1e4e   :  { %v6445_v45 = vpop.eup %6444 }
0x1e4f   :  { %v4040_v8 = vmul.f32 %v6445_v45, %v6443_v14 }
0x1e51   :  { %4126 = vmatmul.mubr.f32.vlgmr.msra.gmra.mrb[34].mxu1 %v4040_v8  ;;  %v4824_v43 = vrot.slane %v4040_v8, 5  ;;  %v4951_v27 = vrot.slane %v4040_v8, 6  ;;  %4197 = vmatmul.mubr.f32.vlgmr.msra.gmra.mrb[40].mxu0 %v4040_v8 }
0x1e52   :  { %6039 = vmatpush1.bf16.msra.mxu1 %v7717_v60  ;;  %6071 = vmatpush1.bf16.msra.mxu0 %v7891_v11 }
0x1e53   :  { %6041 = vmatprep.subr.bf16.mxu1 %v7726_v3  ;;  %6073 = vmatprep.subr.bf16.mxu0 %v7894_v51  ;;  %v8404_v59 = vsel %vm4841_vm15, %v8353_v18, %v4824_v43  ;;  %v8407_v37 = vsel %vm4841_vm15, %v8355_v36, %v4951_v27 }
0x1e54   :  { %4319 = vmatprep.mubr.f32.mxu1 %v8733_v63  ;;  %4390 = vmatprep.mubr.f32.mxu0 %v8733_v63 }
0x1e56   :  { %6043 = vmatpush1.bf16.msra.mxu1 %v7734_v17  ;;  %6075 = vmatpush1.bf16.msra.mxu0 %v7911_v53 }
0x1e57   :  { %6045 = vmatprep.subr.bf16.mxu1 %v7744_v1  ;;  %6077 = vmatprep.subr.bf16.mxu0 %v7914_v54 }
0x1e5a   :  { %6047 = vmatpush1.bf16.msra.mxu1 %v7752_v6  ;;  %6079 = vmatpush1.bf16.msra.mxu0 %v7930_v5 }
0x1e5b   :  { %6049 = vmatprep.subr.bf16.mxu1 %v7762_v12  ;;  %6081 = vmatprep.subr.bf16.mxu0 %v7934_v62 }
0x1e5e   :  { %6051 = vmatpush1.bf16.msra.mxu1 %v7770_v20  ;;  %6083 = vmatpush1.bf16.msra.mxu0 %v7949_v4 }
0x1e5f   :  { %6053 = vmatprep.subr.bf16.mxu1 %v7780_v32  ;;  %6085 = vmatprep.subr.bf16.mxu0 %v7952_v7 }
0x1e62   :  { %6055 = vmatpush1.bf16.msra.mxu1 %v7788_v35  ;;  %6087 = vmatpush1.bf16.msra.mxu0 %v7967_v22 }
0x1e63   :  { %6057 = vmatprep.subr.bf16.mxu1 %v7798_v41  ;;  %6089 = vmatprep.subr.bf16.mxu0 %v7970_v24 }
0x1e66   :  { %6059 = vmatpush1.bf16.msra.mxu1 %v7806_v50  ;;  %6091 = vmatpush1.bf16.msra.mxu0 %v7985_v31 }
0x1e67   :  { %6061 = vmatprep.subr.bf16.mxu1 %v7816_v28  ;;  %6093 = vmatprep.subr.bf16.mxu0 %v7988_v33 }
0x1e6a   :  { %6063 = vmatpush1.bf16.msra.mxu1 %v7824_v25  ;;  %6095 = vmatpush1.bf16.msra.mxu0 %v8003_v56 }
0x1e6b   :  { %6065 = vmatprep.subr.bf16.mxu1 %v7834_v58  ;;  %6097 = vmatprep.subr.bf16.mxu0 %v8006_v55 }
0x1e6e   :  { %6067 = vmatpush1.bf16.msra.mxu1 %v7842_v61  ;;  %6099 = vmatpush1.bf16.msra.mxu0 %v8734_v29 }
0x1e6f   :  { %6101 = vmatprep.subr.bf16.mxu1 %v8735_v15  ;;  %6133 = vmatprep.subr.bf16.mxu0 %v8736_v38 }
0x1f24   :  { %v4127_v18 = vpop.f32.mrb[34].mxu1  ;;  %v4198_v36 = vpop.f32.mrb[40].mxu0 }
0x1f25   :  { %v4203_v44 = vadd.f32 %v4127_v18, %v8745_v23  ;;  %v4205_v39 = vadd.f32 %v4198_v36, %v8746_v16  ;;  %v4129_v30 = vpop.f32.mrb[35].mxu1  ;;  %v4200_v26 = vpop.f32.mrb[41].mxu0 }
0x1f26   :  { %v4204_v13 = vadd.f32 %v4129_v30, %v8747_v49  ;;  %v4206_v10 = vadd.f32 %v4200_v26, %v8168_v9 }
0x1f27   :  { %v4207_v42 = vadd.f32 %v4203_v44, %v8052_v2  ;;  %v4209_v8 = vadd.f32 %v4205_v39, %v8231_v34 }
0x1f28   :  { %v4208_v48 = vadd.f32 %v4204_v13, %v8739_v19  ;;  %v4210_v14 = vadd.f32 %v4206_v10, %v8236_v21 }
0x1f29   :  { %v5169_v57 = vmul.f32 -1.442695, %v4207_v42 }
0x1f2a   :  { %v5170_v46 = vmul.f32 -1.442695, %v4208_v48  ;;  %v5171_v45 = vmul.f32 -1.442695, %v4210_v14 }
0x1f2b   :  { %6446 = vpow2.f32 %v5169_v57 }
0x1f2c   :  { %6448 = vpow2.f32 %v5170_v46 }
0x1f2d   :  { %6450 = vpow2.f32 %v5171_v45 }
0x1f2e   :  { %6452 = vtanh.f32 %v4209_v8 }
0x1f35   :  { %v6447_v43 = vpop.eup %6446 }
0x1f36   :  { %v6449_v27 = vpop.eup %6448  ;;  %v4214_v18 = vadd.f32 1.0, %v6447_v43 }
0x1f37   :  { %v4220_v36 = vadd.f32 1.0, %v6449_v27  ;;  %v6451_v9 = vpop.eup %6450  ;;  %v8748_v27 = vld [vmem:[#allocation54_spill] sm:$0xff] }
0x1f38   :  { %6454 = vrcp.f32 %v4214_v18  ;;  %v6453_v23 = vpop.eup %6452  ;;  %v4227_v26 = vadd.f32 1.0, %v6451_v9 }
0x1f39   :  { %6456 = vrcp.f32 %v4220_v36  ;;  %v8749_v36 = vld [vmem:[#allocation55_spill] sm:$0xff] }
0x1f3a   :  { %6458 = vrcp.f32 %v4227_v26 }
0x1f42   :  { %v6455_v44 = vpop.eup %6454 }
0x1f43   :  { %v6457_v16 = vpop.eup %6456  ;;  %v4231_v30 = vmul.f32 %v6455_v44, %v6453_v23 }
0x1f44   :  { %v4230_v49 = vmul.f32 %v6457_v16, %v8396_v0  ;;  %v6459_v39 = vpop.eup %6458 }
0x1f46   :  { %v8448_v13 = vadd.f32 %v4231_v30, %v4230_v49 }
0x1f48   :  { %6460 = vtanh.f32 %v8448_v13 }
0x1f52   :  { %v6461_v10 = vpop.eup %6460 }
0x1f53   :  { %v4234_v42 = vmul.f32 %v6461_v10, %v6459_v39 }
0x1f55   :  { %4320 = vmatmul.mubr.f32.vlgmr.msra.gmra.mrb[36].mxu1 %v4234_v42  ;;  %4391 = vmatmul.mubr.f32.vlgmr.msra.gmra.mrb[42].mxu0 %v4234_v42  ;;  %v4827_v48 = vrot.slane %v4234_v42, 4  ;;  %v4953_v57 = vrot.slane %v4234_v42, 5 }
0x1f56   :  { %6103 = vmatpush1.bf16.msra.mxu1 %v7717_v60  ;;  %6135 = vmatpush1.bf16.msra.mxu0 %v7891_v11 }
0x1f57   :  { %6105 = vmatprep.subr.bf16.mxu1 %v7726_v3  ;;  %6137 = vmatprep.subr.bf16.mxu0 %v7894_v51  ;;  %v8456_v0 = vsel %vm4843_vm0, %v8404_v59, %v4827_v48  ;;  %v8459_v46 = vsel %vm4843_vm0, %v8407_v37, %v4953_v57 }
0x1f58   :  { %4513 = vmatprep.mubr.f32.mxu1 %v8733_v63  ;;  %4584 = vmatprep.mubr.f32.mxu0 %v8733_v63 }
0x1f5a   :  { %6107 = vmatpush1.bf16.msra.mxu1 %v7734_v17  ;;  %6139 = vmatpush1.bf16.msra.mxu0 %v7911_v53 }
0x1f5b   :  { %6109 = vmatprep.subr.bf16.mxu1 %v7744_v1  ;;  %6141 = vmatprep.subr.bf16.mxu0 %v7914_v54 }
0x1f5e   :  { %6111 = vmatpush1.bf16.msra.mxu1 %v7752_v6  ;;  %6143 = vmatpush1.bf16.msra.mxu0 %v7930_v5 }
0x1f5f   :  { %6113 = vmatprep.subr.bf16.mxu1 %v7762_v12  ;;  %6145 = vmatprep.subr.bf16.mxu0 %v7934_v62 }
0x1f62   :  { %6115 = vmatpush1.bf16.msra.mxu1 %v7770_v20  ;;  %6147 = vmatpush1.bf16.msra.mxu0 %v7949_v4 }
0x1f63   :  { %6117 = vmatprep.subr.bf16.mxu1 %v7780_v32  ;;  %6149 = vmatprep.subr.bf16.mxu0 %v7952_v7 }
0x1f66   :  { %6119 = vmatpush1.bf16.msra.mxu1 %v7788_v35  ;;  %6151 = vmatpush1.bf16.msra.mxu0 %v7967_v22 }
0x1f67   :  { %6121 = vmatprep.subr.bf16.mxu1 %v7798_v41  ;;  %6153 = vmatprep.subr.bf16.mxu0 %v7970_v24 }
0x1f6a   :  { %6123 = vmatpush1.bf16.msra.mxu1 %v7806_v50  ;;  %6155 = vmatpush1.bf16.msra.mxu0 %v7985_v31 }
0x1f6b   :  { %6125 = vmatprep.subr.bf16.mxu1 %v7816_v28  ;;  %6157 = vmatprep.subr.bf16.mxu0 %v7988_v33 }
0x1f6e   :  { %6127 = vmatpush1.bf16.msra.mxu1 %v7824_v25  ;;  %6159 = vmatpush1.bf16.msra.mxu0 %v8003_v56 }
0x1f6f   :  { %6129 = vmatprep.subr.bf16.mxu1 %v7834_v58  ;;  %6161 = vmatprep.subr.bf16.mxu0 %v8006_v55 }
0x1f72   :  { %6131 = vmatpush1.bf16.msra.mxu1 %v7842_v61  ;;  %6163 = vmatpush1.bf16.msra.mxu0 %v8734_v29 }
0x1f73   :  { %6165 = vmatprep.subr.bf16.mxu1 %v8735_v15  ;;  %6197 = vmatprep.subr.bf16.mxu0 %v8736_v38 }
0x2028   :  { %v4321_v59 = vpop.f32.mrb[36].mxu1  ;;  %v4392_v37 = vpop.f32.mrb[42].mxu0 }
0x2029   :  { %v4397_v14 = vadd.f32 %v4321_v59, %v8173_v47  ;;  %v4399_v45 = vadd.f32 %v4392_v37, %v8177_v52  ;;  %v4323_v8 = vpop.f32.mrb[37].mxu1  ;;  %v4394_v43 = vpop.f32.mrb[43].mxu0 }
0x202a   :  { %v4398_v18 = vadd.f32 %v4323_v8, %v8748_v27  ;;  %v4400_v9 = vadd.f32 %v4394_v43, %v8749_v36 }
0x202b   :  { %v4401_v23 = vadd.f32 %v4397_v14, %v8052_v2  ;;  %v4403_v47 = vadd.f32 %v4399_v45, %v8231_v34 }
0x202c   :  { %v4402_v44 = vadd.f32 %v4398_v18, %v8739_v19  ;;  %v4404_v38 = vadd.f32 %v4400_v9, %v8236_v21 }
0x202d   :  { %v5172_v16 = vmul.f32 -1.442695, %v4401_v23 }
0x202e   :  { %v5173_v15 = vmul.f32 -1.442695, %v4402_v44  ;;  %v5174_v30 = vmul.f32 -1.442695, %v4404_v38  ;;  %v4851_v38 = vld [vmem:[%s8753_s21] sm:$0xff] }
0x202f   :  { %6462 = vpow2.f32 %v5172_v16 }
0x2030   :  { %6464 = vpow2.f32 %v5173_v15 }
0x2031   :  { %6466 = vpow2.f32 %v5174_v30  ;;  %v4852_v30 = vld [vmem:[%s8753_s21 + $0x8] sm:$0xff] }
0x2032   :  { %6468 = vtanh.f32 %v4403_v47  ;;  %v6229_v47 = vpack.c.bf16 %v4852_v30, %v4851_v38 }
0x2039   :  { %v6463_v52 = vpop.eup %6462 }
0x203a   :  { %v6465_v26 = vpop.eup %6464  ;;  %v4408_v49 = vadd.f32 1.0, %v6463_v52  ;;  %v4853_v52 = vld [vmem:[%s8753_s21 + $0x10] sm:$0xff] }
0x203b   :  { %v4414_v39 = vadd.f32 1.0, %v6465_v26  ;;  %v6467_v10 = vpop.eup %6466  ;;  %v6959_v26 = vmov 0.0|0.0  }
0x203c   :  { %6470 = vrcp.f32 %v4408_v49  ;;  %v6469_v42 = vpop.eup %6468  ;;  %v4421_v37 = vadd.f32 1.0, %v6467_v10  ;;  %v4856_v10 = vld [vmem:[%s8753_s21 + $0x28] sm:$0xff] }
0x203d   :  { %6472 = vrcp.f32 %v4414_v39  ;;  %v4855_v39 = vld [vmem:[%s8753_s21 + $0x20] sm:$0xff] }
0x203e   :  { %6474 = vrcp.f32 %v4421_v37  ;;  %v4859_v37 = vld [vmem:[%s8753_s21 + $0x40] sm:$0xff] }
0x2046   :  { %v6471_v48 = vpop.eup %6470 }
0x2047   :  { %v6473_v57 = vpop.eup %6472  ;;  %v4425_v59 = vmul.f32 %v6471_v48, %v6469_v42  ;;  %v6235_v42 = vpack.c.bf16 %v4856_v10, %v4855_v39  ;;  %v4857_v48 = vld [vmem:[%s8753_s21 + $0x30] sm:$0xff] }
0x2048   :  { %v4424_v14 = vmul.f32 %v6473_v57, %v8448_v13  ;;  %v6475_v45 = vpop.eup %6474  ;;  %v4858_v57 = vld [vmem:[%s8753_s21 + $0x38] sm:$0xff] }
0x204a   :  { %v8500_v8 = vadd.f32 %v4425_v59, %v4424_v14  ;;  %v6238_v59 = vpack.c.bf16 %v4858_v57, %v4857_v48  ;;  %v4860_v14 = vld [vmem:[%s8753_s21 + $0x48] sm:$0xff] }
0x204c   :  { %6476 = vtanh.f32 %v8500_v8 }
0x2056   :  { %v6477_v43 = vpop.eup %6476 }
0x2057   :  { %v4428_v27 = vmul.f32 %v6477_v43, %v6475_v45  ;;  %v4861_v45 = vld [vmem:[%s8753_s21 + $0x50] sm:$0xff]  ;;  %v4862_v43 = vld [vmem:[%s8753_s21 + $0x58] sm:$0xff] }
0x2059   :  { %4514 = vmatmul.mubr.f32.vlgmr.msra.gmra.mrb[38].mxu1 %v4428_v27  ;;  %4585 = vmatmul.mubr.f32.vlgmr.msra.gmra.mrb[44].mxu0 %v4428_v27  ;;  %v4830_v18 = vrot.slane %v4428_v27, 3  ;;  %v4955_v36 = vrot.slane %v4428_v27, 4  ;;  %v6244_v27 = vpack.c.bf16 %v4862_v43, %v4861_v45 }
0x205a   :  { %6167 = vmatpush1.bf16.msra.mxu1 %v7717_v60  ;;  %6199 = vmatpush1.bf16.msra.mxu0 %v7891_v11 }
0x205b   :  { %6169 = vmatprep.subr.bf16.mxu1 %v7726_v3  ;;  %6201 = vmatprep.subr.bf16.mxu0 %v7894_v51  ;;  %v8508_v13 = vsel %vm4845_vm1, %v8456_v0, %v4830_v18  ;;  %v8511_v9 = vsel %vm4845_vm1, %v8459_v46, %v4955_v36  ;;  %v4863_v18 = vld [vmem:[%s8753_s21 + $0x60] sm:$0xff]  ;;  %v4864_v36 = vld [vmem:[%s8753_s21 + $0x68] sm:$0xff] }
0x205c   :  { %4707 = vmatprep.mubr.f32.mxu1 %v8733_v63  ;;  %4778 = vmatprep.mubr.f32.mxu0 %v8733_v63 }
0x205e   :  { %6171 = vmatpush1.bf16.msra.mxu1 %v7734_v17  ;;  %6203 = vmatpush1.bf16.msra.mxu0 %v7911_v53  ;;  %v8750_v17 = vld [vmem:[#allocation56_spill] sm:$0xff] }
0x205f   :  { %6173 = vmatprep.subr.bf16.mxu1 %v7744_v1  ;;  %6205 = vmatprep.subr.bf16.mxu0 %v7914_v54 }
0x2062   :  { %6175 = vmatpush1.bf16.msra.mxu1 %v7752_v6  ;;  %6207 = vmatpush1.bf16.msra.mxu0 %v7930_v5  ;;  %v8751_v6 = vld [vmem:[#allocation57_spill] sm:$0xff] }
0x2063   :  { %6177 = vmatprep.subr.bf16.mxu1 %v7762_v12  ;;  %6209 = vmatprep.subr.bf16.mxu0 %v7934_v62 }
0x2066   :  { %6179 = vmatpush1.bf16.msra.mxu1 %v7770_v20  ;;  %6211 = vmatpush1.bf16.msra.mxu0 %v7949_v4 }
0x2067   :  { %6181 = vmatprep.subr.bf16.mxu1 %v7780_v32  ;;  %6213 = vmatprep.subr.bf16.mxu0 %v7952_v7 }
0x206a   :  { %6183 = vmatpush1.bf16.msra.mxu1 %v7788_v35  ;;  %6215 = vmatpush1.bf16.msra.mxu0 %v7967_v22 }
0x206b   :  { %6185 = vmatprep.subr.bf16.mxu1 %v7798_v41  ;;  %6217 = vmatprep.subr.bf16.mxu0 %v7970_v24  ;;  %v8752_v41 = vld [vmem:[#allocation58_spill] sm:$0xff] }
0x206e   :  { %6187 = vmatpush1.bf16.msra.mxu1 %v7806_v50  ;;  %6219 = vmatpush1.bf16.msra.mxu0 %v7985_v31 }
0x206f   :  { %6189 = vmatprep.subr.bf16.mxu1 %v7816_v28  ;;  %6221 = vmatprep.subr.bf16.mxu0 %v7988_v33 }
0x2072   :  { %6191 = vmatpush1.bf16.msra.mxu1 %v7824_v25  ;;  %6223 = vmatpush1.bf16.msra.mxu0 %v8003_v56 }
0x2073   :  { %6193 = vmatprep.subr.bf16.mxu1 %v7834_v58  ;;  %6225 = vmatprep.subr.bf16.mxu0 %v8006_v55 }
0x2076   :  { %6195 = vmatpush1.bf16.msra.mxu1 %v7842_v61  ;;  %6227 = vmatpush1.bf16.msra.mxu0 %v8734_v29 }
0x2077   :  { %6228 = vmatprep.subr.bf16.mxu1 %v6959_v26  ;;  %6252 = vmatprep.subr.bf16.mxu0 %v6959_v26 }
0x212c   :  { %v4515_v60 = vpop.f32.mrb[38].mxu1  ;;  %v4586_v3 = vpop.f32.mrb[44].mxu0 }
0x212d   :  { %v4591_v1 = vadd.f32 %v4515_v60, %v8750_v17  ;;  %v4593_v12 = vadd.f32 %v4586_v3, %v8751_v6  ;;  %v4517_v20 = vpop.f32.mrb[39].mxu1  ;;  %v4588_v32 = vpop.f32.mrb[45].mxu0  ;;  %v4866_v60 = vld [vmem:[%s8753_s21 + $0x78] sm:$0xff]  ;;  %v8754_v6 = vld [vmem:[#allocation59_spill] sm:$0xff] }
0x212e   :  { %v4592_v35 = vadd.f32 %v4517_v20, %v8203_v40  ;;  %v4594_v50 = vadd.f32 %v4588_v32, %v8752_v41  ;;  %v8755_v20 = vld [vmem:[#allocation60_spill] sm:$0xff] }
0x212f   :  { %v4595_v28 = vadd.f32 %v4591_v1, %v8052_v2  ;;  %v4597_v53 = vadd.f32 %v4593_v12, %v8231_v34 }
0x2130   :  { %v4596_v25 = vadd.f32 %v4592_v35, %v8739_v19  ;;  %v4598_v11 = vadd.f32 %v4594_v50, %v8236_v21  ;;  %v8756_v50 = vld [vmem:[#allocation61_spill] sm:$0xff] }
0x2131   :  { %v5175_v58 = vmul.f32 -1.442695, %v4595_v28 }
0x2132   :  { %v5176_v61 = vmul.f32 -1.442695, %v4596_v25  ;;  %v5177_v51 = vmul.f32 -1.442695, %v4598_v11  ;;  %v8757_v25 = vld [vmem:[#allocation62_spill] sm:$0xff] }
0x2133   :  { %6478 = vpow2.f32 %v5175_v58 }
0x2134   :  { %6480 = vpow2.f32 %v5176_v61 }
0x2135   :  { %6482 = vpow2.f32 %v5177_v51 }
0x2136   :  { %6484 = vtanh.f32 %v4597_v53 }
0x213d   :  { %v6479_v54 = vpop.eup %6478 }
0x213e   :  { %v6481_v5 = vpop.eup %6480  ;;  %v4602_v62 = vadd.f32 1.0, %v6479_v54 }
0x213f   :  { %v4608_v4 = vadd.f32 1.0, %v6481_v5  ;;  %v6483_v7 = vpop.eup %6482 }
0x2140   :  { %6486 = vrcp.f32 %v4602_v62  ;;  %v6485_v22 = vpop.eup %6484  ;;  %v4615_v56 = vadd.f32 1.0, %v6483_v7 }
0x2141   :  { %6488 = vrcp.f32 %v4608_v4 }
0x2142   :  { %6490 = vrcp.f32 %v4615_v56 }
0x214a   :  { %v6487_v24 = vpop.eup %6486 }
0x214b   :  { %v6489_v31 = vpop.eup %6488  ;;  %v4619_v33 = vmul.f32 %v6487_v24, %v6485_v22 }
0x214c   :  { %v4618_v55 = vmul.f32 %v6489_v31, %v8500_v8  ;;  %v6491_v29 = vpop.eup %6490  ;;  %v6241_v8 = vpack.c.bf16 %v4860_v14, %v4859_v37 }
0x214e   :  { %v8550_v40 = vadd.f32 %v4619_v33, %v4618_v55 }
0x2150   :  { %6492 = vtanh.f32 %v8550_v40 }
0x215a   :  { %v6493_v0 = vpop.eup %6492 }
0x215b   :  { %v4622_v46 = vmul.f32 %v6493_v0, %v6491_v29 }
0x215d   :  { %4708 = vmatmul.mubr.f32.vlgmr.msra.gmra.mrb[40].mxu1 %v4622_v46  ;;  %4779 = vmatmul.mubr.f32.vlgmr.msra.gmra.mrb[46].mxu0 %v4622_v46  ;;  %v4833_v23 = vrot.slane %v4622_v46, 2  ;;  %v4957_v44 = vrot.slane %v4622_v46, 3 }
0x215e   :  { %5562 = vmatprep.mubr.msk.f32.mxu1 %vm6952_vm7, %v8733_v63  ;;  %5597 = vmatprep.mubr.msk.f32.mxu0 %vm6952_vm7, %v8733_v63  ;;  %v4854_v63 = vld [vmem:[%s8753_s21 + $0x18] sm:$0xff] }
0x215f   :  { %v8558_v16 = vsel %vm4847_vm2, %v8508_v13, %v4833_v23  ;;  %v8561_v15 = vsel %vm4847_vm2, %v8511_v9, %v4957_v44  ;;  %6230 = vmatpush3.bf16.msra.mxu1 %v6229_v47  ;;  %6254 = vmatpush3.bf16.msra.mxu0 %v6229_v47  ;;  %v6232_v49 = vpack.c.bf16 %v4854_v63, %v4853_v52  ;;  %v4865_v9 = vld [vmem:[%s8753_s21 + $0x70] sm:$0xff]  ;;  %v5181_v47 = vld [vmem:[#allocation28] ss:$0 sm:$0xff] }
0x2160   :  { %6231 = vmatprep.subr.bf16.mxu1 %v6959_v26  ;;  %6255 = vmatprep.subr.bf16.mxu0 %v6959_v26  ;;  %v6247_v13 = vpack.c.bf16 %v4864_v36, %v4863_v18  ;;  %v6250_v3 = vpack.c.bf16 %v4866_v60, %v4865_v9 }
0x2163   :  { %6233 = vmatpush3.bf16.msra.mxu1 %v6232_v49  ;;  %6257 = vmatpush3.bf16.msra.mxu0 %v6232_v49 }
0x2164   :  { %6234 = vmatprep.subr.bf16.mxu1 %v6959_v26  ;;  %6258 = vmatprep.subr.bf16.mxu0 %v6959_v26 }
0x2167   :  { %6236 = vmatpush3.bf16.msra.mxu1 %v6235_v42  ;;  %6260 = vmatpush3.bf16.msra.mxu0 %v6235_v42 }
0x2168   :  { %6237 = vmatprep.subr.bf16.mxu1 %v6959_v26  ;;  %6261 = vmatprep.subr.bf16.mxu0 %v6959_v26 }
0x216b   :  { %6239 = vmatpush3.bf16.msra.mxu1 %v6238_v59  ;;  %6263 = vmatpush3.bf16.msra.mxu0 %v6238_v59 }
0x216c   :  { %6240 = vmatprep.subr.bf16.mxu1 %v6959_v26  ;;  %6264 = vmatprep.subr.bf16.mxu0 %v6959_v26 }
0x216f   :  { %6242 = vmatpush3.bf16.msra.mxu1 %v6241_v8  ;;  %6266 = vmatpush3.bf16.msra.mxu0 %v6241_v8 }
0x2170   :  { %6243 = vmatprep.subr.bf16.mxu1 %v6959_v26  ;;  %6267 = vmatprep.subr.bf16.mxu0 %v6959_v26 }
0x2173   :  { %6245 = vmatpush3.bf16.msra.mxu1 %v6244_v27  ;;  %6269 = vmatpush3.bf16.msra.mxu0 %v6244_v27 }
0x2174   :  { %6246 = vmatprep.subr.bf16.mxu1 %v6959_v26  ;;  %6270 = vmatprep.subr.bf16.mxu0 %v6959_v26 }
0x2177   :  { %6248 = vmatpush3.bf16.msra.mxu1 %v6247_v13  ;;  %6272 = vmatpush3.bf16.msra.mxu0 %v6247_v13 }
0x2178   :  { %6249 = vmatprep.subr.bf16.mxu1 %v6959_v26  ;;  %6273 = vmatprep.subr.bf16.mxu0 %v6959_v26 }
0x217b   :  { %6251 = vmatpush3.bf16.msra.mxu1 %v6250_v3  ;;  %6275 = vmatpush3.bf16.msra.mxu0 %v6250_v3 }
0x2230   :  { %v4709_v17 = vpop.f32.mrb[40].mxu1  ;;  %v4780_v1 = vpop.f32.mrb[46].mxu0 }
0x2231   :  { %v4785_v12 = vadd.f32 %v4709_v17, %v8754_v6  ;;  %v4787_v32 = vadd.f32 %v4780_v1, %v8755_v20  ;;  %v4711_v35 = vpop.f32.mrb[41].mxu1  ;;  %v4782_v41 = vpop.f32.mrb[47].mxu0 }
0x2232   :  { %v4786_v28 = vadd.f32 %v4711_v35, %v8756_v50  ;;  %v4788_v58 = vadd.f32 %v4782_v41, %v8757_v25 }
0x2233   :  { %v4789_v61 = vadd.f32 %v4785_v12, %v8052_v2  ;;  %v4791_v62 = vadd.f32 %v4787_v32, %v8231_v34 }
0x2234   :  { %v4790_v11 = vadd.f32 %v4786_v28, %v8739_v19  ;;  %v4792_v54 = vadd.f32 %v4788_v58, %v8236_v21 }
0x2235   :  { %v5178_v51 = vmul.f32 -1.442695, %v4789_v61 }
0x2236   :  { %v5179_v53 = vmul.f32 -1.442695, %v4790_v11  ;;  %v5180_v5 = vmul.f32 -1.442695, %v4792_v54 }
0x2237   :  { %6494 = vpow2.f32 %v5178_v51 }
0x2238   :  { %6496 = vpow2.f32 %v5179_v53 }
0x2239   :  { %6498 = vpow2.f32 %v5180_v5 }
0x223a   :  { %6500 = vtanh.f32 %v4791_v62 }
0x2241   :  { %v6495_v4 = vpop.eup %6494 }
0x2242   :  { %v6497_v7 = vpop.eup %6496  ;;  %v4796_v22 = vadd.f32 1.0, %v6495_v4 }
0x2243   :  { %v4802_v24 = vadd.f32 1.0, %v6497_v7  ;;  %v6499_v2 = vpop.eup %6498 }
0x2244   :  { %6502 = vrcp.f32 %v4796_v22  ;;  %v6501_v31 = vpop.eup %6500  ;;  %v4809_v55 = vadd.f32 1.0, %v6499_v2 }
0x2245   :  { %6504 = vrcp.f32 %v4802_v24 }
0x2246   :  { %6506 = vrcp.f32 %v4809_v55 }
0x224e   :  { %v6503_v19 = vpop.eup %6502 }
0x224f   :  { %v6505_v33 = vpop.eup %6504  ;;  %v4813_v56 = vmul.f32 %v6503_v19, %v6501_v31 }
0x2250   :  { %v4812_v29 = vmul.f32 %v6505_v33, %v8550_v40  ;;  %v6507_v34 = vpop.eup %6506 }
0x2252   :  { %v4814_v21 = vadd.f32 %v4813_v56, %v4812_v29 }
0x2254   :  { %6508 = vtanh.f32 %v4814_v21 }
0x225e   :  { %v6509_v0 = vpop.eup %6508 }
0x225f   :  { %v4816_v46 = vmul.f32 %v6509_v0, %v6507_v34 }
0x2261   :  { %v4836_v23 = vrot.slane %v4816_v46, 1  ;;  %v4959_v44 = vrot.slane %v4816_v46, 2 }
0x2263   :  { %v4850_v38 = vsel %vm4849_vm3, %v8558_v16, %v4836_v23  ;;  %v4967_v30 = vsel %vm4849_vm3, %v8561_v15, %v4959_v44 }
0x2264   :  { %5563 = vmatmul.mubr.f32.vlgmr.msra.gmra.mrb[42].mxu1 %v4850_v38  ;;  %5598 = vmatmul.mubr.f32.vlgmr.msra.gmra.mrb[48].mxu0 %v4967_v30 }
0x2337   :  { %v4940_v52 = vpop.f32.mrb[42].mxu1  ;;  %v5057_v63 = vpop.f32.mrb[48].mxu0 }
0x2338   :  { %v4941_v40 = vadd.f32 %v5181_v47, %v4940_v52  ;;  %v5058_v26 = vadd.f32 %v5181_v47, %v5057_v63  ;;  %v5564_v49 = vpop.f32.mrb[43].mxu1  ;;  %v5599_v39 = vpop.f32.mrb[49].mxu0 }
0x233a   :  { %4945 = vst.msk [vmem:[%s8758_s9] sm:$0xff] %vm4944_vm4, %v4941_v40  ;;  %5183 = vst.msk [vmem:[%s8758_s9 + $0x8] sm:$0xff] %vm4944_vm4, %v5058_v26 }
0x233b   :  { %5067 = vsyncpa [#allocation3], 1 }
0x233c   :  { %5068 = vsyncpa [#allocation5], 1 }
0x233d   :  { %5069 = vsyncpa [#allocation8], 1 }
0x233e   :  { %5070 = vsyncpa [#allocation11], 1 }
0x233f   :  { %5071 = vsyncpa [#allocation14], 1 }
0x2340   :  { %5072 = vsyncpa [#allocation17], 1 }
0x2341   :  { %5073 = vsyncpa [#allocation20], 1 }
0x2342   :  { %5074 = vsyncpa [#allocation23], 1 }
0x2343   :  { %5075 = vsyncpa [#allocation26], 1 }
0x2344   :  { %5076 = vsyncpa [#allocation29], 1 }

</bundles_post_ra>
